<compile_context>
chip_gen: v7x
topology: tpu7x:2x2x1
jax: 0.10.0
libtpu: 0.0.40
codegen_flags: <defaults>
</compile_context>

<pallas_src>
import functools

import jax
import jax.numpy as jnp
from jax import lax
from jax.experimental import pallas as pl
from jax.experimental.pallas import tpu as pltpu

_LANE = 128
_MAX_STATIC_UNROLL = 256      # reduction lengths above this use a fori_loop body


def _round_up(n, m):
    return -(-n // m) * m


@functools.lru_cache(maxsize=None)
def _vmem_budgets():
    """Generation-aware (vmem_limit_bytes, tile-planning budget)."""
    cap = 64 * 1024 * 1024                      # conservative fallback (v7x per-TC)
    try:
        cap = int(pltpu.get_tpu_info().vmem_capacity_bytes)
    except Exception:
        pass
    # ~60% of physical VMEM, capped well below the 128 MiB parts:
    #   v5e/v6e (128 MiB) -> ~77 MiB, v7x (64 MiB) -> ~38 MiB.
    limit = max(min(int(cap * 0.60), 96 * 1024 * 1024), 16 * 1024 * 1024)
    return limit, limit // 2


def plan_tiling(L, K, OCp, *, out_bytes=4, target_block_lanes=1024,
                vmem_budget_bytes=None):
    """Pick (tL, Lp, tK, Kp).

    tL: lane tile (multiple of 128).  tK == K (single grid step over the
    reduction) whenever the weight tile fits VMEM; otherwise K becomes an extra
    'arbitrary' grid axis with tK a multiple of 32.
    """
    if vmem_budget_bytes is None:
        vmem_budget_bytes = _vmem_budgets()[1]

    def per_lane_bytes(tK, multi_k):
        b = (2 * tK * OCp * 2                 # weight blocks, bf16, double-buffered
             + 2 * _round_up(tK, 16) * 2      # patch  blocks, bf16, double-buffered
             + 2 * OCp * 4                    # bias blocks, f32
             + 2 * OCp * out_bytes)           # output blocks
        if multi_k:
            b += OCp * 4                      # f32 accumulator scratch
        if tK > _MAX_STATIC_UNROLL:
            b += _round_up(tK, 8) * 4         # f32 patch scratch (fori-loop body)
        return b

    tK, Kp, multi_k = K, K, False
    if per_lane_bytes(K, False) * _LANE > vmem_budget_bytes:
        # Review fix: never silently over-subscribe VMEM at tL=128; instead tile
        # the K reduction as an extra grid axis with a VMEM accumulator.
        multi_k = True
        tK = _round_up(K, 32)
        while tK > 32 and per_lane_bytes(tK, True) * _LANE > vmem_budget_bytes:
            tK = _round_up(tK // 2, 32)
        if per_lane_bytes(tK, True) * _LANE > vmem_budget_bytes:
            raise ValueError(
                "LocalUpsampleConv plan does not fit VMEM even with tK=32: "
                f"K={K}, OCp={OCp}, budget={vmem_budget_bytes} bytes")
        Kp = _round_up(K, tK)

    fit = (vmem_budget_bytes // per_lane_bytes(tK, multi_k)) // _LANE * _LANE
    tL = max(_LANE, min(_round_up(target_block_lanes, _LANE), fit,
                        _round_up(L, _LANE)))

    # Prefer an even number of L tiles so the "parallel" L axis load-balances
    # across the two TensorCores of a dual-core chip (v7x); keep tL >= 256.
    num_l = -(-L // tL)
    if num_l > 1 and num_l % 2 == 1:
        for cand in range(tL - _LANE, 2 * _LANE - 1, -_LANE):
            if (-(-L // cand)) % 2 == 0:
                tL = cand
                break
    Lp = _round_up(L, tL)
    return int(tL), int(Lp), int(tK), int(Kp)


def prepare_conv_params(weight, bias, *, target_block_lanes=1024,
                        out_dtype=jnp.float32):
    """One-time Conv2dLocal parameter re-layout (hoisted out of the forward).

    weight: (OH, OW, OC, IC, kh, kw), bias: (OC, OH, OW)
      -> w_flat: (Kp, OCp, Lp) bf16, K-order (ic, ki, kj), zero-padded
         b_flat: (OCp, Lp) f32
         plan:   static kwargs for local_upsample_conv
    """
    OH, OW, OC, IC, kh, kw = weight.shape
    L = OH * OW
    K = IC * kh * kw
    OCp = _round_up(OC, 8)                    # sublane-aligned output channels
    tL, Lp, tK, Kp = plan_tiling(L, K, OCp,
                                 out_bytes=jnp.dtype(out_dtype).itemsize,
                                 target_block_lanes=target_block_lanes)
    w = jnp.transpose(weight, (3, 4, 5, 2, 0, 1)).reshape(K, OC, L)
    w = jnp.pad(w, ((0, Kp - K), (0, OCp - OC), (0, Lp - L))).astype(jnp.bfloat16)
    b = jnp.pad(bias.reshape(OC, L).astype(jnp.float32),
                ((0, OCp - OC), (0, Lp - L)))
    plan = dict(block_lanes=tL, block_k=tK, out_channels=OC)
    return w, b, plan


def _make_localconv_kernel(tK, oc_chunks, multi_k, use_static):
    """Locally-connected contraction over one (tK, tL) patch tile.

    bf16 multiply / f32 accumulate.  `oc_chunks` bounds the live accumulator;
    `multi_k` adds a VMEM f32 accumulator across the K grid axis; `use_static`
    fully unrolls the reduction with static (Python-int) indices so the packed
    bf16 patch-row extraction is a static sublane slice.
    """
    single_chunk = len(oc_chunks) == 1

    def kernel(patches_ref, w_ref, b_ref, o_ref, *scratch):
        si = 0
        acc_ref = None
        if multi_k:
            acc_ref = scratch[si]
            si += 1
        p32_ref = None
        if not use_static:
            p32_ref = scratch[si]
            si += 1
            # One upcast pass per grid step; the fori body then only does
            # dynamic slicing on an unpacked f32 tile.
            p32_ref[...] = patches_ref[...].astype(jnp.float32)

        if multi_k:
            @pl.when(pl.program_id(2) == 0)
            def _():
                acc_ref[...] = b_ref[...]

        def w_row(k, c0, sz):
            if single_chunk:
                return w_ref[k]
            return w_ref[k, pl.ds(c0, sz), :]

        def contract(c0, sz, init):
            if use_static:
                acc = init
                for k in range(tK):                              # static unroll
                    w = w_row(k, c0, sz)                         # (sz, tL) bf16
                    p = patches_ref[pl.ds(k, 1), :]              # (1,  tL) bf16
                    acc = acc + (w * p).astype(jnp.float32)      # f32 accumulate
                return acc

            def body(k, acc):
                w = w_row(k, c0, sz).astype(jnp.float32)
                p = p32_ref[pl.ds(k, 1), :]
                return acc + w * p
            return lax.fori_loop(0, tK, body, init, unroll=8)

        for c0, sz in oc_chunks:
            if multi_k:
                init = acc_ref[...] if single_chunk else acc_ref[pl.ds(c0, sz), :]
            else:
                init = b_ref[...] if single_chunk else b_ref[pl.ds(c0, sz), :]
            acc = contract(c0, sz, init)
            if multi_k:
                if single_chunk:
                    acc_ref[...] = acc
                else:
                    acc_ref[pl.ds(c0, sz), :] = acc
            else:
                if single_chunk:
                    o_ref[...] = acc.astype(o_ref.dtype)
                else:
                    o_ref[pl.ds(c0, sz), :] = acc.astype(o_ref.dtype)

        if multi_k:
            @pl.when(pl.program_id(2) == pl.num_programs(2) - 1)
            def _():
                o_ref[...] = acc_ref[...].astype(o_ref.dtype)

    return kernel


@functools.partial(jax.jit,
                   static_argnames=("kernel_size", "stride", "upsample",
                                    "block_lanes", "block_k", "out_channels",
                                    "out_dtype"))
def local_upsample_conv(x, w_flat, b_flat, *, kernel_size, stride, upsample,
                        block_lanes, block_k, out_channels,
                        out_dtype=jnp.float32):
    """x: (B, C, H, W) NCHW; w_flat/b_flat/plan from prepare_conv_params."""
    B, C, H, W = x.shape
    k = kernel_size
    pad = k // 2

    # 1) nearest-neighbour upsample   (nn.Upsample(scale_factor=upsample))
    x_up = jnp.repeat(jnp.repeat(x, upsample, axis=2), upsample, axis=3)
    # 2) reflection pad               (nn.ReflectionPad2d(pad))
    x_pad = jnp.pad(x_up, ((0, 0), (0, 0), (pad, pad), (pad, pad)), mode="reflect")
    x_pad = x_pad.astype(jnp.bfloat16)        # quantize once, before im2col copies

    Hp, Wp = x_pad.shape[2], x_pad.shape[3]
    OH = (Hp - (k - 1) - 1) // stride + 1
    OW = (Wp - (k - 1) - 1) // stride + 1
    L, K = OH * OW, C * k * k
    Kp, OCp, Lp = w_flat.shape
    tL, tK, OC = block_lanes, block_k, out_channels
    assert Kp >= K and Kp % tK == 0 and Lp % tL == 0 and L <= Lp
    num_k, num_l = Kp // tK, Lp // tL
    multi_k = num_k > 1
    use_static = tK <= _MAX_STATIC_UNROLL

    # 3) im2col -> (B, Kp, Lp) bf16, K-order (ic, ki, kj), zero-padded tails.
    # TODO(synk): fuse upsample + reflection-pad + im2col into the kernel
    # (memory_space=pl.ANY on x_pad + haloed manual DMA) to drop this k^2-inflated
    # activation round trip — the largest remaining HBM win on v5e/v6e.
    cols = [x_pad[:, :, ki: ki + (OH - 1) * stride + 1: stride,
                        kj: kj + (OW - 1) * stride + 1: stride]
            for ki in range(k) for kj in range(k)]
    patches = jnp.stack(cols, axis=2).reshape(B, K, L)
    patches = jnp.pad(patches, ((0, 0), (0, Kp - K), (0, Lp - L)))

    # Bound the live register accumulator (review guard): <= ~16 f32 vregs.
    cap = max(16, (65536 // (tL * 4)) // 16 * 16)
    if OCp <= cap:
        oc_chunks = ((0, OCp),)
    else:
        oc_chunks, c0 = [], 0
        while c0 < OCp:
            sz = min(cap, OCp - c0)
            oc_chunks.append((c0, sz))
            c0 += sz
        oc_chunks = tuple(oc_chunks)

    kernel = _make_localconv_kernel(tK, oc_chunks, multi_k, use_static)

    out_bytes = jnp.dtype(out_dtype).itemsize
    cost = pl.CostEstimate(
        flops=2 * B * OC * K * L,
        transcendentals=0,
        bytes_accessed=(B * Kp * Lp * 2                                # patches
                        + (B if multi_k else 1) * Kp * OCp * Lp * 2    # weights
                        + OCp * Lp * 4                                 # bias
                        + B * OCp * Lp * out_bytes))                   # output

    scratch_shapes = []
    if multi_k:
        scratch_shapes.append(pltpu.VMEM((OCp, tL), jnp.float32))
    if not use_static:
        scratch_shapes.append(pltpu.VMEM((tK, tL), jnp.float32))

    vmem_limit, _ = _vmem_budgets()

    if multi_k:
        grid = (num_l, B, num_k)
        in_specs = [
            pl.BlockSpec((None, tK, tL), lambda l, b, kk: (b, kk, l)),   # patches
            pl.BlockSpec((tK, OCp, tL), lambda l, b, kk: (kk, 0, l)),    # weights
            pl.BlockSpec((OCp, tL), lambda l, b, kk: (0, l)),            # bias
        ]
        out_spec = pl.BlockSpec((None, OCp, tL), lambda l, b, kk: (b, 0, l))
        dims = ("parallel", "parallel", "arbitrary")
    else:
        grid = (num_l, B)   # L-tiles outermost: weight tile fetched once, reused over B
        in_specs = [
            pl.BlockSpec((None, Kp, tL), lambda l, b: (b, 0, l)),        # patches
            pl.BlockSpec((Kp, OCp, tL), lambda l, b: (0, 0, l)),         # weights
            pl.BlockSpec((OCp, tL), lambda l, b: (0, l)),                # bias
        ]
        out_spec = pl.BlockSpec((None, OCp, tL), lambda l, b: (b, 0, l))
        dims = ("parallel", "parallel")

    out_flat = pl.pallas_call(
        kernel,
        out_shape=jax.ShapeDtypeStruct((B, OCp, Lp), out_dtype),
        grid=grid,
        in_specs=in_specs,
        out_specs=out_spec,
        scratch_shapes=scratch_shapes,
        compiler_params=pltpu.CompilerParams(
            dimension_semantics=dims,
            vmem_limit_bytes=vmem_limit,
        ),
        cost_estimate=cost,
    )(patches, w_flat, b_flat)

    return out_flat[:, :OC, :L].reshape(B, OC, OH, OW).astype(jnp.float32)


def _reference(x, weight, bias, *, kernel_size, stride, upsample, quantize_bf16=False):
    """Pure-JAX reference of the same forward (f32 elementwise math)."""
    k = kernel_size
    pad = k // 2
    x_up = jnp.repeat(jnp.repeat(x, upsample, axis=2), upsample, axis=3)
    x_pad = jnp.pad(x_up, ((0, 0), (0, 0), (pad, pad), (pad, pad)), mode="reflect")
    if quantize_bf16:  # mirror the kernel's bf16 storage of activations / weights
        x_pad = x_pad.astype(jnp.bfloat16).astype(jnp.float32)
        weight = weight.astype(jnp.bfloat16).astype(jnp.float32)
    B, C, Hp, Wp = x_pad.shape
    OH = (Hp - (k - 1) - 1) // stride + 1
    OW = (Wp - (k - 1) - 1) // stride + 1
    OC = weight.shape[2]
    patches = jnp.stack(
        [x_pad[:, :, ki: ki + (OH - 1) * stride + 1: stride,
                     kj: kj + (OW - 1) * stride + 1: stride]
         for ki in range(k) for kj in range(k)], axis=2)
    patches = patches.reshape(B, C * k * k, OH, OW)
    w = jnp.transpose(weight, (3, 4, 5, 2, 0, 1)).reshape(C * k * k, OC, OH, OW)
    out = (patches[:, :, None, :, :] * w[None, :, :, :, :]).sum(axis=1) + bias[None]
    return out


if __name__ == "__main__":
    # Small shapes consistent with the module.
    B, C, H, W = 2, 4, 16, 16
    OC = 8
    kernel_size, stride, upsample = 3, 1, 2

    pad = kernel_size // 2
    in_h = upsample * H + 2 * pad          # input height seen by Conv2dLocal
    in_w = upsample * W + 2 * pad
    OH = (in_h - (kernel_size - 1) - 1) // stride + 1
    OW = (in_w - (kernel_size - 1) - 1) // stride + 1

    key = jax.random.PRNGKey(0)
    kx, kw_, kb = jax.random.split(key, 3)
    x = jax.random.normal(kx, (B, C, H, W), dtype=jnp.float32)
    # Conv2dLocal parameters: weight (OH, OW, OC, IC, kh, kw), bias (OC, OH, OW)
    weight = 0.1 * jax.random.normal(
        kw_, (OH, OW, OC, C, kernel_size, kernel_size), dtype=jnp.float32)
    bias = 0.1 * jax.random.normal(kb, (OC, OH, OW), dtype=jnp.float32)

    # One-time parameter re-layout (hoisted out of the per-call forward).
    w_flat, b_flat, plan = prepare_conv_params(weight, bias)

    out = local_upsample_conv(
        x, w_flat, b_flat, kernel_size=kernel_size, stride=stride,
        upsample=upsample, **plan)
    out = jax.block_until_ready(out)
    assert out.shape == (B, OC, OH, OW), out.shape

    # Check vs a reference with the same bf16 storage of weights / activations.
    # (The kernel additionally rounds each product to bf16 before the f32
    #  accumulation, hence the 1e-2 bound; accumulation itself is f32.)
    ref_q = _reference(x, weight, bias, kernel_size=kernel_size, stride=stride,
                       upsample=upsample, quantize_bf16=True)
    err_q = float(jnp.max(jnp.abs(out - ref_q)))
    assert err_q < 1e-2, err_q

    # Looser check vs the full-f32 PyTorch-semantics reference.
    ref_f = _reference(x, weight, bias, kernel_size=kernel_size, stride=stride,
                       upsample=upsample, quantize_bf16=False)
    err_f = float(jnp.max(jnp.abs(out - ref_f)))
    assert err_f < 5e-2, err_f

    print("KERNEL_OK")
</pallas_src>

<mosaic_0001>
module attributes {stable_mosaic.version = 11 : i64} {
  func.func @kernel(%arg0: i32, %arg1: i32, %arg2: memref<1x36x1024xbf16, #tpu.memory_space<vmem>>, %arg3: memref<36x8x1024xbf16, #tpu.memory_space<vmem>>, %arg4: memref<8x1024xf32, #tpu.memory_space<vmem>>, %arg5: memref<1x8x1024xf32, #tpu.memory_space<vmem>>) attributes {dimension_semantics = [#tpu.dimension_semantics<parallel>, #tpu.dimension_semantics<parallel>], iteration_bounds = array<i64: 1, 2>, scalar_prefetch = 0 : i64, scratch_operands = 0 : i64, tpu.core_type = #tpu.core_type<tc>, window_params = [{transform_indices = @transform_0, window_bounds = array<i64: 1, 36, 1024>}, {transform_indices = @transform_1, window_bounds = array<i64: 36, 8, 1024>}, {transform_indices = @transform_2, window_bounds = array<i64: 8, 1024>}, {transform_indices = @transform_3, window_bounds = array<i64: 1, 8, 1024>}]} {
    %c0 = arith.constant 0 : index
    %c0_0 = arith.constant 0 : index
    %0 = vector.load %arg4[%c0, %c0_0] : memref<8x1024xf32, #tpu.memory_space<vmem>>, vector<8x1024xf32>
    %c0_1 = arith.constant 0 : index
    %c0_2 = arith.constant 0 : index
    %c0_3 = arith.constant 0 : index
    %1 = vector.load %arg3[%c0_1, %c0_2, %c0_3] : memref<36x8x1024xbf16, #tpu.memory_space<vmem>>, vector<1x8x1024xbf16>
    %2 = vector.shape_cast %1 : vector<1x8x1024xbf16> to vector<8x1024xbf16>
    %c0_4 = arith.constant 0 : index
    %c0_5 = arith.constant 0 : index
    %c0_6 = arith.constant 0 : index
    %3 = vector.load %arg2[%c0_4, %c0_5, %c0_6] : memref<1x36x1024xbf16, #tpu.memory_space<vmem>>, vector<1x1x1024xbf16>
    %4 = vector.shape_cast %3 : vector<1x1x1024xbf16> to vector<1x1024xbf16>
    %5 = vector.broadcast %4 : vector<1x1024xbf16> to vector<8x1024xbf16>
    %6 = arith.mulf %2, %5 : vector<8x1024xbf16>
    %7 = arith.extf %6 : vector<8x1024xbf16> to vector<8x1024xf32>
    %8 = arith.addf %0, %7 : vector<8x1024xf32>
    %c1 = arith.constant 1 : index
    %c0_7 = arith.constant 0 : index
    %c0_8 = arith.constant 0 : index
    %9 = vector.load %arg3[%c1, %c0_7, %c0_8] : memref<36x8x1024xbf16, #tpu.memory_space<vmem>>, vector<1x8x1024xbf16>
    %10 = vector.shape_cast %9 : vector<1x8x1024xbf16> to vector<8x1024xbf16>
    %c0_9 = arith.constant 0 : index
    %c1_10 = arith.constant 1 : index
    %c0_11 = arith.constant 0 : index
    %11 = vector.load %arg2[%c0_9, %c1_10, %c0_11] : memref<1x36x1024xbf16, #tpu.memory_space<vmem>>, vector<1x1x1024xbf16>
    %12 = vector.shape_cast %11 : vector<1x1x1024xbf16> to vector<1x1024xbf16>
    %13 = vector.broadcast %12 : vector<1x1024xbf16> to vector<8x1024xbf16>
    %14 = arith.mulf %10, %13 : vector<8x1024xbf16>
    %15 = arith.extf %14 : vector<8x1024xbf16> to vector<8x1024xf32>
    %16 = arith.addf %8, %15 : vector<8x1024xf32>
    %c2 = arith.constant 2 : index
    %c0_12 = arith.constant 0 : index
    %c0_13 = arith.constant 0 : index
    %17 = vector.load %arg3[%c2, %c0_12, %c0_13] : memref<36x8x1024xbf16, #tpu.memory_space<vmem>>, vector<1x8x1024xbf16>
    %18 = vector.shape_cast %17 : vector<1x8x1024xbf16> to vector<8x1024xbf16>
    %c0_14 = arith.constant 0 : index
    %c2_15 = arith.constant 2 : index
    %c0_16 = arith.constant 0 : index
    %19 = vector.load %arg2[%c0_14, %c2_15, %c0_16] : memref<1x36x1024xbf16, #tpu.memory_space<vmem>>, vector<1x1x1024xbf16>
    %20 = vector.shape_cast %19 : vector<1x1x1024xbf16> to vector<1x1024xbf16>
    %21 = vector.broadcast %20 : vector<1x1024xbf16> to vector<8x1024xbf16>
    %22 = arith.mulf %18, %21 : vector<8x1024xbf16>
    %23 = arith.extf %22 : vector<8x1024xbf16> to vector<8x1024xf32>
    %24 = arith.addf %16, %23 : vector<8x1024xf32>
    %c3 = arith.constant 3 : index
    %c0_17 = arith.constant 0 : index
    %c0_18 = arith.constant 0 : index
    %25 = vector.load %arg3[%c3, %c0_17, %c0_18] : memref<36x8x1024xbf16, #tpu.memory_space<vmem>>, vector<1x8x1024xbf16>
    %26 = vector.shape_cast %25 : vector<1x8x1024xbf16> to vector<8x1024xbf16>
    %c0_19 = arith.constant 0 : index
    %c3_20 = arith.constant 3 : index
    %c0_21 = arith.constant 0 : index
    %27 = vector.load %arg2[%c0_19, %c3_20, %c0_21] : memref<1x36x1024xbf16, #tpu.memory_space<vmem>>, vector<1x1x1024xbf16>
    %28 = vector.shape_cast %27 : vector<1x1x1024xbf16> to vector<1x1024xbf16>
    %29 = vector.broadcast %28 : vector<1x1024xbf16> to vector<8x1024xbf16>
    %30 = arith.mulf %26, %29 : vector<8x1024xbf16>
    %31 = arith.extf %30 : vector<8x1024xbf16> to vector<8x1024xf32>
    %32 = arith.addf %24, %31 : vector<8x1024xf32>
    %c4 = arith.constant 4 : index
    %c0_22 = arith.constant 0 : index
    %c0_23 = arith.constant 0 : index
    %33 = vector.load %arg3[%c4, %c0_22, %c0_23] : memref<36x8x1024xbf16, #tpu.memory_space<vmem>>, vector<1x8x1024xbf16>
    %34 = vector.shape_cast %33 : vector<1x8x1024xbf16> to vector<8x1024xbf16>
    %c0_24 = arith.constant 0 : index
    %c4_25 = arith.constant 4 : index
    %c0_26 = arith.constant 0 : index
    %35 = vector.load %arg2[%c0_24, %c4_25, %c0_26] : memref<1x36x1024xbf16, #tpu.memory_space<vmem>>, vector<1x1x1024xbf16>
    %36 = vector.shape_cast %35 : vector<1x1x1024xbf16> to vector<1x1024xbf16>
    %37 = vector.broadcast %36 : vector<1x1024xbf16> to vector<8x1024xbf16>
    %38 = arith.mulf %34, %37 : vector<8x1024xbf16>
    %39 = arith.extf %38 : vector<8x1024xbf16> to vector<8x1024xf32>
    %40 = arith.addf %32, %39 : vector<8x1024xf32>
    %c5 = arith.constant 5 : index
    %c0_27 = arith.constant 0 : index
    %c0_28 = arith.constant 0 : index
    %41 = vector.load %arg3[%c5, %c0_27, %c0_28] : memref<36x8x1024xbf16, #tpu.memory_space<vmem>>, vector<1x8x1024xbf16>
    %42 = vector.shape_cast %41 : vector<1x8x1024xbf16> to vector<8x1024xbf16>
    %c0_29 = arith.constant 0 : index
    %c5_30 = arith.constant 5 : index
    %c0_31 = arith.constant 0 : index
    %43 = vector.load %arg2[%c0_29, %c5_30, %c0_31] : memref<1x36x1024xbf16, #tpu.memory_space<vmem>>, vector<1x1x1024xbf16>
    %44 = vector.shape_cast %43 : vector<1x1x1024xbf16> to vector<1x1024xbf16>
    %45 = vector.broadcast %44 : vector<1x1024xbf16> to vector<8x1024xbf16>
    %46 = arith.mulf %42, %45 : vector<8x1024xbf16>
    %47 = arith.extf %46 : vector<8x1024xbf16> to vector<8x1024xf32>
    %48 = arith.addf %40, %47 : vector<8x1024xf32>
    %c6 = arith.constant 6 : index
    %c0_32 = arith.constant 0 : index
    %c0_33 = arith.constant 0 : index
    %49 = vector.load %arg3[%c6, %c0_32, %c0_33] : memref<36x8x1024xbf16, #tpu.memory_space<vmem>>, vector<1x8x1024xbf16>
    %50 = vector.shape_cast %49 : vector<1x8x1024xbf16> to vector<8x1024xbf16>
    %c0_34 = arith.constant 0 : index
    %c6_35 = arith.constant 6 : index
    %c0_36 = arith.constant 0 : index
    %51 = vector.load %arg2[%c0_34, %c6_35, %c0_36] : memref<1x36x1024xbf16, #tpu.memory_space<vmem>>, vector<1x1x1024xbf16>
    %52 = vector.shape_cast %51 : vector<1x1x1024xbf16> to vector<1x1024xbf16>
    %53 = vector.broadcast %52 : vector<1x1024xbf16> to vector<8x1024xbf16>
    %54 = arith.mulf %50, %53 : vector<8x1024xbf16>
    %55 = arith.extf %54 : vector<8x1024xbf16> to vector<8x1024xf32>
    %56 = arith.addf %48, %55 : vector<8x1024xf32>
    %c7 = arith.constant 7 : index
    %c0_37 = arith.constant 0 : index
    %c0_38 = arith.constant 0 : index
    %57 = vector.load %arg3[%c7, %c0_37, %c0_38] : memref<36x8x1024xbf16, #tpu.memory_space<vmem>>, vector<1x8x1024xbf16>
    %58 = vector.shape_cast %57 : vector<1x8x1024xbf16> to vector<8x1024xbf16>
    %c0_39 = arith.constant 0 : index
    %c7_40 = arith.constant 7 : index
    %c0_41 = arith.constant 0 : index
    %59 = vector.load %arg2[%c0_39, %c7_40, %c0_41] : memref<1x36x1024xbf16, #tpu.memory_space<vmem>>, vector<1x1x1024xbf16>
    %60 = vector.shape_cast %59 : vector<1x1x1024xbf16> to vector<1x1024xbf16>
    %61 = vector.broadcast %60 : vector<1x1024xbf16> to vector<8x1024xbf16>
    %62 = arith.mulf %58, %61 : vector<8x1024xbf16>
    %63 = arith.extf %62 : vector<8x1024xbf16> to vector<8x1024xf32>
    %64 = arith.addf %56, %63 : vector<8x1024xf32>
    %c8 = arith.constant 8 : index
    %c0_42 = arith.constant 0 : index
    %c0_43 = arith.constant 0 : index
    %65 = vector.load %arg3[%c8, %c0_42, %c0_43] : memref<36x8x1024xbf16, #tpu.memory_space<vmem>>, vector<1x8x1024xbf16>
    %66 = vector.shape_cast %65 : vector<1x8x1024xbf16> to vector<8x1024xbf16>
    %c0_44 = arith.constant 0 : index
    %c8_45 = arith.constant 8 : index
    %c0_46 = arith.constant 0 : index
    %67 = vector.load %arg2[%c0_44, %c8_45, %c0_46] : memref<1x36x1024xbf16, #tpu.memory_space<vmem>>, vector<1x1x1024xbf16>
    %68 = vector.shape_cast %67 : vector<1x1x1024xbf16> to vector<1x1024xbf16>
    %69 = vector.broadcast %68 : vector<1x1024xbf16> to vector<8x1024xbf16>
    %70 = arith.mulf %66, %69 : vector<8x1024xbf16>
    %71 = arith.extf %70 : vector<8x1024xbf16> to vector<8x1024xf32>
    %72 = arith.addf %64, %71 : vector<8x1024xf32>
    %c9 = arith.constant 9 : index
    %c0_47 = arith.constant 0 : index
    %c0_48 = arith.constant 0 : index
    %73 = vector.load %arg3[%c9, %c0_47, %c0_48] : memref<36x8x1024xbf16, #tpu.memory_space<vmem>>, vector<1x8x1024xbf16>
    %74 = vector.shape_cast %73 : vector<1x8x1024xbf16> to vector<8x1024xbf16>
    %c0_49 = arith.constant 0 : index
    %c9_50 = arith.constant 9 : index
    %c0_51 = arith.constant 0 : index
    %75 = vector.load %arg2[%c0_49, %c9_50, %c0_51] : memref<1x36x1024xbf16, #tpu.memory_space<vmem>>, vector<1x1x1024xbf16>
    %76 = vector.shape_cast %75 : vector<1x1x1024xbf16> to vector<1x1024xbf16>
    %77 = vector.broadcast %76 : vector<1x1024xbf16> to vector<8x1024xbf16>
    %78 = arith.mulf %74, %77 : vector<8x1024xbf16>
    %79 = arith.extf %78 : vector<8x1024xbf16> to vector<8x1024xf32>
    %80 = arith.addf %72, %79 : vector<8x1024xf32>
    %c10 = arith.constant 10 : index
    %c0_52 = arith.constant 0 : index
    %c0_53 = arith.constant 0 : index
    %81 = vector.load %arg3[%c10, %c0_52, %c0_53] : memref<36x8x1024xbf16, #tpu.memory_space<vmem>>, vector<1x8x1024xbf16>
    %82 = vector.shape_cast %81 : vector<1x8x1024xbf16> to vector<8x1024xbf16>
    %c0_54 = arith.constant 0 : index
    %c10_55 = arith.constant 10 : index
    %c0_56 = arith.constant 0 : index
    %83 = vector.load %arg2[%c0_54, %c10_55, %c0_56] : memref<1x36x1024xbf16, #tpu.memory_space<vmem>>, vector<1x1x1024xbf16>
    %84 = vector.shape_cast %83 : vector<1x1x1024xbf16> to vector<1x1024xbf16>
    %85 = vector.broadcast %84 : vector<1x1024xbf16> to vector<8x1024xbf16>
    %86 = arith.mulf %82, %85 : vector<8x1024xbf16>
    %87 = arith.extf %86 : vector<8x1024xbf16> to vector<8x1024xf32>
    %88 = arith.addf %80, %87 : vector<8x1024xf32>
    %c11 = arith.constant 11 : index
    %c0_57 = arith.constant 0 : index
    %c0_58 = arith.constant 0 : index
    %89 = vector.load %arg3[%c11, %c0_57, %c0_58] : memref<36x8x1024xbf16, #tpu.memory_space<vmem>>, vector<1x8x1024xbf16>
    %90 = vector.shape_cast %89 : vector<1x8x1024xbf16> to vector<8x1024xbf16>
    %c0_59 = arith.constant 0 : index
    %c11_60 = arith.constant 11 : index
    %c0_61 = arith.constant 0 : index
    %91 = vector.load %arg2[%c0_59, %c11_60, %c0_61] : memref<1x36x1024xbf16, #tpu.memory_space<vmem>>, vector<1x1x1024xbf16>
    %92 = vector.shape_cast %91 : vector<1x1x1024xbf16> to vector<1x1024xbf16>
    %93 = vector.broadcast %92 : vector<1x1024xbf16> to vector<8x1024xbf16>
    %94 = arith.mulf %90, %93 : vector<8x1024xbf16>
    %95 = arith.extf %94 : vector<8x1024xbf16> to vector<8x1024xf32>
    %96 = arith.addf %88, %95 : vector<8x1024xf32>
    %c12 = arith.constant 12 : index
    %c0_62 = arith.constant 0 : index
    %c0_63 = arith.constant 0 : index
    %97 = vector.load %arg3[%c12, %c0_62, %c0_63] : memref<36x8x1024xbf16, #tpu.memory_space<vmem>>, vector<1x8x1024xbf16>
    %98 = vector.shape_cast %97 : vector<1x8x1024xbf16> to vector<8x1024xbf16>
    %c0_64 = arith.constant 0 : index
    %c12_65 = arith.constant 12 : index
    %c0_66 = arith.constant 0 : index
    %99 = vector.load %arg2[%c0_64, %c12_65, %c0_66] : memref<1x36x1024xbf16, #tpu.memory_space<vmem>>, vector<1x1x1024xbf16>
    %100 = vector.shape_cast %99 : vector<1x1x1024xbf16> to vector<1x1024xbf16>
    %101 = vector.broadcast %100 : vector<1x1024xbf16> to vector<8x1024xbf16>
    %102 = arith.mulf %98, %101 : vector<8x1024xbf16>
    %103 = arith.extf %102 : vector<8x1024xbf16> to vector<8x1024xf32>
    %104 = arith.addf %96, %103 : vector<8x1024xf32>
    %c13 = arith.constant 13 : index
    %c0_67 = arith.constant 0 : index
    %c0_68 = arith.constant 0 : index
    %105 = vector.load %arg3[%c13, %c0_67, %c0_68] : memref<36x8x1024xbf16, #tpu.memory_space<vmem>>, vector<1x8x1024xbf16>
    %106 = vector.shape_cast %105 : vector<1x8x1024xbf16> to vector<8x1024xbf16>
    %c0_69 = arith.constant 0 : index
    %c13_70 = arith.constant 13 : index
    %c0_71 = arith.constant 0 : index
    %107 = vector.load %arg2[%c0_69, %c13_70, %c0_71] : memref<1x36x1024xbf16, #tpu.memory_space<vmem>>, vector<1x1x1024xbf16>
    %108 = vector.shape_cast %107 : vector<1x1x1024xbf16> to vector<1x1024xbf16>
    %109 = vector.broadcast %108 : vector<1x1024xbf16> to vector<8x1024xbf16>
    %110 = arith.mulf %106, %109 : vector<8x1024xbf16>
    %111 = arith.extf %110 : vector<8x1024xbf16> to vector<8x1024xf32>
    %112 = arith.addf %104, %111 : vector<8x1024xf32>
    %c14 = arith.constant 14 : index
    %c0_72 = arith.constant 0 : index
    %c0_73 = arith.constant 0 : index
    %113 = vector.load %arg3[%c14, %c0_72, %c0_73] : memref<36x8x1024xbf16, #tpu.memory_space<vmem>>, vector<1x8x1024xbf16>
    %114 = vector.shape_cast %113 : vector<1x8x1024xbf16> to vector<8x1024xbf16>
    %c0_74 = arith.constant 0 : index
    %c14_75 = arith.constant 14 : index
    %c0_76 = arith.constant 0 : index
    %115 = vector.load %arg2[%c0_74, %c14_75, %c0_76] : memref<1x36x1024xbf16, #tpu.memory_space<vmem>>, vector<1x1x1024xbf16>
    %116 = vector.shape_cast %115 : vector<1x1x1024xbf16> to vector<1x1024xbf16>
    %117 = vector.broadcast %116 : vector<1x1024xbf16> to vector<8x1024xbf16>
    %118 = arith.mulf %114, %117 : vector<8x1024xbf16>
    %119 = arith.extf %118 : vector<8x1024xbf16> to vector<8x1024xf32>
    %120 = arith.addf %112, %119 : vector<8x1024xf32>
    %c15 = arith.constant 15 : index
    %c0_77 = arith.constant 0 : index
    %c0_78 = arith.constant 0 : index
    %121 = vector.load %arg3[%c15, %c0_77, %c0_78] : memref<36x8x1024xbf16, #tpu.memory_space<vmem>>, vector<1x8x1024xbf16>
    %122 = vector.shape_cast %121 : vector<1x8x1024xbf16> to vector<8x1024xbf16>
    %c0_79 = arith.constant 0 : index
    %c15_80 = arith.constant 15 : index
    %c0_81 = arith.constant 0 : index
    %123 = vector.load %arg2[%c0_79, %c15_80, %c0_81] : memref<1x36x1024xbf16, #tpu.memory_space<vmem>>, vector<1x1x1024xbf16>
    %124 = vector.shape_cast %123 : vector<1x1x1024xbf16> to vector<1x1024xbf16>
    %125 = vector.broadcast %124 : vector<1x1024xbf16> to vector<8x1024xbf16>
    %126 = arith.mulf %122, %125 : vector<8x1024xbf16>
    %127 = arith.extf %126 : vector<8x1024xbf16> to vector<8x1024xf32>
    %128 = arith.addf %120, %127 : vector<8x1024xf32>
    %c16 = arith.constant 16 : index
    %c0_82 = arith.constant 0 : index
    %c0_83 = arith.constant 0 : index
    %129 = vector.load %arg3[%c16, %c0_82, %c0_83] : memref<36x8x1024xbf16, #tpu.memory_space<vmem>>, vector<1x8x1024xbf16>
    %130 = vector.shape_cast %129 : vector<1x8x1024xbf16> to vector<8x1024xbf16>
    %c0_84 = arith.constant 0 : index
    %c16_85 = arith.constant 16 : index
    %c0_86 = arith.constant 0 : index
    %131 = vector.load %arg2[%c0_84, %c16_85, %c0_86] : memref<1x36x1024xbf16, #tpu.memory_space<vmem>>, vector<1x1x1024xbf16>
    %132 = vector.shape_cast %131 : vector<1x1x1024xbf16> to vector<1x1024xbf16>
    %133 = vector.broadcast %132 : vector<1x1024xbf16> to vector<8x1024xbf16>
    %134 = arith.mulf %130, %133 : vector<8x1024xbf16>
    %135 = arith.extf %134 : vector<8x1024xbf16> to vector<8x1024xf32>
    %136 = arith.addf %128, %135 : vector<8x1024xf32>
    %c17 = arith.constant 17 : index
    %c0_87 = arith.constant 0 : index
    %c0_88 = arith.constant 0 : index
    %137 = vector.load %arg3[%c17, %c0_87, %c0_88] : memref<36x8x1024xbf16, #tpu.memory_space<vmem>>, vector<1x8x1024xbf16>
    %138 = vector.shape_cast %137 : vector<1x8x1024xbf16> to vector<8x1024xbf16>
    %c0_89 = arith.constant 0 : index
    %c17_90 = arith.constant 17 : index
    %c0_91 = arith.constant 0 : index
    %139 = vector.load %arg2[%c0_89, %c17_90, %c0_91] : memref<1x36x1024xbf16, #tpu.memory_space<vmem>>, vector<1x1x1024xbf16>
    %140 = vector.shape_cast %139 : vector<1x1x1024xbf16> to vector<1x1024xbf16>
    %141 = vector.broadcast %140 : vector<1x1024xbf16> to vector<8x1024xbf16>
    %142 = arith.mulf %138, %141 : vector<8x1024xbf16>
    %143 = arith.extf %142 : vector<8x1024xbf16> to vector<8x1024xf32>
    %144 = arith.addf %136, %143 : vector<8x1024xf32>
    %c18 = arith.constant 18 : index
    %c0_92 = arith.constant 0 : index
    %c0_93 = arith.constant 0 : index
    %145 = vector.load %arg3[%c18, %c0_92, %c0_93] : memref<36x8x1024xbf16, #tpu.memory_space<vmem>>, vector<1x8x1024xbf16>
    %146 = vector.shape_cast %145 : vector<1x8x1024xbf16> to vector<8x1024xbf16>
    %c0_94 = arith.constant 0 : index
    %c18_95 = arith.constant 18 : index
    %c0_96 = arith.constant 0 : index
    %147 = vector.load %arg2[%c0_94, %c18_95, %c0_96] : memref<1x36x1024xbf16, #tpu.memory_space<vmem>>, vector<1x1x1024xbf16>
    %148 = vector.shape_cast %147 : vector<1x1x1024xbf16> to vector<1x1024xbf16>
    %149 = vector.broadcast %148 : vector<1x1024xbf16> to vector<8x1024xbf16>
    %150 = arith.mulf %146, %149 : vector<8x1024xbf16>
    %151 = arith.extf %150 : vector<8x1024xbf16> to vector<8x1024xf32>
    %152 = arith.addf %144, %151 : vector<8x1024xf32>
    %c19 = arith.constant 19 : index
    %c0_97 = arith.constant 0 : index
    %c0_98 = arith.constant 0 : index
    %153 = vector.load %arg3[%c19, %c0_97, %c0_98] : memref<36x8x1024xbf16, #tpu.memory_space<vmem>>, vector<1x8x1024xbf16>
    %154 = vector.shape_cast %153 : vector<1x8x1024xbf16> to vector<8x1024xbf16>
    %c0_99 = arith.constant 0 : index
    %c19_100 = arith.constant 19 : index
    %c0_101 = arith.constant 0 : index
    %155 = vector.load %arg2[%c0_99, %c19_100, %c0_101] : memref<1x36x1024xbf16, #tpu.memory_space<vmem>>, vector<1x1x1024xbf16>
    %156 = vector.shape_cast %155 : vector<1x1x1024xbf16> to vector<1x1024xbf16>
    %157 = vector.broadcast %156 : vector<1x1024xbf16> to vector<8x1024xbf16>
    %158 = arith.mulf %154, %157 : vector<8x1024xbf16>
    %159 = arith.extf %158 : vector<8x1024xbf16> to vector<8x1024xf32>
    %160 = arith.addf %152, %159 : vector<8x1024xf32>
    %c20 = arith.constant 20 : index
    %c0_102 = arith.constant 0 : index
    %c0_103 = arith.constant 0 : index
    %161 = vector.load %arg3[%c20, %c0_102, %c0_103] : memref<36x8x1024xbf16, #tpu.memory_space<vmem>>, vector<1x8x1024xbf16>
    %162 = vector.shape_cast %161 : vector<1x8x1024xbf16> to vector<8x1024xbf16>
    %c0_104 = arith.constant 0 : index
    %c20_105 = arith.constant 20 : index
    %c0_106 = arith.constant 0 : index
    %163 = vector.load %arg2[%c0_104, %c20_105, %c0_106] : memref<1x36x1024xbf16, #tpu.memory_space<vmem>>, vector<1x1x1024xbf16>
    %164 = vector.shape_cast %163 : vector<1x1x1024xbf16> to vector<1x1024xbf16>
    %165 = vector.broadcast %164 : vector<1x1024xbf16> to vector<8x1024xbf16>
    %166 = arith.mulf %162, %165 : vector<8x1024xbf16>
    %167 = arith.extf %166 : vector<8x1024xbf16> to vector<8x1024xf32>
    %168 = arith.addf %160, %167 : vector<8x1024xf32>
    %c21 = arith.constant 21 : index
    %c0_107 = arith.constant 0 : index
    %c0_108 = arith.constant 0 : index
    %169 = vector.load %arg3[%c21, %c0_107, %c0_108] : memref<36x8x1024xbf16, #tpu.memory_space<vmem>>, vector<1x8x1024xbf16>
    %170 = vector.shape_cast %169 : vector<1x8x1024xbf16> to vector<8x1024xbf16>
    %c0_109 = arith.constant 0 : index
    %c21_110 = arith.constant 21 : index
    %c0_111 = arith.constant 0 : index
    %171 = vector.load %arg2[%c0_109, %c21_110, %c0_111] : memref<1x36x1024xbf16, #tpu.memory_space<vmem>>, vector<1x1x1024xbf16>
    %172 = vector.shape_cast %171 : vector<1x1x1024xbf16> to vector<1x1024xbf16>
    %173 = vector.broadcast %172 : vector<1x1024xbf16> to vector<8x1024xbf16>
    %174 = arith.mulf %170, %173 : vector<8x1024xbf16>
    %175 = arith.extf %174 : vector<8x1024xbf16> to vector<8x1024xf32>
    %176 = arith.addf %168, %175 : vector<8x1024xf32>
    %c22 = arith.constant 22 : index
    %c0_112 = arith.constant 0 : index
    %c0_113 = arith.constant 0 : index
    %177 = vector.load %arg3[%c22, %c0_112, %c0_113] : memref<36x8x1024xbf16, #tpu.memory_space<vmem>>, vector<1x8x1024xbf16>
    %178 = vector.shape_cast %177 : vector<1x8x1024xbf16> to vector<8x1024xbf16>
    %c0_114 = arith.constant 0 : index
    %c22_115 = arith.constant 22 : index
    %c0_116 = arith.constant 0 : index
    %179 = vector.load %arg2[%c0_114, %c22_115, %c0_116] : memref<1x36x1024xbf16, #tpu.memory_space<vmem>>, vector<1x1x1024xbf16>
    %180 = vector.shape_cast %179 : vector<1x1x1024xbf16> to vector<1x1024xbf16>
    %181 = vector.broadcast %180 : vector<1x1024xbf16> to vector<8x1024xbf16>
    %182 = arith.mulf %178, %181 : vector<8x1024xbf16>
    %183 = arith.extf %182 : vector<8x1024xbf16> to vector<8x1024xf32>
    %184 = arith.addf %176, %183 : vector<8x1024xf32>
    %c23 = arith.constant 23 : index
    %c0_117 = arith.constant 0 : index
    %c0_118 = arith.constant 0 : index
    %185 = vector.load %arg3[%c23, %c0_117, %c0_118] : memref<36x8x1024xbf16, #tpu.memory_space<vmem>>, vector<1x8x1024xbf16>
    %186 = vector.shape_cast %185 : vector<1x8x1024xbf16> to vector<8x1024xbf16>
    %c0_119 = arith.constant 0 : index
    %c23_120 = arith.constant 23 : index
    %c0_121 = arith.constant 0 : index
    %187 = vector.load %arg2[%c0_119, %c23_120, %c0_121] : memref<1x36x1024xbf16, #tpu.memory_space<vmem>>, vector<1x1x1024xbf16>
    %188 = vector.shape_cast %187 : vector<1x1x1024xbf16> to vector<1x1024xbf16>
    %189 = vector.broadcast %188 : vector<1x1024xbf16> to vector<8x1024xbf16>
    %190 = arith.mulf %186, %189 : vector<8x1024xbf16>
    %191 = arith.extf %190 : vector<8x1024xbf16> to vector<8x1024xf32>
    %192 = arith.addf %184, %191 : vector<8x1024xf32>
    %c24 = arith.constant 24 : index
    %c0_122 = arith.constant 0 : index
    %c0_123 = arith.constant 0 : index
    %193 = vector.load %arg3[%c24, %c0_122, %c0_123] : memref<36x8x1024xbf16, #tpu.memory_space<vmem>>, vector<1x8x1024xbf16>
    %194 = vector.shape_cast %193 : vector<1x8x1024xbf16> to vector<8x1024xbf16>
    %c0_124 = arith.constant 0 : index
    %c24_125 = arith.constant 24 : index
    %c0_126 = arith.constant 0 : index
    %195 = vector.load %arg2[%c0_124, %c24_125, %c0_126] : memref<1x36x1024xbf16, #tpu.memory_space<vmem>>, vector<1x1x1024xbf16>
    %196 = vector.shape_cast %195 : vector<1x1x1024xbf16> to vector<1x1024xbf16>
    %197 = vector.broadcast %196 : vector<1x1024xbf16> to vector<8x1024xbf16>
    %198 = arith.mulf %194, %197 : vector<8x1024xbf16>
    %199 = arith.extf %198 : vector<8x1024xbf16> to vector<8x1024xf32>
    %200 = arith.addf %192, %199 : vector<8x1024xf32>
    %c25 = arith.constant 25 : index
    %c0_127 = arith.constant 0 : index
    %c0_128 = arith.constant 0 : index
    %201 = vector.load %arg3[%c25, %c0_127, %c0_128] : memref<36x8x1024xbf16, #tpu.memory_space<vmem>>, vector<1x8x1024xbf16>
    %202 = vector.shape_cast %201 : vector<1x8x1024xbf16> to vector<8x1024xbf16>
    %c0_129 = arith.constant 0 : index
    %c25_130 = arith.constant 25 : index
    %c0_131 = arith.constant 0 : index
    %203 = vector.load %arg2[%c0_129, %c25_130, %c0_131] : memref<1x36x1024xbf16, #tpu.memory_space<vmem>>, vector<1x1x1024xbf16>
    %204 = vector.shape_cast %203 : vector<1x1x1024xbf16> to vector<1x1024xbf16>
    %205 = vector.broadcast %204 : vector<1x1024xbf16> to vector<8x1024xbf16>
    %206 = arith.mulf %202, %205 : vector<8x1024xbf16>
    %207 = arith.extf %206 : vector<8x1024xbf16> to vector<8x1024xf32>
    %208 = arith.addf %200, %207 : vector<8x1024xf32>
    %c26 = arith.constant 26 : index
    %c0_132 = arith.constant 0 : index
    %c0_133 = arith.constant 0 : index
    %209 = vector.load %arg3[%c26, %c0_132, %c0_133] : memref<36x8x1024xbf16, #tpu.memory_space<vmem>>, vector<1x8x1024xbf16>
    %210 = vector.shape_cast %209 : vector<1x8x1024xbf16> to vector<8x1024xbf16>
    %c0_134 = arith.constant 0 : index
    %c26_135 = arith.constant 26 : index
    %c0_136 = arith.constant 0 : index
    %211 = vector.load %arg2[%c0_134, %c26_135, %c0_136] : memref<1x36x1024xbf16, #tpu.memory_space<vmem>>, vector<1x1x1024xbf16>
    %212 = vector.shape_cast %211 : vector<1x1x1024xbf16> to vector<1x1024xbf16>
    %213 = vector.broadcast %212 : vector<1x1024xbf16> to vector<8x1024xbf16>
    %214 = arith.mulf %210, %213 : vector<8x1024xbf16>
    %215 = arith.extf %214 : vector<8x1024xbf16> to vector<8x1024xf32>
    %216 = arith.addf %208, %215 : vector<8x1024xf32>
    %c27 = arith.constant 27 : index
    %c0_137 = arith.constant 0 : index
    %c0_138 = arith.constant 0 : index
    %217 = vector.load %arg3[%c27, %c0_137, %c0_138] : memref<36x8x1024xbf16, #tpu.memory_space<vmem>>, vector<1x8x1024xbf16>
    %218 = vector.shape_cast %217 : vector<1x8x1024xbf16> to vector<8x1024xbf16>
    %c0_139 = arith.constant 0 : index
    %c27_140 = arith.constant 27 : index
    %c0_141 = arith.constant 0 : index
    %219 = vector.load %arg2[%c0_139, %c27_140, %c0_141] : memref<1x36x1024xbf16, #tpu.memory_space<vmem>>, vector<1x1x1024xbf16>
    %220 = vector.shape_cast %219 : vector<1x1x1024xbf16> to vector<1x1024xbf16>
    %221 = vector.broadcast %220 : vector<1x1024xbf16> to vector<8x1024xbf16>
    %222 = arith.mulf %218, %221 : vector<8x1024xbf16>
    %223 = arith.extf %222 : vector<8x1024xbf16> to vector<8x1024xf32>
    %224 = arith.addf %216, %223 : vector<8x1024xf32>
    %c28 = arith.constant 28 : index
    %c0_142 = arith.constant 0 : index
    %c0_143 = arith.constant 0 : index
    %225 = vector.load %arg3[%c28, %c0_142, %c0_143] : memref<36x8x1024xbf16, #tpu.memory_space<vmem>>, vector<1x8x1024xbf16>
    %226 = vector.shape_cast %225 : vector<1x8x1024xbf16> to vector<8x1024xbf16>
    %c0_144 = arith.constant 0 : index
    %c28_145 = arith.constant 28 : index
    %c0_146 = arith.constant 0 : index
    %227 = vector.load %arg2[%c0_144, %c28_145, %c0_146] : memref<1x36x1024xbf16, #tpu.memory_space<vmem>>, vector<1x1x1024xbf16>
    %228 = vector.shape_cast %227 : vector<1x1x1024xbf16> to vector<1x1024xbf16>
    %229 = vector.broadcast %228 : vector<1x1024xbf16> to vector<8x1024xbf16>
    %230 = arith.mulf %226, %229 : vector<8x1024xbf16>
    %231 = arith.extf %230 : vector<8x1024xbf16> to vector<8x1024xf32>
    %232 = arith.addf %224, %231 : vector<8x1024xf32>
    %c29 = arith.constant 29 : index
    %c0_147 = arith.constant 0 : index
    %c0_148 = arith.constant 0 : index
    %233 = vector.load %arg3[%c29, %c0_147, %c0_148] : memref<36x8x1024xbf16, #tpu.memory_space<vmem>>, vector<1x8x1024xbf16>
    %234 = vector.shape_cast %233 : vector<1x8x1024xbf16> to vector<8x1024xbf16>
    %c0_149 = arith.constant 0 : index
    %c29_150 = arith.constant 29 : index
    %c0_151 = arith.constant 0 : index
    %235 = vector.load %arg2[%c0_149, %c29_150, %c0_151] : memref<1x36x1024xbf16, #tpu.memory_space<vmem>>, vector<1x1x1024xbf16>
    %236 = vector.shape_cast %235 : vector<1x1x1024xbf16> to vector<1x1024xbf16>
    %237 = vector.broadcast %236 : vector<1x1024xbf16> to vector<8x1024xbf16>
    %238 = arith.mulf %234, %237 : vector<8x1024xbf16>
    %239 = arith.extf %238 : vector<8x1024xbf16> to vector<8x1024xf32>
    %240 = arith.addf %232, %239 : vector<8x1024xf32>
    %c30 = arith.constant 30 : index
    %c0_152 = arith.constant 0 : index
    %c0_153 = arith.constant 0 : index
    %241 = vector.load %arg3[%c30, %c0_152, %c0_153] : memref<36x8x1024xbf16, #tpu.memory_space<vmem>>, vector<1x8x1024xbf16>
    %242 = vector.shape_cast %241 : vector<1x8x1024xbf16> to vector<8x1024xbf16>
    %c0_154 = arith.constant 0 : index
    %c30_155 = arith.constant 30 : index
    %c0_156 = arith.constant 0 : index
    %243 = vector.load %arg2[%c0_154, %c30_155, %c0_156] : memref<1x36x1024xbf16, #tpu.memory_space<vmem>>, vector<1x1x1024xbf16>
    %244 = vector.shape_cast %243 : vector<1x1x1024xbf16> to vector<1x1024xbf16>
    %245 = vector.broadcast %244 : vector<1x1024xbf16> to vector<8x1024xbf16>
    %246 = arith.mulf %242, %245 : vector<8x1024xbf16>
    %247 = arith.extf %246 : vector<8x1024xbf16> to vector<8x1024xf32>
    %248 = arith.addf %240, %247 : vector<8x1024xf32>
    %c31 = arith.constant 31 : index
    %c0_157 = arith.constant 0 : index
    %c0_158 = arith.constant 0 : index
    %249 = vector.load %arg3[%c31, %c0_157, %c0_158] : memref<36x8x1024xbf16, #tpu.memory_space<vmem>>, vector<1x8x1024xbf16>
    %250 = vector.shape_cast %249 : vector<1x8x1024xbf16> to vector<8x1024xbf16>
    %c0_159 = arith.constant 0 : index
    %c31_160 = arith.constant 31 : index
    %c0_161 = arith.constant 0 : index
    %251 = vector.load %arg2[%c0_159, %c31_160, %c0_161] : memref<1x36x1024xbf16, #tpu.memory_space<vmem>>, vector<1x1x1024xbf16>
    %252 = vector.shape_cast %251 : vector<1x1x1024xbf16> to vector<1x1024xbf16>
    %253 = vector.broadcast %252 : vector<1x1024xbf16> to vector<8x1024xbf16>
    %254 = arith.mulf %250, %253 : vector<8x1024xbf16>
    %255 = arith.extf %254 : vector<8x1024xbf16> to vector<8x1024xf32>
    %256 = arith.addf %248, %255 : vector<8x1024xf32>
    %c32 = arith.constant 32 : index
    %c0_162 = arith.constant 0 : index
    %c0_163 = arith.constant 0 : index
    %257 = vector.load %arg3[%c32, %c0_162, %c0_163] : memref<36x8x1024xbf16, #tpu.memory_space<vmem>>, vector<1x8x1024xbf16>
    %258 = vector.shape_cast %257 : vector<1x8x1024xbf16> to vector<8x1024xbf16>
    %c0_164 = arith.constant 0 : index
    %c32_165 = arith.constant 32 : index
    %c0_166 = arith.constant 0 : index
    %259 = vector.load %arg2[%c0_164, %c32_165, %c0_166] : memref<1x36x1024xbf16, #tpu.memory_space<vmem>>, vector<1x1x1024xbf16>
    %260 = vector.shape_cast %259 : vector<1x1x1024xbf16> to vector<1x1024xbf16>
    %261 = vector.broadcast %260 : vector<1x1024xbf16> to vector<8x1024xbf16>
    %262 = arith.mulf %258, %261 : vector<8x1024xbf16>
    %263 = arith.extf %262 : vector<8x1024xbf16> to vector<8x1024xf32>
    %264 = arith.addf %256, %263 : vector<8x1024xf32>
    %c33 = arith.constant 33 : index
    %c0_167 = arith.constant 0 : index
    %c0_168 = arith.constant 0 : index
    %265 = vector.load %arg3[%c33, %c0_167, %c0_168] : memref<36x8x1024xbf16, #tpu.memory_space<vmem>>, vector<1x8x1024xbf16>
    %266 = vector.shape_cast %265 : vector<1x8x1024xbf16> to vector<8x1024xbf16>
    %c0_169 = arith.constant 0 : index
    %c33_170 = arith.constant 33 : index
    %c0_171 = arith.constant 0 : index
    %267 = vector.load %arg2[%c0_169, %c33_170, %c0_171] : memref<1x36x1024xbf16, #tpu.memory_space<vmem>>, vector<1x1x1024xbf16>
    %268 = vector.shape_cast %267 : vector<1x1x1024xbf16> to vector<1x1024xbf16>
    %269 = vector.broadcast %268 : vector<1x1024xbf16> to vector<8x1024xbf16>
    %270 = arith.mulf %266, %269 : vector<8x1024xbf16>
    %271 = arith.extf %270 : vector<8x1024xbf16> to vector<8x1024xf32>
    %272 = arith.addf %264, %271 : vector<8x1024xf32>
    %c34 = arith.constant 34 : index
    %c0_172 = arith.constant 0 : index
    %c0_173 = arith.constant 0 : index
    %273 = vector.load %arg3[%c34, %c0_172, %c0_173] : memref<36x8x1024xbf16, #tpu.memory_space<vmem>>, vector<1x8x1024xbf16>
    %274 = vector.shape_cast %273 : vector<1x8x1024xbf16> to vector<8x1024xbf16>
    %c0_174 = arith.constant 0 : index
    %c34_175 = arith.constant 34 : index
    %c0_176 = arith.constant 0 : index
    %275 = vector.load %arg2[%c0_174, %c34_175, %c0_176] : memref<1x36x1024xbf16, #tpu.memory_space<vmem>>, vector<1x1x1024xbf16>
    %276 = vector.shape_cast %275 : vector<1x1x1024xbf16> to vector<1x1024xbf16>
    %277 = vector.broadcast %276 : vector<1x1024xbf16> to vector<8x1024xbf16>
    %278 = arith.mulf %274, %277 : vector<8x1024xbf16>
    %279 = arith.extf %278 : vector<8x1024xbf16> to vector<8x1024xf32>
    %280 = arith.addf %272, %279 : vector<8x1024xf32>
    %c35 = arith.constant 35 : index
    %c0_177 = arith.constant 0 : index
    %c0_178 = arith.constant 0 : index
    %281 = vector.load %arg3[%c35, %c0_177, %c0_178] : memref<36x8x1024xbf16, #tpu.memory_space<vmem>>, vector<1x8x1024xbf16>
    %282 = vector.shape_cast %281 : vector<1x8x1024xbf16> to vector<8x1024xbf16>
    %c0_179 = arith.constant 0 : index
    %c35_180 = arith.constant 35 : index
    %c0_181 = arith.constant 0 : index
    %283 = vector.load %arg2[%c0_179, %c35_180, %c0_181] : memref<1x36x1024xbf16, #tpu.memory_space<vmem>>, vector<1x1x1024xbf16>
    %284 = vector.shape_cast %283 : vector<1x1x1024xbf16> to vector<1x1024xbf16>
    %285 = vector.broadcast %284 : vector<1x1024xbf16> to vector<8x1024xbf16>
    %286 = arith.mulf %282, %285 : vector<8x1024xbf16>
    %287 = arith.extf %286 : vector<8x1024xbf16> to vector<8x1024xf32>
    %288 = arith.addf %280, %287 : vector<8x1024xf32>
    %c0_182 = arith.constant 0 : index
    %c0_183 = arith.constant 0 : index
    %c0_184 = arith.constant 0 : index
    %289 = vector.load %arg5[%c0_182, %c0_183, %c0_184] : memref<1x8x1024xf32, #tpu.memory_space<vmem>>, vector<1x8x1024xf32>
    %290 = vector.shape_cast %289 : vector<1x8x1024xf32> to vector<8x1024xf32>
    %291 = vector.shape_cast %288 : vector<8x1024xf32> to vector<1x8x1024xf32>
    tpu.vector_store %arg5[%c0_182, %c0_183, %c0_184], %291 {strides = array<i32>} : memref<1x8x1024xf32, #tpu.memory_space<vmem>>, vector<1x8x1024xf32>,
    return
  }
  func.func @transform_0(%arg0: i32, %arg1: i32) -> (i32, i32, i32) {
    %c0_i32 = arith.constant 0 : i32
    %c0_i32_0 = arith.constant 0 : i32
    return %arg1, %c0_i32, %arg0 : i32, i32, i32
  }
  func.func @transform_1(%arg0: i32, %arg1: i32) -> (i32, i32, i32) {
    %c0_i32 = arith.constant 0 : i32
    %c0_i32_0 = arith.constant 0 : i32
    %c0_i32_1 = arith.constant 0 : i32
    return %c0_i32, %c0_i32_0, %arg0 : i32, i32, i32
  }
  func.func @transform_2(%arg0: i32, %arg1: i32) -> (i32, i32) {
    %c0_i32 = arith.constant 0 : i32
    %c0_i32_0 = arith.constant 0 : i32
    return %c0_i32, %arg0 : i32, i32
  }
  func.func @transform_3(%arg0: i32, %arg1: i32) -> (i32, i32, i32) {
    %c0_i32 = arith.constant 0 : i32
    %c0_i32_0 = arith.constant 0 : i32
    return %arg1, %c0_i32, %arg0 : i32, i32, i32
  }
}

</mosaic_0001>

<bundles_post_ra>
// kernel: local_upsample_conv.1
= control target key start
LH: loop header
LB: loop body
LE: loop exit
PB: predicated region body
PF: predicated region fallthrough
CT: control target
= control target key end

     0   :  { %s5252_s12 = smov 0   ;;  %s5254_s13 = smov 0   ;;  %s6853_s0 = inlined_call_operand.vmem [shape: bf16[2,36,1024], index: 0, kind: input, shape index: {}]   ;;  %s6854_s1 = inlined_call_operand.vmem [shape: bf16[36,8,1024], index: 1, kind: input, shape index: {}]   ;;  %s6855_s2 = inlined_call_operand.vmem [shape: f32[8,1024], index: 2, kind: input, shape index: {}]   ;;  %s6856_s3 = inlined_call_operand.vmem [shape: f32[2,8,1024], index: 3, kind: output, shape index: {}]  }
   0x1   :  { %s5256_s14 = smov 0  }
   0x2 LB: > { %s22_s15 = sadd.s32 1, %s5226_s13  ;;  %p4604_p0 = scmp.ge.s32.totalorder %s5230_s14, 1  ;;  %s5230_s14 = sphi %s5256_s14, %s13_s14   ;;  %s5226_s13 = sphi %s5254_s13, %s6858_s13   ;;  %s5222_s12 = sphi %s5252_s12, %s6857_s12  }
   0x3   : > { %p23_p1 = scmp.ge.s32.totalorder %s22_s15, 2  ;;  %p180_p2 = scmp.lt.s32.totalorder %s5230_s14, 3 }
   0x5   : > { %s6860_s15 = smov (%p23_p1, %s22_s15), 0  ;;  %p181_p3 = pnand %p4604_p0, %p180_p2 }
   0x6   : > { %p223_p4 = scmp.lt.s32.totalorder (!%p181_p3), %s5222_s12, 1  ;;  %v293_v0 = vlaneseq (!%p181_p3)  ;;  %v262_v27 = vld [vmem:[%s6854_s1] sm:$0xff] (!%p181_p3)  ;;  %v263_v28 = vld [vmem:[%s6854_s1 + $0x8] sm:$0xff] (!%p181_p3)  ;;  %v264_v33 = vld [vmem:[%s6854_s1 + $0x10] sm:$0xff] (!%p181_p3) }
   0x7   : > { %184 = sbr.rel (%p181_p3) target bundleno = 456 (0x1c8), region = 32  ;;  %v265_v34 = vld [vmem:[%s6854_s1 + $0x18] sm:$0xff] (!%p181_p3)  ;;  %v254_v58 = vld [vmem:[%s6855_s2] sm:$0xff] (!%p181_p3)  ;;  %v255_v59 = vld [vmem:[%s6855_s2 + $0x8] sm:$0xff] (!%p181_p3) }
   0x8   : > { %v294_v1 = vshrl.u32 (!%p181_p3), %v293_v0, 7  ;;  %v256_v0 = vld [vmem:[%s6855_s2 + $0x10] sm:$0xff] (!%p181_p3) }
   0xa   : > { %v5278_v2 = vsub.s32 (!%p181_p3), 0, %v294_v1  ;;  %v5322_v51 = vsub.s32 (!%p181_p3), 1, %v294_v1  ;;  %v5324_v52 = vsub.s32 (!%p181_p3), 2, %v294_v1  ;;  %v5326_v53 = vsub.s32 (!%p181_p3), 3, %v294_v1  ;;  %v257_v1 = vld [vmem:[%s6855_s2 + $0x18] sm:$0xff] (!%p181_p3) }
   0xe   : > { %s6862_s12 = smov (!%p223_p4, %s5222_s12), 1 }
   0xf   : > { %s5039_s16 = smul.u32 160, %s6862_s12  ;;  %s5038_s6 = sshll.u32 %s6862_s12, 6 }
  0x10   : > { %s252_s10 = scalar_lea.vmem %s6856_s3, %s5038_s6 }
  0x11   : > { %s5276_s19 = scalar_lea.vmem %s6853_s0, %s5039_s16 }
  0x12   : > { %v266_v3 = vld [vmem:[%s5276_s19] sm:$0x11]  ;;  %v267_v4 = vld [vmem:[%s5276_s19 + $0x8] sm:$0x11]  ;;  %v268_v5 = vld [vmem:[%s5276_s19 + $0x10] sm:$0x11] }
  0x13   : > { %v269_v6 = vld [vmem:[%s5276_s19 + $0x18] sm:$0x11]  ;;  %v4608_v7 = vcombine.low %v266_v3, %v266_v3  ;;  %v4609_v8 = vcombine.high %v266_v3, %v266_v3  ;;  %v4610_v9 = vcombine.low %v267_v4, %v267_v4  ;;  %v4611_v10 = vcombine.high %v267_v4, %v267_v4 }
  0x14   : > { %v5284_v11 = vcombine.low %v268_v5, %v268_v5  ;;  %v5286_v12 = vcombine.high %v268_v5, %v268_v5  ;;  %v5288_v13 = vcombine.low %v269_v6, %v269_v6  ;;  %v5290_v14 = vcombine.high %v269_v6, %v269_v6 }
  0x15   : > { %v291_v15 = vpack.i.b16 %v4608_v7, %v4608_v7  ;;  %v298_v16 = vpack.i.b16 %v4609_v8, %v4609_v8  ;;  %v305_v17 = vpack.i.b16 %v4610_v9, %v4610_v9  ;;  %v312_v18 = vpack.i.b16 %v4611_v10, %v4611_v10 }
  0x16   : > { %v319_v19 = vpack.i.b16 %v5284_v11, %v5284_v11  ;;  %v326_v20 = vpack.i.b16 %v5286_v12, %v5286_v12  ;;  %v333_v21 = vpack.i.b16 %v5288_v13, %v5288_v13  ;;  %v340_v22 = vpack.i.b16 %v5290_v14, %v5290_v14 }
  0x17   : > { %v296_v23 = vrot.slane %v291_v15, %v5278_v2  ;;  %v303_v24 = vrot.slane %v298_v16, %v5278_v2  ;;  %v310_v25 = vrot.slane %v305_v17, %v5278_v2  ;;  %v317_v26 = vrot.slane %v312_v18, %v5278_v2 }
  0x18   : > { %v324_v29 = vrot.slane %v319_v19, %v5278_v2  ;;  %v331_v30 = vrot.slane %v326_v20, %v5278_v2  ;;  %v338_v31 = vrot.slane %v333_v21, %v5278_v2  ;;  %v345_v32 = vrot.slane %v340_v22, %v5278_v2 }
  0x19   : > { %v4616_v35 = vcombine.low %v296_v23, %v303_v24  ;;  %v4617_v36 = vcombine.low %v310_v25, %v317_v26  ;;  %v395_v37 = vshrl.u32 %v4608_v7, 16  ;;  %v402_v38 = vshrl.u32 %v4609_v8, 16  ;;  %v258_v7 = vld [vmem:[%s6855_s2 + $0x20] sm:$0xff]  ;;  %v501_v26 = vld [vmem:[%s5276_s19 + $0x8] sm:$0x22] }
  0x1a   : > { %v4618_v39 = vcombine.low %v324_v29, %v331_v30  ;;  %v4619_v40 = vcombine.low %v338_v31, %v345_v32  ;;  %v409_v41 = vshrl.u32 %v4610_v9, 16  ;;  %v416_v42 = vshrl.u32 %v4611_v10, 16  ;;  %v4620_v8 = vld [vmem:[%s6854_s1 + $0x20] sm:$0xff]  ;;  %v260_v29 = vld [vmem:[%s6855_s2 + $0x30] sm:$0xff] }
  0x1b   : > { %v370_v43 = vmul.bf16 %v4616_v35, %v262_v27  ;;  %v371_v44 = vmul.bf16 %v4617_v36, %v263_v28  ;;  %v396_v47 = vpack.i.b16 %v395_v37, %v395_v37  ;;  %v403_v48 = vpack.i.b16 %v402_v38, %v402_v38  ;;  %v500_v25 = vld [vmem:[%s5276_s19] sm:$0x22]  ;;  %v4621_v27 = vld [vmem:[%s6854_s1 + $0x28] sm:$0xff]  ;;  %v4622_v35 = vld [vmem:[%s6854_s1 + $0x30] sm:$0xff] }
  0x1c   : > { %v372_v45 = vmul.bf16 %v4618_v39, %v264_v33  ;;  %v5320_v46 = vmul.bf16 %v4619_v40, %v265_v34  ;;  %v410_v49 = vpack.i.b16 %v409_v41, %v409_v41  ;;  %v417_v50 = vpack.i.b16 %v416_v42, %v416_v42  ;;  %v502_v34 = vld [vmem:[%s5276_s19 + $0x10] sm:$0x22]  ;;  %v503_v36 = vld [vmem:[%s5276_s19 + $0x18] sm:$0x22] }
  0x1d   : > { %v374_v54 = vunpack.c.l.bf16 %v370_v43  ;;  %v375_v55 = vunpack.c.h.bf16 %v370_v43  ;;  %v376_v56 = vunpack.c.l.bf16 %v371_v44  ;;  %v377_v57 = vunpack.c.h.bf16 %v371_v44 }
  0x1e   : > { %v378_v60 = vunpack.c.l.bf16 %v372_v45  ;;  %v379_v61 = vunpack.c.h.bf16 %v372_v45  ;;  %v380_v62 = vunpack.c.l.bf16 %v5320_v46  ;;  %v381_v63 = vunpack.c.h.bf16 %v5320_v46  ;;  %v261_v45 = vld [vmem:[%s6855_s2 + $0x38] sm:$0xff] }
  0x1f   : > { %v401_v3 = vrot.slane %v396_v47, %v5278_v2  ;;  %v408_v4 = vrot.slane %v403_v48, %v5278_v2  ;;  %v415_v5 = vrot.slane %v410_v49, %v5278_v2  ;;  %v422_v6 = vrot.slane %v417_v50, %v5278_v2 }
  0x20   : > { %v423_v9 = vshrl.u32 %v5284_v11, 16  ;;  %v430_v10 = vshrl.u32 %v5286_v12, 16  ;;  %v437_v15 = vshrl.u32 %v5288_v13, 16  ;;  %v444_v16 = vshrl.u32 %v5290_v14, 16  ;;  %v259_v11 = vld [vmem:[%s6855_s2 + $0x28] sm:$0xff] }
  0x21   : > { %v382_v17 = vadd.f32 %v374_v54, %v254_v58  ;;  %v383_v18 = vadd.f32 %v375_v55, %v255_v59  ;;  %v4624_v19 = vcombine.low %v401_v3, %v408_v4  ;;  %v4625_v20 = vcombine.low %v415_v5, %v422_v6 }
  0x22   : > { %v424_v21 = vpack.i.b16 %v423_v9, %v423_v9  ;;  %v431_v22 = vpack.i.b16 %v430_v10, %v430_v10  ;;  %v438_v23 = vpack.i.b16 %v437_v15, %v437_v15  ;;  %v445_v24 = vpack.i.b16 %v444_v16, %v444_v16  ;;  %v4628_v16 = vld [vmem:[%s6854_s1 + $0x40] sm:$0xff] }
  0x23   : > { %v5361_v12 = vadd.f32 %v376_v56, %v256_v0  ;;  %v5363_v13 = vadd.f32 %v377_v57, %v257_v1  ;;  %v5365_v14 = vadd.f32 %v378_v60, %v258_v7  ;;  %v475_v28 = vmul.bf16 %v4624_v19, %v4620_v8  ;;  %v4623_v57 = vld [vmem:[%s6854_s1 + $0x38] sm:$0xff] }
  0x24   : > { %v429_v30 = vrot.slane %v424_v21, %v5278_v2  ;;  %v436_v31 = vrot.slane %v431_v22, %v5278_v2  ;;  %v443_v32 = vrot.slane %v438_v23, %v5278_v2  ;;  %v450_v33 = vrot.slane %v445_v24, %v5278_v2 }
  0x25   : > { %v4632_v37 = vcombine.low %v500_v25, %v500_v25  ;;  %v4633_v38 = vcombine.high %v500_v25, %v500_v25  ;;  %v5382_v39 = vcombine.low %v501_v26, %v501_v26  ;;  %v5384_v40 = vcombine.high %v501_v26, %v501_v26 }
  0x26   : > { %v387_v41 = vadd.f32 %v379_v61, %v259_v11  ;;  %v4626_v42 = vcombine.low %v429_v30, %v436_v31  ;;  %v476_v43 = vmul.bf16 %v4625_v20, %v4621_v27  ;;  %v479_v44 = vunpack.c.l.bf16 %v475_v28  ;;  %v4630_v30 = vld [vmem:[%s6854_s1 + $0x50] sm:$0xff] }
  0x27   : > { %v388_v46 = vadd.f32 %v380_v62, %v260_v29  ;;  %v4627_v47 = vcombine.low %v443_v32, %v450_v33  ;;  %v480_v48 = vunpack.c.h.bf16 %v475_v28  ;;  %v5389_v49 = vcombine.low %v502_v34, %v502_v34 }
  0x28   : > { %v477_v50 = vmul.bf16 %v4626_v42, %v4622_v35  ;;  %v5391_v54 = vcombine.high %v502_v34, %v502_v34  ;;  %v5393_v55 = vcombine.low %v503_v36, %v503_v36  ;;  %v5395_v56 = vcombine.high %v503_v36, %v503_v36  ;;  %v4631_v42 = vld [vmem:[%s6854_s1 + $0x58] sm:$0xff] }
  0x29   : > { %v525_v58 = vpack.i.b16 %v4632_v37, %v4632_v37  ;;  %v532_v59 = vpack.i.b16 %v4633_v38, %v4633_v38  ;;  %v539_v60 = vpack.i.b16 %v5382_v39, %v5382_v39  ;;  %v546_v61 = vpack.i.b16 %v5384_v40, %v5384_v40 }
  0x2a   : > { %v389_v62 = vadd.f32 %v381_v63, %v261_v45  ;;  %v481_v0 = vunpack.c.l.bf16 %v476_v43  ;;  %v482_v1 = vunpack.c.h.bf16 %v476_v43  ;;  %v487_v3 = vadd.f32 %v479_v44, %v382_v17  ;;  %v4629_v63 = vld [vmem:[%s6854_s1 + $0x48] sm:$0xff] }
  0x2b   : > { %v530_v4 = vrot.slane %v525_v58, %v5322_v51  ;;  %v537_v5 = vrot.slane %v532_v59, %v5322_v51  ;;  %v544_v6 = vrot.slane %v539_v60, %v5322_v51  ;;  %v551_v7 = vrot.slane %v546_v61, %v5322_v51 }
  0x2c   : > { %v478_v8 = vmul.bf16 %v4627_v47, %v4623_v57  ;;  %v483_v9 = vunpack.c.l.bf16 %v477_v50  ;;  %v484_v10 = vunpack.c.h.bf16 %v477_v50  ;;  %v488_v15 = vadd.f32 %v480_v48, %v383_v18 }
  0x2d   : > { %v553_v17 = vpack.i.b16 %v5389_v49, %v5389_v49  ;;  %v560_v19 = vpack.i.b16 %v5391_v54, %v5391_v54  ;;  %v567_v20 = vpack.i.b16 %v5393_v55, %v5393_v55  ;;  %v574_v18 = vpack.i.b16 %v5395_v56, %v5395_v56 }
  0x2e   : > { %v4640_v21 = vcombine.low %v530_v4, %v537_v5  ;;  %v4641_v22 = vcombine.low %v544_v6, %v551_v7  ;;  %v629_v23 = vshrl.u32 %v4632_v37, 16  ;;  %v636_v24 = vshrl.u32 %v4633_v38, 16 }
  0x2f   : > { %v558_v25 = vrot.slane %v553_v17, %v5322_v51  ;;  %v565_v26 = vrot.slane %v560_v19, %v5322_v51  ;;  %v572_v11 = vrot.slane %v567_v20, %v5322_v51  ;;  %v579_v27 = vrot.slane %v574_v18, %v5322_v51  ;;  %v734_v19 = vld [vmem:[%s5276_s19] sm:$0x44]  ;;  %v4645_v18 = vld [vmem:[%s6854_s1 + $0x68] sm:$0xff] }
  0x30   : > { %v485_v28 = vunpack.c.l.bf16 %v478_v8  ;;  %v486_v29 = vunpack.c.h.bf16 %v478_v8  ;;  %v604_v31 = vmul.bf16 %v4640_v21, %v4628_v16  ;;  %v605_v32 = vmul.bf16 %v4641_v22, %v4629_v63 }
  0x31   : > { %v4642_v33 = vcombine.low %v558_v25, %v565_v26  ;;  %v4643_v34 = vcombine.low %v572_v11, %v579_v27  ;;  %v630_v35 = vpack.i.b16 %v629_v23, %v629_v23  ;;  %v637_v36 = vpack.i.b16 %v636_v24, %v636_v24  ;;  %v735_v23 = vld [vmem:[%s5276_s19 + $0x8] sm:$0x44]  ;;  %v4646_v26 = vld [vmem:[%s6854_s1 + $0x70] sm:$0xff] }
  0x32   : > { %v489_v37 = vadd.f32 %v481_v0, %v5361_v12  ;;  %v490_v38 = vadd.f32 %v482_v1, %v5363_v13  ;;  %v643_v43 = vshrl.u32 %v5382_v39, 16  ;;  %v650_v44 = vshrl.u32 %v5384_v40, 16 }
  0x33   : > { %v491_v45 = vadd.f32 %v483_v9, %v5365_v14  ;;  %v606_v47 = vmul.bf16 %v4642_v33, %v4630_v30  ;;  %v608_v48 = vunpack.c.l.bf16 %v604_v31  ;;  %v609_v50 = vunpack.c.h.bf16 %v604_v31  ;;  %v737_v30 = vld [vmem:[%s5276_s19 + $0x18] sm:$0x44] }
  0x34   : > { %v492_v57 = vadd.f32 %v484_v10, %v387_v41  ;;  %v493_v58 = vadd.f32 %v485_v28, %v388_v46  ;;  %v494_v59 = vadd.f32 %v486_v29, %v389_v62  ;;  %v610_v60 = vunpack.c.l.bf16 %v605_v32  ;;  %v4644_v46 = vld [vmem:[%s6854_s1 + $0x60] sm:$0xff]  ;;  %v736_v29 = vld [vmem:[%s5276_s19 + $0x10] sm:$0x44] }
  0x35   : > { %v607_v12 = vmul.bf16 %v4643_v34, %v4631_v42  ;;  %v611_v61 = vunpack.c.h.bf16 %v605_v32  ;;  %v635_v13 = vrot.slane %v630_v35, %v5322_v51  ;;  %v642_v0 = vrot.slane %v637_v36, %v5322_v51  ;;  %v4647_v34 = vld [vmem:[%s6854_s1 + $0x78] sm:$0xff] }
  0x36   : > { %v644_v1 = vpack.i.b16 %v643_v43, %v643_v43  ;;  %v651_v4 = vpack.i.b16 %v650_v44, %v650_v44  ;;  %v657_v39 = vshrl.u32 %v5389_v49, 16  ;;  %v664_v40 = vshrl.u32 %v5391_v54, 16 }
  0x37   : > { %v612_v14 = vunpack.c.l.bf16 %v606_v47  ;;  %v613_v5 = vunpack.c.h.bf16 %v606_v47  ;;  %v616_v6 = vadd.f32 %v608_v48, %v487_v3  ;;  %v5441_v41 = vadd.f32 %v609_v50, %v488_v15 }
  0x38   : > { %v649_v62 = vrot.slane %v644_v1, %v5322_v51  ;;  %v656_v7 = vrot.slane %v651_v4, %v5322_v51  ;;  %v658_v8 = vpack.i.b16 %v657_v39, %v657_v39  ;;  %v665_v9 = vpack.i.b16 %v664_v40, %v664_v40 }
  0x39   : > { %v5448_v49 = vadd.f32 %v610_v60, %v489_v37  ;;  %v671_v54 = vshrl.u32 %v5393_v55, 16  ;;  %v678_v10 = vshrl.u32 %v5395_v56, 16  ;;  %v4648_v3 = vcombine.low %v635_v13, %v642_v0 }
  0x3a   : > { %v614_v15 = vunpack.c.l.bf16 %v607_v12  ;;  %v663_v16 = vrot.slane %v658_v8, %v5322_v51  ;;  %v670_v63 = vrot.slane %v665_v9, %v5322_v51  ;;  %v4649_v17 = vcombine.low %v649_v62, %v656_v7  ;;  %v4653_v9 = vld [vmem:[%s6854_s1 + $0x88] sm:$0xff] }
  0x3b   : > { %v615_v20 = vunpack.c.h.bf16 %v607_v12  ;;  %v672_v21 = vpack.i.b16 %v671_v54, %v671_v54  ;;  %v679_v22 = vpack.i.b16 %v678_v10, %v678_v10  ;;  %v709_v55 = vmul.bf16 %v4648_v3, %v4644_v46 }
  0x3c   : > { %v5459_v56 = vadd.f32 %v611_v61, %v490_v38  ;;  %v5461_v24 = vadd.f32 %v612_v14, %v491_v45  ;;  %v5463_v25 = vadd.f32 %v613_v5, %v492_v57  ;;  %v4650_v11 = vcombine.low %v663_v16, %v670_v63 }
  0x3d   : > { %v677_v27 = vrot.slane %v672_v21, %v5322_v51  ;;  %v684_v28 = vrot.slane %v679_v22, %v5322_v51  ;;  %v4656_v31 = vcombine.low %v734_v19, %v734_v19  ;;  %v4657_v32 = vcombine.high %v734_v19, %v734_v19 }
  0x3e   : > { %v622_v33 = vadd.f32 %v614_v15, %v493_v58  ;;  %v710_v35 = vmul.bf16 %v4649_v17, %v4645_v18  ;;  %v5475_v36 = vcombine.low %v735_v23, %v735_v23  ;;  %v5477_v37 = vcombine.high %v735_v23, %v735_v23  ;;  %v4654_v17 = vld [vmem:[%s6854_s1 + $0x90] sm:$0xff] }
  0x3f   : > { %v623_v38 = vadd.f32 %v615_v20, %v494_v59  ;;  %v4651_v42 = vcombine.low %v677_v27, %v684_v28  ;;  %v711_v43 = vmul.bf16 %v4650_v11, %v4646_v26  ;;  %v713_v44 = vunpack.c.l.bf16 %v709_v55 }
  0x40   : > { %v714_v45 = vunpack.c.h.bf16 %v709_v55  ;;  %v5479_v47 = vcombine.low %v736_v29, %v736_v29  ;;  %v5481_v48 = vcombine.high %v736_v29, %v736_v29  ;;  %v5483_v50 = vcombine.low %v737_v30, %v737_v30 }
  0x41   : > { %v712_v57 = vmul.bf16 %v4651_v42, %v4647_v34  ;;  %v5485_v58 = vcombine.high %v737_v30, %v737_v30  ;;  %v759_v60 = vpack.i.b16 %v4656_v31, %v4656_v31  ;;  %v766_v12 = vpack.i.b16 %v4657_v32, %v4657_v32  ;;  %v4655_v34 = vld [vmem:[%s6854_s1 + $0x98] sm:$0xff] }
  0x42   : > { %v715_v61 = vunpack.c.l.bf16 %v710_v35  ;;  %v716_v13 = vunpack.c.h.bf16 %v710_v35  ;;  %v773_v59 = vpack.i.b16 %v5475_v36, %v5475_v36  ;;  %v780_v0 = vpack.i.b16 %v5477_v37, %v5477_v37 }
  0x43   : > { %v717_v1 = vunpack.c.l.bf16 %v711_v43  ;;  %v721_v4 = vadd.f32 %v713_v44, %v616_v6  ;;  %v764_v39 = vrot.slane %v759_v60, %v5324_v52  ;;  %v771_v40 = vrot.slane %v766_v12, %v5324_v52  ;;  %v4652_v6 = vld [vmem:[%s6854_s1 + $0x80] sm:$0xff] }
  0x44   : > { %v778_v14 = vrot.slane %v773_v59, %v5324_v52  ;;  %v785_v5 = vrot.slane %v780_v0, %v5324_v52  ;;  %v787_v46 = vpack.i.b16 %v5479_v47, %v5479_v47  ;;  %v794_v62 = vpack.i.b16 %v5481_v48, %v5481_v48 }
  0x45   : > { %v718_v7 = vunpack.c.h.bf16 %v711_v43  ;;  %v719_v8 = vunpack.c.l.bf16 %v712_v57  ;;  %v801_v54 = vpack.i.b16 %v5483_v50, %v5483_v50  ;;  %v808_v10 = vpack.i.b16 %v5485_v58, %v5485_v58 }
  0x46   : > { %v792_v3 = vrot.slane %v787_v46, %v5324_v52  ;;  %v799_v15 = vrot.slane %v794_v62, %v5324_v52  ;;  %v4664_v16 = vcombine.low %v764_v39, %v771_v40  ;;  %v4665_v63 = vcombine.low %v778_v14, %v785_v5 }
  0x47   : > { %v806_v19 = vrot.slane %v801_v54, %v5324_v52  ;;  %v813_v20 = vrot.slane %v808_v10, %v5324_v52  ;;  %v863_v18 = vshrl.u32 %v4656_v31, 16  ;;  %v870_v21 = vshrl.u32 %v4657_v32, 16  ;;  %v968_v54 = vld [vmem:[%s5276_s19] sm:$0x88] }
  0x48   : > { %v720_v22 = vunpack.c.h.bf16 %v712_v57  ;;  %v4666_v55 = vcombine.low %v792_v3, %v799_v15  ;;  %v838_v23 = vmul.bf16 %v4664_v16, %v4652_v6  ;;  %v839_v26 = vmul.bf16 %v4665_v63, %v4653_v9  ;;  %v969_v15 = vld [vmem:[%s5276_s19 + $0x8] sm:$0x88] }
  0x49   : > { %v722_v11 = vadd.f32 %v714_v45, %v5441_v41  ;;  %v4667_v27 = vcombine.low %v806_v19, %v813_v20  ;;  %v864_v28 = vpack.i.b16 %v863_v18, %v863_v18  ;;  %v871_v29 = vpack.i.b16 %v870_v21, %v870_v21  ;;  %v4670_v18 = vld [vmem:[%s6854_s1 + $0xb0] sm:$0xff] }
  0x4a   : > { %v723_v30 = vadd.f32 %v715_v61, %v5448_v49  ;;  %v840_v35 = vmul.bf16 %v4666_v55, %v4654_v17  ;;  %v877_v42 = vshrl.u32 %v5475_v36, 16  ;;  %v884_v31 = vshrl.u32 %v5477_v37, 16 }
  0x4b   : > { %v724_v32 = vadd.f32 %v716_v13, %v5459_v56  ;;  %v725_v43 = vadd.f32 %v717_v1, %v5461_v24  ;;  %v842_v44 = vunpack.c.l.bf16 %v838_v23  ;;  %v843_v41 = vunpack.c.h.bf16 %v838_v23 }
  0x4c   : > { %v726_v45 = vadd.f32 %v718_v7, %v5463_v25  ;;  %v727_v57 = vadd.f32 %v719_v8, %v622_v33  ;;  %v728_v60 = vadd.f32 %v720_v22, %v623_v38  ;;  %v844_v49 = vunpack.c.l.bf16 %v839_v26  ;;  %v4668_v33 = vld [vmem:[%s6854_s1 + $0xa0] sm:$0xff]  ;;  %v970_v22 = vld [vmem:[%s5276_s19 + $0x10] sm:$0x88] }
  0x4d   : > { %v841_v12 = vmul.bf16 %v4667_v27, %v4655_v34  ;;  %v845_v61 = vunpack.c.h.bf16 %v839_v26  ;;  %v869_v59 = vrot.slane %v864_v28, %v5324_v52  ;;  %v876_v0 = vrot.slane %v871_v29, %v5324_v52  ;;  %v971_v27 = vld [vmem:[%s5276_s19 + $0x18] sm:$0x88] }
  0x4e   : > { %v846_v36 = vunpack.c.l.bf16 %v840_v35  ;;  %v847_v39 = vunpack.c.h.bf16 %v840_v35  ;;  %v878_v37 = vpack.i.b16 %v877_v42, %v877_v42  ;;  %v885_v40 = vpack.i.b16 %v884_v31, %v884_v31  ;;  %v4671_v31 = vld [vmem:[%s6854_s1 + $0xb8] sm:$0xff] }
  0x4f   : > { %v850_v56 = vadd.f32 %v842_v44, %v721_v4  ;;  %v851_v13 = vadd.f32 %v843_v41, %v722_v11  ;;  %v891_v24 = vshrl.u32 %v5479_v47, 16  ;;  %v898_v25 = vshrl.u32 %v5481_v48, 16  ;;  %v4669_v47 = vld [vmem:[%s6854_s1 + $0xa8] sm:$0xff] }
  0x50   : > { %v883_v38 = vrot.slane %v878_v37, %v5324_v52  ;;  %v890_v1 = vrot.slane %v885_v40, %v5324_v52  ;;  %v905_v14 = vshrl.u32 %v5483_v50, 16  ;;  %v912_v5 = vshrl.u32 %v5485_v58, 16 }
  0x51   : > { %v848_v4 = vunpack.c.l.bf16 %v841_v12  ;;  %v892_v46 = vpack.i.b16 %v891_v24, %v891_v24  ;;  %v899_v48 = vpack.i.b16 %v898_v25, %v898_v25  ;;  %v4672_v62 = vcombine.low %v869_v59, %v876_v0 }
  0x52   : > { %v849_v7 = vunpack.c.h.bf16 %v841_v12  ;;  %v906_v8 = vpack.i.b16 %v905_v14, %v905_v14  ;;  %v913_v6 = vpack.i.b16 %v912_v5, %v912_v5  ;;  %v4673_v9 = vcombine.low %v883_v38, %v890_v1  ;;  %v4677_v1 = vld [vmem:[%s6854_s1 + $0xc8] sm:$0xff] }
  0x53   : > { %v5541_v10 = vadd.f32 %v844_v49, %v723_v30  ;;  %v897_v50 = vrot.slane %v892_v46, %v5324_v52  ;;  %v904_v58 = vrot.slane %v899_v48, %v5324_v52  ;;  %v943_v3 = vmul.bf16 %v4672_v62, %v4668_v33 }
  0x54   : > { %v5546_v16 = vadd.f32 %v845_v61, %v724_v32  ;;  %v911_v63 = vrot.slane %v906_v8, %v5324_v52  ;;  %v918_v17 = vrot.slane %v913_v6, %v5324_v52  ;;  %v944_v19 = vmul.bf16 %v4673_v9, %v4669_v47 }
  0x55   : > { %v5550_v20 = vadd.f32 %v846_v36, %v725_v43  ;;  %v4674_v21 = vcombine.low %v897_v50, %v904_v58  ;;  %v4680_v55 = vcombine.low %v968_v54, %v968_v54  ;;  %v4681_v23 = vcombine.high %v968_v54, %v968_v54  ;;  %v4678_v58 = vld [vmem:[%s6854_s1 + $0xd0] sm:$0xff] }
  0x56   : > { %v855_v26 = vadd.f32 %v847_v39, %v726_v45  ;;  %v947_v11 = vunpack.c.l.bf16 %v943_v3  ;;  %v5557_v28 = vcombine.low %v969_v15, %v969_v15  ;;  %v5559_v29 = vcombine.high %v969_v15, %v969_v15 }
  0x57   : > { %v856_v30 = vadd.f32 %v848_v4, %v727_v57  ;;  %v857_v34 = vadd.f32 %v849_v7, %v728_v60  ;;  %v4675_v35 = vcombine.low %v911_v63, %v918_v17  ;;  %v948_v42 = vunpack.c.h.bf16 %v943_v3 }
  0x58   : > { %v945_v32 = vmul.bf16 %v4674_v21, %v4670_v18  ;;  %v949_v43 = vunpack.c.l.bf16 %v944_v19  ;;  %v5564_v44 = vcombine.low %v970_v22, %v970_v22  ;;  %v5566_v41 = vcombine.high %v970_v22, %v970_v22 }
  0x59   : > { %v5568_v45 = vcombine.low %v971_v27, %v971_v27  ;;  %v5570_v49 = vcombine.high %v971_v27, %v971_v27  ;;  %v993_v12 = vpack.i.b16 %v4680_v55, %v4680_v55  ;;  %v1000_v61 = vpack.i.b16 %v4681_v23, %v4681_v23 }
  0x5a   : > { %v950_v57 = vunpack.c.h.bf16 %v944_v19  ;;  %v955_v60 = vadd.f32 %v947_v11, %v850_v56  ;;  %v1007_v59 = vpack.i.b16 %v5557_v28, %v5557_v28  ;;  %v1014_v0 = vpack.i.b16 %v5559_v29, %v5559_v29  ;;  %v4676_v56 = vld [vmem:[%s6854_s1 + $0xc0] sm:$0xff] }
  0x5b   : > { %v946_v36 = vmul.bf16 %v4675_v35, %v4671_v31  ;;  %v956_v39 = vadd.f32 %v948_v42, %v851_v13  ;;  %v998_v37 = vrot.slane %v993_v12, %v5326_v53  ;;  %v1005_v40 = vrot.slane %v1000_v61, %v5326_v53 }
  0x5c   : > { %v951_v24 = vunpack.c.l.bf16 %v945_v32  ;;  %v952_v25 = vunpack.c.h.bf16 %v945_v32  ;;  %v1012_v33 = vrot.slane %v1007_v59, %v5326_v53  ;;  %v1019_v38 = vrot.slane %v1014_v0, %v5326_v53 }
  0x5d   : > { %v1021_v13 = vpack.i.b16 %v5564_v44, %v5564_v44  ;;  %v1028_v14 = vpack.i.b16 %v5566_v41, %v5566_v41  ;;  %v1035_v5 = vpack.i.b16 %v5568_v45, %v5568_v45  ;;  %v1042_v4 = vpack.i.b16 %v5570_v49, %v5570_v49 }
  0x5e   : > { %v4688_v47 = vcombine.low %v998_v37, %v1005_v40  ;;  %v4689_v46 = vcombine.low %v1012_v33, %v1019_v38  ;;  %v1097_v48 = vshrl.u32 %v4680_v55, 16  ;;  %v1104_v62 = vshrl.u32 %v4681_v23, 16  ;;  %v4679_v55 = vld [vmem:[%s6854_s1 + $0xd8] sm:$0xff] }
  0x5f   : > { %v1026_v7 = vrot.slane %v1021_v13, %v5326_v53  ;;  %v1033_v8 = vrot.slane %v1028_v14, %v5326_v53  ;;  %v1040_v6 = vrot.slane %v1035_v5, %v5326_v53  ;;  %v1047_v9 = vrot.slane %v1042_v4, %v5326_v53  ;;  %v1202_v14 = vld [vmem:[%s5276_s19 + $0x20] sm:$0x11]  ;;  %v4693_v4 = vld [vmem:[%s6854_s1 + $0xe8] sm:$0xff] }
  0x60   : > { %v953_v54 = vunpack.c.l.bf16 %v946_v36  ;;  %v954_v50 = vunpack.c.h.bf16 %v946_v36  ;;  %v1072_v3 = vmul.bf16 %v4688_v47, %v4676_v56  ;;  %v1073_v15 = vmul.bf16 %v4689_v46, %v4677_v1 }
  0x61   : > { %v4690_v63 = vcombine.low %v1026_v7, %v1033_v8  ;;  %v4691_v17 = vcombine.low %v1040_v6, %v1047_v9  ;;  %v1098_v19 = vpack.i.b16 %v1097_v48, %v1097_v48  ;;  %v1105_v18 = vpack.i.b16 %v1104_v62, %v1104_v62  ;;  %v1203_v48 = vld [vmem:[%s5276_s19 + $0x28] sm:$0x11]  ;;  %v4694_v8 = vld [vmem:[%s6854_s1 + $0xf0] sm:$0xff] }
  0x62   : > { %v957_v21 = vadd.f32 %v949_v43, %v5541_v10  ;;  %v958_v22 = vadd.f32 %v950_v57, %v5546_v16  ;;  %v1111_v23 = vshrl.u32 %v5557_v28, 16  ;;  %v1118_v11 = vshrl.u32 %v5559_v29, 16 }
  0x63   : > { %v959_v27 = vadd.f32 %v951_v24, %v5550_v20  ;;  %v1074_v35 = vmul.bf16 %v4690_v63, %v4678_v58  ;;  %v1076_v42 = vunpack.c.l.bf16 %v1072_v3  ;;  %v1077_v31 = vunpack.c.h.bf16 %v1072_v3  ;;  %v1205_v58 = vld [vmem:[%s5276_s19 + $0x38] sm:$0x11] }
  0x64   : > { %v960_v32 = vadd.f32 %v952_v25, %v855_v26  ;;  %v961_v12 = vadd.f32 %v953_v54, %v856_v30  ;;  %v962_v61 = vadd.f32 %v954_v50, %v857_v34  ;;  %v1078_v59 = vunpack.c.l.bf16 %v1073_v15  ;;  %v4692_v30 = vld [vmem:[%s6854_s1 + $0xe0] sm:$0xff]  ;;  %v1204_v50 = vld [vmem:[%s5276_s19 + $0x30] sm:$0x11] }
  0x65   : > { %v1075_v10 = vmul.bf16 %v4691_v17, %v4679_v55  ;;  %v1079_v43 = vunpack.c.h.bf16 %v1073_v15  ;;  %v1103_v16 = vrot.slane %v1098_v19, %v5326_v53  ;;  %v1110_v57 = vrot.slane %v1105_v18, %v5326_v53  ;;  %v4695_v17 = vld [vmem:[%s6854_s1 + $0xf8] sm:$0xff] }
  0x66   : > { %v1112_v0 = vpack.i.b16 %v1111_v23, %v1111_v23  ;;  %v1119_v36 = vpack.i.b16 %v1118_v11, %v1118_v11  ;;  %v1125_v28 = vshrl.u32 %v5564_v44, 16  ;;  %v1132_v29 = vshrl.u32 %v5566_v41, 16 }
  0x67   : > { %v1080_v20 = vunpack.c.l.bf16 %v1074_v35  ;;  %v1081_v37 = vunpack.c.h.bf16 %v1074_v35  ;;  %v1084_v40 = vadd.f32 %v1076_v42, %v955_v60  ;;  %v5613_v26 = vadd.f32 %v1077_v31, %v956_v39 }
  0x68   : > { %v1117_v34 = vrot.slane %v1112_v0, %v5326_v53  ;;  %v1124_v24 = vrot.slane %v1119_v36, %v5326_v53  ;;  %v1126_v25 = vpack.i.b16 %v1125_v28, %v1125_v28  ;;  %v1133_v33 = vpack.i.b16 %v1132_v29, %v1132_v29 }
  0x69   : > { %v5620_v44 = vadd.f32 %v1078_v59, %v957_v21  ;;  %v1139_v41 = vshrl.u32 %v5568_v45, 16  ;;  %v1146_v38 = vshrl.u32 %v5570_v49, 16  ;;  %v4696_v60 = vcombine.low %v1103_v16, %v1110_v57 }
  0x6a   : > { %v1082_v39 = vunpack.c.l.bf16 %v1075_v10  ;;  %v1131_v56 = vrot.slane %v1126_v25, %v5326_v53  ;;  %v1138_v1 = vrot.slane %v1133_v33, %v5326_v53  ;;  %v4697_v13 = vcombine.low %v1117_v34, %v1124_v24  ;;  %v4701_v33 = vld [vmem:[%s6854_s1 + $0x108] sm:$0xff] }
  0x6b   : > { %v1083_v5 = vunpack.c.h.bf16 %v1075_v10  ;;  %v1140_v47 = vpack.i.b16 %v1139_v41, %v1139_v41  ;;  %v1147_v46 = vpack.i.b16 %v1146_v38, %v1146_v38  ;;  %v1177_v45 = vmul.bf16 %v4696_v60, %v4692_v30 }
  0x6c   : > { %v5631_v49 = vadd.f32 %v1079_v43, %v958_v22  ;;  %v5633_v62 = vadd.f32 %v1080_v20, %v959_v27  ;;  %v5635_v7 = vadd.f32 %v1081_v37, %v960_v32  ;;  %v4698_v6 = vcombine.low %v1131_v56, %v1138_v1 }
  0x6d   : > { %v1145_v9 = vrot.slane %v1140_v47, %v5326_v53  ;;  %v1152_v54 = vrot.slane %v1147_v46, %v5326_v53  ;;  %v4704_v3 = vcombine.low %v1202_v14, %v1202_v14  ;;  %v4705_v15 = vcombine.high %v1202_v14, %v1202_v14 }
  0x6e   : > { %v1090_v63 = vadd.f32 %v1082_v39, %v961_v12  ;;  %v1178_v19 = vmul.bf16 %v4697_v13, %v4693_v4  ;;  %v5647_v18 = vcombine.low %v1203_v48, %v1203_v48  ;;  %v5649_v21 = vcombine.high %v1203_v48, %v1203_v48  ;;  %v4702_v13 = vld [vmem:[%s6854_s1 + $0x110] sm:$0xff] }
  0x6f   : > { %v1091_v22 = vadd.f32 %v1083_v5, %v962_v61  ;;  %v4699_v55 = vcombine.low %v1145_v9, %v1152_v54  ;;  %v1179_v23 = vmul.bf16 %v4698_v6, %v4694_v8  ;;  %v1181_v11 = vunpack.c.l.bf16 %v1177_v45 }
  0x70   : > { %v1182_v27 = vunpack.c.h.bf16 %v1177_v45  ;;  %v5651_v35 = vcombine.low %v1204_v50, %v1204_v50  ;;  %v5653_v42 = vcombine.high %v1204_v50, %v1204_v50  ;;  %v5655_v31 = vcombine.low %v1205_v58, %v1205_v58 }
  0x71   : > { %v1180_v32 = vmul.bf16 %v4699_v55, %v4695_v17  ;;  %v5657_v12 = vcombine.high %v1205_v58, %v1205_v58  ;;  %v1227_v59 = vpack.i.b16 %v4704_v3, %v4704_v3  ;;  %v1234_v10 = vpack.i.b16 %v4705_v15, %v4705_v15  ;;  %v4703_v17 = vld [vmem:[%s6854_s1 + $0x118] sm:$0xff] }
  0x72   : > { %v1183_v43 = vunpack.c.l.bf16 %v1178_v19  ;;  %v1184_v16 = vunpack.c.h.bf16 %v1178_v19  ;;  %v1241_v61 = vpack.i.b16 %v5647_v18, %v5647_v18  ;;  %v1248_v57 = vpack.i.b16 %v5649_v21, %v5649_v21 }
  0x73   : > { %v1185_v0 = vunpack.c.l.bf16 %v1179_v23  ;;  %v1189_v36 = vadd.f32 %v1181_v11, %v1084_v40  ;;  %v1232_v28 = vrot.slane %v1227_v59, %v5278_v2  ;;  %v1239_v29 = vrot.slane %v1234_v10, %v5278_v2  ;;  %v4700_v40 = vld [vmem:[%s6854_s1 + $0x100] sm:$0xff] }
  0x74   : > { %v1246_v20 = vrot.slane %v1241_v61, %v5278_v2  ;;  %v1253_v37 = vrot.slane %v1248_v57, %v5278_v2  ;;  %v1255_v30 = vpack.i.b16 %v5651_v35, %v5651_v35  ;;  %v1262_v34 = vpack.i.b16 %v5653_v42, %v5653_v42 }
  0x75   : > { %v1186_v24 = vunpack.c.h.bf16 %v1179_v23  ;;  %v1187_v25 = vunpack.c.l.bf16 %v1180_v32  ;;  %v1269_v41 = vpack.i.b16 %v5655_v31, %v5655_v31  ;;  %v1276_v38 = vpack.i.b16 %v5657_v12, %v5657_v12 }
  0x76   : > { %v1260_v60 = vrot.slane %v1255_v30, %v5278_v2  ;;  %v1267_v39 = vrot.slane %v1262_v34, %v5278_v2  ;;  %v4712_v56 = vcombine.low %v1232_v28, %v1239_v29  ;;  %v4713_v1 = vcombine.low %v1246_v20, %v1253_v37 }
  0x77   : > { %v1274_v14 = vrot.slane %v1269_v41, %v5278_v2  ;;  %v1281_v5 = vrot.slane %v1276_v38, %v5278_v2  ;;  %v1331_v4 = vshrl.u32 %v4704_v3, 16  ;;  %v1338_v47 = vshrl.u32 %v4705_v15, 16  ;;  %v1436_v41 = vld [vmem:[%s5276_s19 + $0x20] sm:$0x22] }
  0x78   : > { %v1188_v46 = vunpack.c.h.bf16 %v1180_v32  ;;  %v4714_v45 = vcombine.low %v1260_v60, %v1267_v39  ;;  %v1306_v48 = vmul.bf16 %v4712_v56, %v4700_v40  ;;  %v1307_v8 = vmul.bf16 %v4713_v1, %v4701_v33  ;;  %v1437_v39 = vld [vmem:[%s5276_s19 + $0x28] sm:$0x22] }
  0x79   : > { %v1190_v6 = vadd.f32 %v1182_v27, %v5613_v26  ;;  %v4715_v9 = vcombine.low %v1274_v14, %v1281_v5  ;;  %v1332_v54 = vpack.i.b16 %v1331_v4, %v1331_v4  ;;  %v1339_v50 = vpack.i.b16 %v1338_v47, %v1338_v47  ;;  %v4718_v4 = vld [vmem:[%s6854_s1 + $0x130] sm:$0xff] }
  0x7a   : > { %v1191_v58 = vadd.f32 %v1183_v43, %v5620_v44  ;;  %v1308_v19 = vmul.bf16 %v4714_v45, %v4702_v13  ;;  %v1345_v55 = vshrl.u32 %v5647_v18, 16  ;;  %v1352_v3 = vshrl.u32 %v5649_v21, 16 }
  0x7b   : > { %v1192_v15 = vadd.f32 %v1184_v16, %v5631_v49  ;;  %v1193_v23 = vadd.f32 %v1185_v0, %v5633_v62  ;;  %v1310_v11 = vunpack.c.l.bf16 %v1306_v48  ;;  %v1311_v26 = vunpack.c.h.bf16 %v1306_v48 }
  0x7c   : > { %v1194_v27 = vadd.f32 %v1186_v24, %v5635_v7  ;;  %v1195_v32 = vadd.f32 %v1187_v25, %v1090_v63  ;;  %v1196_v59 = vadd.f32 %v1188_v46, %v1091_v22  ;;  %v1312_v44 = vunpack.c.l.bf16 %v1307_v8  ;;  %v4716_v63 = vld [vmem:[%s6854_s1 + $0x120] sm:$0xff]  ;;  %v1438_v46 = vld [vmem:[%s5276_s19 + $0x30] sm:$0x22] }
  0x7d   : > { %v1309_v10 = vmul.bf16 %v4715_v9, %v4703_v17  ;;  %v1313_v43 = vunpack.c.h.bf16 %v1307_v8  ;;  %v1337_v61 = vrot.slane %v1332_v54, %v5278_v2  ;;  %v1344_v57 = vrot.slane %v1339_v50, %v5278_v2  ;;  %v1439_v9 = vld [vmem:[%s5276_s19 + $0x38] sm:$0x22] }
  0x7e   : > { %v1314_v18 = vunpack.c.l.bf16 %v1308_v19  ;;  %v1315_v28 = vunpack.c.h.bf16 %v1308_v19  ;;  %v1346_v21 = vpack.i.b16 %v1345_v55, %v1345_v55  ;;  %v1353_v29 = vpack.i.b16 %v1352_v3, %v1352_v3  ;;  %v4719_v3 = vld [vmem:[%s6854_s1 + $0x138] sm:$0xff] }
  0x7f   : > { %v1318_v49 = vadd.f32 %v1310_v11, %v1189_v36  ;;  %v1319_v16 = vadd.f32 %v1311_v26, %v1190_v6  ;;  %v1359_v62 = vshrl.u32 %v5651_v35, 16  ;;  %v1366_v7 = vshrl.u32 %v5653_v42, 16  ;;  %v4717_v35 = vld [vmem:[%s6854_s1 + $0x128] sm:$0xff] }
  0x80   : > { %v1351_v22 = vrot.slane %v1346_v21, %v5278_v2  ;;  %v1358_v0 = vrot.slane %v1353_v29, %v5278_v2  ;;  %v1373_v20 = vshrl.u32 %v5655_v31, 16  ;;  %v1380_v37 = vshrl.u32 %v5657_v12, 16 }
  0x81   : > { %v1316_v36 = vunpack.c.l.bf16 %v1309_v10  ;;  %v1360_v30 = vpack.i.b16 %v1359_v62, %v1359_v62  ;;  %v1367_v42 = vpack.i.b16 %v1366_v7, %v1366_v7  ;;  %v4720_v34 = vcombine.low %v1337_v61, %v1344_v57 }
  0x82   : > { %v1317_v24 = vunpack.c.h.bf16 %v1309_v10  ;;  %v1374_v25 = vpack.i.b16 %v1373_v20, %v1373_v20  ;;  %v1381_v40 = vpack.i.b16 %v1380_v37, %v1380_v37  ;;  %v4721_v33 = vcombine.low %v1351_v22, %v1358_v0  ;;  %v4725_v0 = vld [vmem:[%s6854_s1 + $0x148] sm:$0xff] }
  0x83   : > { %v5713_v38 = vadd.f32 %v1312_v44, %v1191_v58  ;;  %v1365_v31 = vrot.slane %v1360_v30, %v5278_v2  ;;  %v1372_v12 = vrot.slane %v1367_v42, %v5278_v2  ;;  %v1411_v60 = vmul.bf16 %v4720_v34, %v4716_v63 }
  0x84   : > { %v5718_v56 = vadd.f32 %v1313_v43, %v1192_v15  ;;  %v1379_v1 = vrot.slane %v1374_v25, %v5278_v2  ;;  %v1386_v13 = vrot.slane %v1381_v40, %v5278_v2  ;;  %v1412_v14 = vmul.bf16 %v4721_v33, %v4717_v35 }
  0x85   : > { %v5722_v5 = vadd.f32 %v1314_v18, %v1193_v23  ;;  %v4722_v47 = vcombine.low %v1365_v31, %v1372_v12  ;;  %v4728_v45 = vcombine.low %v1436_v41, %v1436_v41  ;;  %v4729_v48 = vcombine.high %v1436_v41, %v1436_v41  ;;  %v4726_v12 = vld [vmem:[%s6854_s1 + $0x150] sm:$0xff] }
  0x86   : > { %v1323_v8 = vadd.f32 %v1315_v28, %v1194_v27  ;;  %v1415_v6 = vunpack.c.l.bf16 %v1411_v60  ;;  %v5729_v54 = vcombine.low %v1437_v39, %v1437_v39  ;;  %v5731_v50 = vcombine.high %v1437_v39, %v1437_v39 }
  0x87   : > { %v1324_v58 = vadd.f32 %v1316_v36, %v1195_v32  ;;  %v1325_v17 = vadd.f32 %v1317_v24, %v1196_v59  ;;  %v4723_v19 = vcombine.low %v1379_v1, %v1386_v13  ;;  %v1416_v55 = vunpack.c.h.bf16 %v1411_v60 }
  0x88   : > { %v1413_v15 = vmul.bf16 %v4722_v47, %v4718_v4  ;;  %v1417_v23 = vunpack.c.l.bf16 %v1412_v14  ;;  %v5736_v11 = vcombine.low %v1438_v46, %v1438_v46  ;;  %v5738_v26 = vcombine.high %v1438_v46, %v1438_v46 }
  0x89   : > { %v5740_v27 = vcombine.low %v1439_v9, %v1439_v9  ;;  %v5742_v44 = vcombine.high %v1439_v9, %v1439_v9  ;;  %v1461_v10 = vpack.i.b16 %v4728_v45, %v4728_v45  ;;  %v1468_v43 = vpack.i.b16 %v4729_v48, %v4729_v48 }
  0x8a   : > { %v1418_v32 = vunpack.c.h.bf16 %v1412_v14  ;;  %v1423_v59 = vadd.f32 %v1415_v6, %v1318_v49  ;;  %v1475_v61 = vpack.i.b16 %v5729_v54, %v5729_v54  ;;  %v1482_v57 = vpack.i.b16 %v5731_v50, %v5731_v50  ;;  %v4724_v49 = vld [vmem:[%s6854_s1 + $0x140] sm:$0xff] }
  0x8b   : > { %v1414_v18 = vmul.bf16 %v4723_v19, %v4719_v3  ;;  %v1424_v28 = vadd.f32 %v1416_v55, %v1319_v16  ;;  %v1466_v21 = vrot.slane %v1461_v10, %v5322_v51  ;;  %v1473_v29 = vrot.slane %v1468_v43, %v5322_v51 }
  0x8c   : > { %v1419_v62 = vunpack.c.l.bf16 %v1413_v15  ;;  %v1420_v7 = vunpack.c.h.bf16 %v1413_v15  ;;  %v1480_v63 = vrot.slane %v1475_v61, %v5322_v51  ;;  %v1487_v22 = vrot.slane %v1482_v57, %v5322_v51 }
  0x8d   : > { %v1489_v16 = vpack.i.b16 %v5736_v11, %v5736_v11  ;;  %v1496_v20 = vpack.i.b16 %v5738_v26, %v5738_v26  ;;  %v1503_v37 = vpack.i.b16 %v5740_v27, %v5740_v27  ;;  %v1510_v36 = vpack.i.b16 %v5742_v44, %v5742_v44 }
  0x8e   : > { %v4736_v35 = vcombine.low %v1466_v21, %v1473_v29  ;;  %v4737_v30 = vcombine.low %v1480_v63, %v1487_v22  ;;  %v1565_v42 = vshrl.u32 %v4728_v45, 16  ;;  %v1572_v34 = vshrl.u32 %v4729_v48, 16  ;;  %v4727_v45 = vld [vmem:[%s6854_s1 + $0x158] sm:$0xff] }
  0x8f   : > { %v1494_v24 = vrot.slane %v1489_v16, %v5322_v51  ;;  %v1501_v25 = vrot.slane %v1496_v20, %v5322_v51  ;;  %v1508_v40 = vrot.slane %v1503_v37, %v5322_v51  ;;  %v1515_v33 = vrot.slane %v1510_v36, %v5322_v51  ;;  %v1670_v20 = vld [vmem:[%s5276_s19 + $0x20] sm:$0x44]  ;;  %v4741_v36 = vld [vmem:[%s6854_s1 + $0x168] sm:$0xff] }
  0x90   : > { %v1421_v41 = vunpack.c.l.bf16 %v1414_v18  ;;  %v1422_v31 = vunpack.c.h.bf16 %v1414_v18  ;;  %v1540_v60 = vmul.bf16 %v4736_v35, %v4724_v49  ;;  %v1541_v39 = vmul.bf16 %v4737_v30, %v4725_v0 }
  0x91   : > { %v4738_v1 = vcombine.low %v1494_v24, %v1501_v25  ;;  %v4739_v13 = vcombine.low %v1508_v40, %v1515_v33  ;;  %v1566_v14 = vpack.i.b16 %v1565_v42, %v1565_v42  ;;  %v1573_v4 = vpack.i.b16 %v1572_v34, %v1572_v34  ;;  %v1671_v42 = vld [vmem:[%s5276_s19 + $0x28] sm:$0x44]  ;;  %v4742_v25 = vld [vmem:[%s6854_s1 + $0x170] sm:$0xff] }
  0x92   : > { %v1425_v47 = vadd.f32 %v1417_v23, %v5713_v38  ;;  %v1426_v46 = vadd.f32 %v1418_v32, %v5718_v56  ;;  %v1579_v48 = vshrl.u32 %v5729_v54, 16  ;;  %v1586_v6 = vshrl.u32 %v5731_v50, 16 }
  0x93   : > { %v1427_v9 = vadd.f32 %v1419_v62, %v5722_v5  ;;  %v1542_v19 = vmul.bf16 %v4738_v1, %v4726_v12  ;;  %v1544_v55 = vunpack.c.l.bf16 %v1540_v60  ;;  %v1545_v3 = vunpack.c.h.bf16 %v1540_v60  ;;  %v1673_v12 = vld [vmem:[%s5276_s19 + $0x38] sm:$0x44] }
  0x94   : > { %v1428_v15 = vadd.f32 %v1420_v7, %v1323_v8  ;;  %v1429_v10 = vadd.f32 %v1421_v41, %v1324_v58  ;;  %v1430_v43 = vadd.f32 %v1422_v31, %v1325_v17  ;;  %v1546_v61 = vunpack.c.l.bf16 %v1541_v39  ;;  %v4740_v58 = vld [vmem:[%s6854_s1 + $0x160] sm:$0xff]  ;;  %v1672_v31 = vld [vmem:[%s5276_s19 + $0x30] sm:$0x44] }
  0x95   : > { %v1543_v38 = vmul.bf16 %v4739_v13, %v4727_v45  ;;  %v1547_v23 = vunpack.c.h.bf16 %v1541_v39  ;;  %v1571_v56 = vrot.slane %v1566_v14, %v5322_v51  ;;  %v1578_v32 = vrot.slane %v1573_v4, %v5322_v51  ;;  %v4743_v13 = vld [vmem:[%s6854_s1 + $0x178] sm:$0xff] }
  0x96   : > { %v1580_v57 = vpack.i.b16 %v1579_v48, %v1579_v48  ;;  %v1587_v18 = vpack.i.b16 %v1586_v6, %v1586_v6  ;;  %v1593_v54 = vshrl.u32 %v5736_v11, 16  ;;  %v1600_v50 = vshrl.u32 %v5738_v26, 16 }
  0x97   : > { %v1548_v5 = vunpack.c.l.bf16 %v1542_v19  ;;  %v1549_v21 = vunpack.c.h.bf16 %v1542_v19  ;;  %v1552_v29 = vadd.f32 %v1544_v55, %v1423_v59  ;;  %v5785_v8 = vadd.f32 %v1545_v3, %v1424_v28 }
  0x98   : > { %v1585_v17 = vrot.slane %v1580_v57, %v5322_v51  ;;  %v1592_v62 = vrot.slane %v1587_v18, %v5322_v51  ;;  %v1594_v7 = vpack.i.b16 %v1593_v54, %v1593_v54  ;;  %v1601_v63 = vpack.i.b16 %v1600_v50, %v1600_v50 }
  0x99   : > { %v5792_v11 = vadd.f32 %v1546_v61, %v1425_v47  ;;  %v1607_v26 = vshrl.u32 %v5740_v27, 16  ;;  %v1614_v22 = vshrl.u32 %v5742_v44, 16  ;;  %v4744_v59 = vcombine.low %v1571_v56, %v1578_v32 }
  0x9a   : > { %v1550_v28 = vunpack.c.l.bf16 %v1543_v38  ;;  %v1599_v49 = vrot.slane %v1594_v7, %v5322_v51  ;;  %v1606_v0 = vrot.slane %v1601_v63, %v5322_v51  ;;  %v4745_v16 = vcombine.low %v1585_v17, %v1592_v62  ;;  %v4749_v63 = vld [vmem:[%s6854_s1 + $0x188] sm:$0xff] }
  0x9b   : > { %v1551_v37 = vunpack.c.h.bf16 %v1543_v38  ;;  %v1608_v35 = vpack.i.b16 %v1607_v26, %v1607_v26  ;;  %v1615_v30 = vpack.i.b16 %v1614_v22, %v1614_v22  ;;  %v1645_v27 = vmul.bf16 %v4744_v59, %v4740_v58 }
  0x9c   : > { %v5803_v44 = vadd.f32 %v1547_v23, %v1426_v46  ;;  %v5805_v34 = vadd.f32 %v1548_v5, %v1427_v9  ;;  %v5807_v24 = vadd.f32 %v1549_v21, %v1428_v15  ;;  %v4746_v40 = vcombine.low %v1599_v49, %v1606_v0 }
  0x9d   : > { %v1613_v33 = vrot.slane %v1608_v35, %v5322_v51  ;;  %v1620_v41 = vrot.slane %v1615_v30, %v5322_v51  ;;  %v4752_v60 = vcombine.low %v1670_v20, %v1670_v20  ;;  %v4753_v39 = vcombine.high %v1670_v20, %v1670_v20 }
  0x9e   : > { %v1558_v1 = vadd.f32 %v1550_v28, %v1429_v10  ;;  %v1646_v14 = vmul.bf16 %v4745_v16, %v4741_v36  ;;  %v5819_v4 = vcombine.low %v1671_v42, %v1671_v42  ;;  %v5821_v47 = vcombine.high %v1671_v42, %v1671_v42  ;;  %v4750_v16 = vld [vmem:[%s6854_s1 + $0x190] sm:$0xff] }
  0x9f   : > { %v1559_v46 = vadd.f32 %v1551_v37, %v1430_v43  ;;  %v4747_v45 = vcombine.low %v1613_v33, %v1620_v41  ;;  %v1647_v48 = vmul.bf16 %v4746_v40, %v4742_v25  ;;  %v1649_v6 = vunpack.c.l.bf16 %v1645_v27 }
  0xa0   : > { %v1650_v9 = vunpack.c.h.bf16 %v1645_v27  ;;  %v5823_v19 = vcombine.low %v1672_v31, %v1672_v31  ;;  %v5825_v55 = vcombine.high %v1672_v31, %v1672_v31  ;;  %v5827_v3 = vcombine.low %v1673_v12, %v1673_v12 }
  0xa1   : > { %v1648_v15 = vmul.bf16 %v4747_v45, %v4743_v13  ;;  %v5829_v10 = vcombine.high %v1673_v12, %v1673_v12  ;;  %v1695_v61 = vpack.i.b16 %v4752_v60, %v4752_v60  ;;  %v1702_v38 = vpack.i.b16 %v4753_v39, %v4753_v39  ;;  %v4751_v13 = vld [vmem:[%s6854_s1 + $0x198] sm:$0xff] }
  0xa2   : > { %v1651_v23 = vunpack.c.l.bf16 %v1646_v14  ;;  %v1652_v56 = vunpack.c.h.bf16 %v1646_v14  ;;  %v1709_v43 = vpack.i.b16 %v5819_v4, %v5819_v4  ;;  %v1716_v32 = vpack.i.b16 %v5821_v47, %v5821_v47 }
  0xa3   : > { %v1653_v57 = vunpack.c.l.bf16 %v1647_v48  ;;  %v1657_v18 = vadd.f32 %v1649_v6, %v1552_v29  ;;  %v1700_v54 = vrot.slane %v1695_v61, %v5324_v52  ;;  %v1707_v50 = vrot.slane %v1702_v38, %v5324_v52  ;;  %v4748_v29 = vld [vmem:[%s6854_s1 + $0x180] sm:$0xff] }
  0xa4   : > { %v1714_v5 = vrot.slane %v1709_v43, %v5324_v52  ;;  %v1721_v21 = vrot.slane %v1716_v32, %v5324_v52  ;;  %v1723_v58 = vpack.i.b16 %v5823_v19, %v5823_v19  ;;  %v1730_v17 = vpack.i.b16 %v5825_v55, %v5825_v55 }
  0xa5   : > { %v1654_v62 = vunpack.c.h.bf16 %v1647_v48  ;;  %v1655_v7 = vunpack.c.l.bf16 %v1648_v15  ;;  %v1737_v26 = vpack.i.b16 %v5827_v3, %v5827_v3  ;;  %v1744_v22 = vpack.i.b16 %v5829_v10, %v5829_v10 }
  0xa6   : > { %v1728_v59 = vrot.slane %v1723_v58, %v5324_v52  ;;  %v1735_v28 = vrot.slane %v1730_v17, %v5324_v52  ;;  %v4760_v49 = vcombine.low %v1700_v54, %v1707_v50  ;;  %v4761_v0 = vcombine.low %v1714_v5, %v1721_v21 }
  0xa7   : > { %v1742_v20 = vrot.slane %v1737_v26, %v5324_v52  ;;  %v1749_v37 = vrot.slane %v1744_v22, %v5324_v52  ;;  %v1799_v36 = vshrl.u32 %v4752_v60, 16  ;;  %v1806_v35 = vshrl.u32 %v4753_v39, 16  ;;  %v1904_v26 = vld [vmem:[%s5276_s19 + $0x20] sm:$0x88] }
  0xa8   : > { %v1656_v30 = vunpack.c.h.bf16 %v1648_v15  ;;  %v4762_v27 = vcombine.low %v1728_v59, %v1735_v28  ;;  %v1774_v42 = vmul.bf16 %v4760_v49, %v4748_v29  ;;  %v1775_v25 = vmul.bf16 %v4761_v0, %v4749_v63  ;;  %v1905_v28 = vld [vmem:[%s5276_s19 + $0x28] sm:$0x88] }
  0xa9   : > { %v1658_v40 = vadd.f32 %v1650_v9, %v5785_v8  ;;  %v4763_v33 = vcombine.low %v1742_v20, %v1749_v37  ;;  %v1800_v41 = vpack.i.b16 %v1799_v36, %v1799_v36  ;;  %v1807_v31 = vpack.i.b16 %v1806_v35, %v1806_v35  ;;  %v4766_v36 = vld [vmem:[%s6854_s1 + $0x1b0] sm:$0xff] }
  0xaa   : > { %v1659_v12 = vadd.f32 %v1651_v23, %v5792_v11  ;;  %v1776_v14 = vmul.bf16 %v4762_v27, %v4750_v16  ;;  %v1813_v45 = vshrl.u32 %v5819_v4, 16  ;;  %v1820_v60 = vshrl.u32 %v5821_v47, 16 }
  0xab   : > { %v1660_v39 = vadd.f32 %v1652_v56, %v5803_v44  ;;  %v1661_v48 = vadd.f32 %v1653_v57, %v5805_v34  ;;  %v1778_v6 = vunpack.c.l.bf16 %v1774_v42  ;;  %v1779_v8 = vunpack.c.h.bf16 %v1774_v42 }
  0xac   : > { %v1662_v9 = vadd.f32 %v1654_v62, %v5807_v24  ;;  %v1663_v15 = vadd.f32 %v1655_v7, %v1558_v1  ;;  %v1664_v61 = vadd.f32 %v1656_v30, %v1559_v46  ;;  %v1780_v11 = vunpack.c.l.bf16 %v1775_v25  ;;  %v4764_v1 = vld [vmem:[%s6854_s1 + $0x1a0] sm:$0xff]  ;;  %v1906_v30 = vld [vmem:[%s5276_s19 + $0x30] sm:$0x88] }
  0xad   : > { %v1777_v38 = vmul.bf16 %v4763_v33, %v4751_v13  ;;  %v1781_v23 = vunpack.c.h.bf16 %v1775_v25  ;;  %v1805_v43 = vrot.slane %v1800_v41, %v5324_v52  ;;  %v1812_v32 = vrot.slane %v1807_v31, %v5324_v52  ;;  %v1907_v33 = vld [vmem:[%s5276_s19 + $0x38] sm:$0x88] }
  0xae   : > { %v1782_v4 = vunpack.c.l.bf16 %v1776_v14  ;;  %v1783_v54 = vunpack.c.h.bf16 %v1776_v14  ;;  %v1814_v47 = vpack.i.b16 %v1813_v45, %v1813_v45  ;;  %v1821_v50 = vpack.i.b16 %v1820_v60, %v1820_v60  ;;  %v4767_v60 = vld [vmem:[%s6854_s1 + $0x1b8] sm:$0xff] }
  0xaf   : > { %v1786_v44 = vadd.f32 %v1778_v6, %v1657_v18  ;;  %v1787_v56 = vadd.f32 %v1779_v8, %v1658_v40  ;;  %v1827_v34 = vshrl.u32 %v5823_v19, 16  ;;  %v1834_v24 = vshrl.u32 %v5825_v55, 16  ;;  %v4765_v19 = vld [vmem:[%s6854_s1 + $0x1a8] sm:$0xff] }
  0xb0   : > { %v1819_v46 = vrot.slane %v1814_v47, %v5324_v52  ;;  %v1826_v57 = vrot.slane %v1821_v50, %v5324_v52  ;;  %v1841_v5 = vshrl.u32 %v5827_v3, 16  ;;  %v1848_v21 = vshrl.u32 %v5829_v10, 16 }
  0xb1   : > { %v1784_v18 = vunpack.c.l.bf16 %v1777_v38  ;;  %v1828_v58 = vpack.i.b16 %v1827_v34, %v1827_v34  ;;  %v1835_v55 = vpack.i.b16 %v1834_v24, %v1834_v24  ;;  %v4768_v17 = vcombine.low %v1805_v43, %v1812_v32 }
  0xb2   : > { %v1785_v62 = vunpack.c.h.bf16 %v1777_v38  ;;  %v1842_v7 = vpack.i.b16 %v1841_v5, %v1841_v5  ;;  %v1849_v29 = vpack.i.b16 %v1848_v21, %v1848_v21  ;;  %v4769_v63 = vcombine.low %v1819_v46, %v1826_v57  ;;  %v4773_v57 = vld [vmem:[%s6854_s1 + $0x1c8] sm:$0xff] }
  0xb3   : > { %v5885_v22 = vadd.f32 %v1780_v11, %v1659_v12  ;;  %v1833_v3 = vrot.slane %v1828_v58, %v5324_v52  ;;  %v1840_v10 = vrot.slane %v1835_v55, %v5324_v52  ;;  %v1879_v59 = vmul.bf16 %v4768_v17, %v4764_v1 }
  0xb4   : > { %v5890_v49 = vadd.f32 %v1781_v23, %v1660_v39  ;;  %v1847_v0 = vrot.slane %v1842_v7, %v5324_v52  ;;  %v1854_v16 = vrot.slane %v1849_v29, %v5324_v52  ;;  %v1880_v20 = vmul.bf16 %v4769_v63, %v4765_v19 }
  0xb5   : > { %v5894_v37 = vadd.f32 %v1782_v4, %v1661_v48  ;;  %v4770_v35 = vcombine.low %v1833_v3, %v1840_v10  ;;  %v4776_v27 = vcombine.low %v1904_v26, %v1904_v26  ;;  %v4777_v42 = vcombine.high %v1904_v26, %v1904_v26  ;;  %v4774_v10 = vld [vmem:[%s6854_s1 + $0x1d0] sm:$0xff] }
  0xb6   : > { %v1791_v25 = vadd.f32 %v1783_v54, %v1662_v9  ;;  %v1883_v40 = vunpack.c.l.bf16 %v1879_v59  ;;  %v5901_v41 = vcombine.low %v1905_v28, %v1905_v28  ;;  %v5903_v31 = vcombine.high %v1905_v28, %v1905_v28 }
  0xb7   : > { %v1792_v12 = vadd.f32 %v1784_v18, %v1663_v15  ;;  %v1793_v13 = vadd.f32 %v1785_v62, %v1664_v61  ;;  %v4771_v14 = vcombine.low %v1847_v0, %v1854_v16  ;;  %v1884_v45 = vunpack.c.h.bf16 %v1879_v59 }
  0xb8   : > { %v1881_v39 = vmul.bf16 %v4770_v35, %v4766_v36  ;;  %v1885_v48 = vunpack.c.l.bf16 %v1880_v20  ;;  %v5908_v6 = vcombine.low %v1906_v30, %v1906_v30  ;;  %v5910_v8 = vcombine.high %v1906_v30, %v1906_v30 }
  0xb9   : > { %v5912_v9 = vcombine.low %v1907_v33, %v1907_v33  ;;  %v5914_v11 = vcombine.high %v1907_v33, %v1907_v33  ;;  %v1929_v38 = vpack.i.b16 %v4776_v27, %v4776_v27  ;;  %v1936_v23 = vpack.i.b16 %v4777_v42, %v4777_v42 }
  0xba   : > { %v1886_v15 = vunpack.c.h.bf16 %v1880_v20  ;;  %v1891_v61 = vadd.f32 %v1883_v40, %v1786_v44  ;;  %v1943_v43 = vpack.i.b16 %v5901_v41, %v5901_v41  ;;  %v1950_v32 = vpack.i.b16 %v5903_v31, %v5903_v31  ;;  %v4772_v44 = vld [vmem:[%s6854_s1 + $0x1c0] sm:$0xff] }
  0xbb   : > { %v1882_v4 = vmul.bf16 %v4771_v14, %v4767_v60  ;;  %v1892_v54 = vadd.f32 %v1884_v45, %v1787_v56  ;;  %v1934_v47 = vrot.slane %v1929_v38, %v5326_v53  ;;  %v1941_v50 = vrot.slane %v1936_v23, %v5326_v53 }
  0xbc   : > { %v1887_v34 = vunpack.c.l.bf16 %v1881_v39  ;;  %v1888_v24 = vunpack.c.h.bf16 %v1881_v39  ;;  %v1948_v1 = vrot.slane %v1943_v43, %v5326_v53  ;;  %v1955_v46 = vrot.slane %v1950_v32, %v5326_v53 }
  0xbd   : > { %v1957_v56 = vpack.i.b16 %v5908_v6, %v5908_v6  ;;  %v1964_v5 = vpack.i.b16 %v5910_v8, %v5910_v8  ;;  %v1971_v21 = vpack.i.b16 %v5912_v9, %v5912_v9  ;;  %v1978_v18 = vpack.i.b16 %v5914_v11, %v5914_v11 }
  0xbe   : > { %v4784_v19 = vcombine.low %v1934_v47, %v1941_v50  ;;  %v4785_v58 = vcombine.low %v1948_v1, %v1955_v46  ;;  %v2033_v55 = vshrl.u32 %v4776_v27, 16  ;;  %v2040_v17 = vshrl.u32 %v4777_v42, 16  ;;  %v4775_v27 = vld [vmem:[%s6854_s1 + $0x1d8] sm:$0xff] }
  0xbf   : > { %v1962_v62 = vrot.slane %v1957_v56, %v5326_v53  ;;  %v1969_v7 = vrot.slane %v1964_v5, %v5326_v53  ;;  %v1976_v29 = vrot.slane %v1971_v21, %v5326_v53  ;;  %v1983_v63 = vrot.slane %v1978_v18, %v5326_v53  ;;  %v2138_v5 = vld [vmem:[%s5276_s19 + $0x40] sm:$0x11]  ;;  %v4789_v18 = vld [vmem:[%s6854_s1 + $0x1e8] sm:$0xff] }
  0xc0   : > { %v1889_v26 = vunpack.c.l.bf16 %v1882_v4  ;;  %v1890_v3 = vunpack.c.h.bf16 %v1882_v4  ;;  %v2008_v59 = vmul.bf16 %v4784_v19, %v4772_v44  ;;  %v2009_v28 = vmul.bf16 %v4785_v58, %v4773_v57 }
  0xc1   : > { %v4786_v0 = vcombine.low %v1962_v62, %v1969_v7  ;;  %v4787_v16 = vcombine.low %v1976_v29, %v1983_v63  ;;  %v2034_v20 = vpack.i.b16 %v2033_v55, %v2033_v55  ;;  %v2041_v36 = vpack.i.b16 %v2040_v17, %v2040_v17  ;;  %v2139_v55 = vld [vmem:[%s5276_s19 + $0x48] sm:$0x11]  ;;  %v4790_v7 = vld [vmem:[%s6854_s1 + $0x1f0] sm:$0xff] }
  0xc2   : > { %v1893_v35 = vadd.f32 %v1885_v48, %v5885_v22  ;;  %v1894_v30 = vadd.f32 %v1886_v15, %v5890_v49  ;;  %v2047_v42 = vshrl.u32 %v5901_v41, 16  ;;  %v2054_v40 = vshrl.u32 %v5903_v31, 16 }
  0xc3   : > { %v1895_v33 = vadd.f32 %v1887_v34, %v5894_v37  ;;  %v2010_v14 = vmul.bf16 %v4786_v0, %v4774_v10  ;;  %v2012_v45 = vunpack.c.l.bf16 %v2008_v59  ;;  %v2013_v60 = vunpack.c.h.bf16 %v2008_v59  ;;  %v2141_v10 = vld [vmem:[%s5276_s19 + $0x58] sm:$0x11] }
  0xc4   : > { %v1896_v39 = vadd.f32 %v1888_v24, %v1791_v25  ;;  %v1897_v38 = vadd.f32 %v1889_v26, %v1792_v12  ;;  %v1898_v23 = vadd.f32 %v1890_v3, %v1793_v13  ;;  %v2014_v43 = vunpack.c.l.bf16 %v2009_v28  ;;  %v4788_v12 = vld [vmem:[%s6854_s1 + $0x1e0] sm:$0xff]  ;;  %v2140_v3 = vld [vmem:[%s5276_s19 + $0x50] sm:$0x11] }
  0xc5   : > { %v2011_v22 = vmul.bf16 %v4787_v16, %v4775_v27  ;;  %v2015_v48 = vunpack.c.h.bf16 %v2009_v28  ;;  %v2039_v49 = vrot.slane %v2034_v20, %v5326_v53  ;;  %v2046_v15 = vrot.slane %v2041_v36, %v5326_v53  ;;  %v4791_v16 = vld [vmem:[%s6854_s1 + $0x1f8] sm:$0xff] }
  0xc6   : > { %v2048_v32 = vpack.i.b16 %v2047_v42, %v2047_v42  ;;  %v2055_v4 = vpack.i.b16 %v2054_v40, %v2054_v40  ;;  %v2061_v41 = vshrl.u32 %v5908_v6, 16  ;;  %v2068_v31 = vshrl.u32 %v5910_v8, 16 }
  0xc7   : > { %v2016_v37 = vunpack.c.l.bf16 %v2010_v14  ;;  %v2017_v47 = vunpack.c.h.bf16 %v2010_v14  ;;  %v2020_v50 = vadd.f32 %v2012_v45, %v1891_v61  ;;  %v5957_v25 = vadd.f32 %v2013_v60, %v1892_v54 }
  0xc8   : > { %v2053_v13 = vrot.slane %v2048_v32, %v5326_v53  ;;  %v2060_v34 = vrot.slane %v2055_v4, %v5326_v53  ;;  %v2062_v24 = vpack.i.b16 %v2061_v41, %v2061_v41  ;;  %v2069_v1 = vpack.i.b16 %v2068_v31, %v2068_v31 }
  0xc9   : > { %v5964_v6 = vadd.f32 %v2014_v43, %v1893_v35  ;;  %v2075_v8 = vshrl.u32 %v5912_v9, 16  ;;  %v2082_v46 = vshrl.u32 %v5914_v11, 16  ;;  %v4792_v61 = vcombine.low %v2039_v49, %v2046_v15 }
  0xca   : > { %v2018_v54 = vunpack.c.l.bf16 %v2011_v22  ;;  %v2067_v44 = vrot.slane %v2062_v24, %v5326_v53  ;;  %v2074_v57 = vrot.slane %v2069_v1, %v5326_v53  ;;  %v4793_v56 = vcombine.low %v2053_v13, %v2060_v34  ;;  %v4797_v1 = vld [vmem:[%s6854_s1 + $0x208] sm:$0xff] }
  0xcb   : > { %v2019_v21 = vunpack.c.h.bf16 %v2011_v22  ;;  %v2076_v19 = vpack.i.b16 %v2075_v8, %v2075_v8  ;;  %v2083_v58 = vpack.i.b16 %v2082_v46, %v2082_v46  ;;  %v2113_v9 = vmul.bf16 %v4792_v61, %v4788_v12 }
  0xcc   : > { %v5975_v11 = vadd.f32 %v2015_v48, %v1894_v30  ;;  %v5977_v17 = vadd.f32 %v2016_v37, %v1895_v33  ;;  %v5979_v62 = vadd.f32 %v2017_v47, %v1896_v39  ;;  %v4794_v29 = vcombine.low %v2067_v44, %v2074_v57 }
  0xcd   : > { %v2081_v63 = vrot.slane %v2076_v19, %v5326_v53  ;;  %v2088_v26 = vrot.slane %v2083_v58, %v5326_v53  ;;  %v4800_v59 = vcombine.low %v2138_v5, %v2138_v5  ;;  %v4801_v28 = vcombine.high %v2138_v5, %v2138_v5 }
  0xce   : > { %v2026_v0 = vadd.f32 %v2018_v54, %v1897_v38  ;;  %v2114_v20 = vmul.bf16 %v4793_v56, %v4789_v18  ;;  %v5991_v36 = vcombine.low %v2139_v55, %v2139_v55  ;;  %v5993_v35 = vcombine.high %v2139_v55, %v2139_v55  ;;  %v4798_v56 = vld [vmem:[%s6854_s1 + $0x210] sm:$0xff] }
  0xcf   : > { %v2027_v30 = vadd.f32 %v2019_v21, %v1898_v23  ;;  %v4795_v27 = vcombine.low %v2081_v63, %v2088_v26  ;;  %v2115_v42 = vmul.bf16 %v4794_v29, %v4790_v7  ;;  %v2117_v40 = vunpack.c.l.bf16 %v2113_v9 }
  0xd0   : > { %v2118_v33 = vunpack.c.h.bf16 %v2113_v9  ;;  %v5995_v14 = vcombine.low %v2140_v3, %v2140_v3  ;;  %v5997_v45 = vcombine.high %v2140_v3, %v2140_v3  ;;  %v5999_v60 = vcombine.low %v2141_v10, %v2141_v10 }
  0xd1   : > { %v2116_v39 = vmul.bf16 %v4795_v27, %v4791_v16  ;;  %v6001_v38 = vcombine.high %v2141_v10, %v2141_v10  ;;  %v2163_v43 = vpack.i.b16 %v4800_v59, %v4800_v59  ;;  %v2170_v22 = vpack.i.b16 %v4801_v28, %v4801_v28  ;;  %v4799_v16 = vld [vmem:[%s6854_s1 + $0x218] sm:$0xff] }
  0xd2   : > { %v2119_v48 = vunpack.c.l.bf16 %v2114_v20  ;;  %v2120_v49 = vunpack.c.h.bf16 %v2114_v20  ;;  %v2177_v23 = vpack.i.b16 %v5991_v36, %v5991_v36  ;;  %v2184_v15 = vpack.i.b16 %v5993_v35, %v5993_v35 }
  0xd3   : > { %v2121_v32 = vunpack.c.l.bf16 %v2115_v42  ;;  %v2125_v4 = vadd.f32 %v2117_v40, %v2020_v50  ;;  %v2168_v41 = vrot.slane %v2163_v43, %v5278_v2  ;;  %v2175_v31 = vrot.slane %v2170_v22, %v5278_v2  ;;  %v4796_v50 = vld [vmem:[%s6854_s1 + $0x200] sm:$0xff] }
  0xd4   : > { %v2182_v37 = vrot.slane %v2177_v23, %v5278_v2  ;;  %v2189_v47 = vrot.slane %v2184_v15, %v5278_v2  ;;  %v2191_v12 = vpack.i.b16 %v5995_v14, %v5995_v14  ;;  %v2198_v13 = vpack.i.b16 %v5997_v45, %v5997_v45 }
  0xd5   : > { %v2122_v34 = vunpack.c.h.bf16 %v2115_v42  ;;  %v2123_v24 = vunpack.c.l.bf16 %v2116_v39  ;;  %v2205_v8 = vpack.i.b16 %v5999_v60, %v5999_v60  ;;  %v2212_v46 = vpack.i.b16 %v6001_v38, %v6001_v38 }
  0xd6   : > { %v2196_v61 = vrot.slane %v2191_v12, %v5278_v2  ;;  %v2203_v54 = vrot.slane %v2198_v13, %v5278_v2  ;;  %v4808_v44 = vcombine.low %v2168_v41, %v2175_v31  ;;  %v4809_v57 = vcombine.low %v2182_v37, %v2189_v47 }
  0xd7   : > { %v2210_v5 = vrot.slane %v2205_v8, %v5278_v2  ;;  %v2217_v21 = vrot.slane %v2212_v46, %v5278_v2  ;;  %v2267_v18 = vshrl.u32 %v4800_v59, 16  ;;  %v2274_v19 = vshrl.u32 %v4801_v28, 16  ;;  %v2372_v8 = vld [vmem:[%s5276_s19 + $0x40] sm:$0x22] }
  0xd8   : > { %v2124_v58 = vunpack.c.h.bf16 %v2116_v39  ;;  %v4810_v9 = vcombine.low %v2196_v61, %v2203_v54  ;;  %v2242_v55 = vmul.bf16 %v4808_v44, %v4796_v50  ;;  %v2243_v7 = vmul.bf16 %v4809_v57, %v4797_v1  ;;  %v2373_v54 = vld [vmem:[%s5276_s19 + $0x48] sm:$0x22] }
  0xd9   : > { %v2126_v29 = vadd.f32 %v2118_v33, %v5957_v25  ;;  %v4811_v63 = vcombine.low %v2210_v5, %v2217_v21  ;;  %v2268_v26 = vpack.i.b16 %v2267_v18, %v2267_v18  ;;  %v2275_v3 = vpack.i.b16 %v2274_v19, %v2274_v19  ;;  %v4814_v18 = vld [vmem:[%s6854_s1 + $0x230] sm:$0xff] }
  0xda   : > { %v2127_v10 = vadd.f32 %v2119_v48, %v5964_v6  ;;  %v2244_v20 = vmul.bf16 %v4810_v9, %v4798_v56  ;;  %v2281_v27 = vshrl.u32 %v5991_v36, 16  ;;  %v2288_v59 = vshrl.u32 %v5993_v35, 16 }
  0xdb   : > { %v2128_v28 = vadd.f32 %v2120_v49, %v5975_v11  ;;  %v2129_v42 = vadd.f32 %v2121_v32, %v5977_v17  ;;  %v2246_v40 = vunpack.c.l.bf16 %v2242_v55  ;;  %v2247_v25 = vunpack.c.h.bf16 %v2242_v55 }
  0xdc   : > { %v2130_v33 = vadd.f32 %v2122_v34, %v5979_v62  ;;  %v2131_v39 = vadd.f32 %v2123_v24, %v2026_v0  ;;  %v2132_v43 = vadd.f32 %v2124_v58, %v2027_v30  ;;  %v2248_v6 = vunpack.c.l.bf16 %v2243_v7  ;;  %v4812_v0 = vld [vmem:[%s6854_s1 + $0x220] sm:$0xff]  ;;  %v2374_v58 = vld [vmem:[%s5276_s19 + $0x50] sm:$0x22] }
  0xdd   : > { %v2245_v22 = vmul.bf16 %v4811_v63, %v4799_v16  ;;  %v2249_v48 = vunpack.c.h.bf16 %v2243_v7  ;;  %v2273_v23 = vrot.slane %v2268_v26, %v5278_v2  ;;  %v2280_v15 = vrot.slane %v2275_v3, %v5278_v2  ;;  %v2375_v63 = vld [vmem:[%s5276_s19 + $0x58] sm:$0x22] }
  0xde   : > { %v2250_v36 = vunpack.c.l.bf16 %v2244_v20  ;;  %v2251_v41 = vunpack.c.h.bf16 %v2244_v20  ;;  %v2282_v35 = vpack.i.b16 %v2281_v27, %v2281_v27  ;;  %v2289_v31 = vpack.i.b16 %v2288_v59, %v2288_v59  ;;  %v4815_v59 = vld [vmem:[%s6854_s1 + $0x238] sm:$0xff] }
  0xdf   : > { %v2254_v11 = vadd.f32 %v2246_v40, %v2125_v4  ;;  %v2255_v49 = vadd.f32 %v2247_v25, %v2126_v29  ;;  %v2295_v17 = vshrl.u32 %v5995_v14, 16  ;;  %v2302_v62 = vshrl.u32 %v5997_v45, 16  ;;  %v4813_v14 = vld [vmem:[%s6854_s1 + $0x228] sm:$0xff] }
  0xe0   : > { %v2287_v30 = vrot.slane %v2282_v35, %v5278_v2  ;;  %v2294_v32 = vrot.slane %v2289_v31, %v5278_v2  ;;  %v2309_v37 = vshrl.u32 %v5999_v60, 16  ;;  %v2316_v47 = vshrl.u32 %v6001_v38, 16 }
  0xe1   : > { %v2252_v4 = vunpack.c.l.bf16 %v2245_v22  ;;  %v2296_v12 = vpack.i.b16 %v2295_v17, %v2295_v17  ;;  %v2303_v45 = vpack.i.b16 %v2302_v62, %v2302_v62  ;;  %v4816_v13 = vcombine.low %v2273_v23, %v2280_v15 }
  0xe2   : > { %v2253_v34 = vunpack.c.h.bf16 %v2245_v22  ;;  %v2310_v24 = vpack.i.b16 %v2309_v37, %v2309_v37  ;;  %v2317_v50 = vpack.i.b16 %v2316_v47, %v2316_v47  ;;  %v4817_v1 = vcombine.low %v2287_v30, %v2294_v32  ;;  %v4821_v32 = vld [vmem:[%s6854_s1 + $0x248] sm:$0xff] }
  0xe3   : > { %v6057_v46 = vadd.f32 %v2248_v6, %v2127_v10  ;;  %v2301_v60 = vrot.slane %v2296_v12, %v5278_v2  ;;  %v2308_v38 = vrot.slane %v2303_v45, %v5278_v2  ;;  %v2347_v61 = vmul.bf16 %v4816_v13, %v4812_v0 }
  0xe4   : > { %v6062_v44 = vadd.f32 %v2249_v48, %v2128_v28  ;;  %v2315_v57 = vrot.slane %v2310_v24, %v5278_v2  ;;  %v2322_v56 = vrot.slane %v2317_v50, %v5278_v2  ;;  %v2348_v5 = vmul.bf16 %v4817_v1, %v4813_v14 }
  0xe5   : > { %v6066_v21 = vadd.f32 %v2250_v36, %v2129_v42  ;;  %v4818_v19 = vcombine.low %v2301_v60, %v2308_v38  ;;  %v4824_v9 = vcombine.low %v2372_v8, %v2372_v8  ;;  %v4825_v55 = vcombine.high %v2372_v8, %v2372_v8  ;;  %v4822_v38 = vld [vmem:[%s6854_s1 + $0x250] sm:$0xff] }
  0xe6   : > { %v2259_v7 = vadd.f32 %v2251_v41, %v2130_v33  ;;  %v2351_v29 = vunpack.c.l.bf16 %v2347_v61  ;;  %v6073_v26 = vcombine.low %v2373_v54, %v2373_v54  ;;  %v6075_v3 = vcombine.high %v2373_v54, %v2373_v54 }
  0xe7   : > { %v2260_v10 = vadd.f32 %v2252_v4, %v2131_v39  ;;  %v2261_v16 = vadd.f32 %v2253_v34, %v2132_v43  ;;  %v4819_v20 = vcombine.low %v2315_v57, %v2322_v56  ;;  %v2352_v27 = vunpack.c.h.bf16 %v2347_v61 }
  0xe8   : > { %v2349_v28 = vmul.bf16 %v4818_v19, %v4814_v18  ;;  %v2353_v42 = vunpack.c.l.bf16 %v2348_v5  ;;  %v6080_v40 = vcombine.low %v2374_v58, %v2374_v58  ;;  %v6082_v25 = vcombine.high %v2374_v58, %v2374_v58 }
  0xe9   : > { %v6084_v33 = vcombine.low %v2375_v63, %v2375_v63  ;;  %v6086_v6 = vcombine.high %v2375_v63, %v2375_v63  ;;  %v2397_v22 = vpack.i.b16 %v4824_v9, %v4824_v9  ;;  %v2404_v48 = vpack.i.b16 %v4825_v55, %v4825_v55 }
  0xea   : > { %v2354_v39 = vunpack.c.h.bf16 %v2348_v5  ;;  %v2359_v43 = vadd.f32 %v2351_v29, %v2254_v11  ;;  %v2411_v23 = vpack.i.b16 %v6073_v26, %v6073_v26  ;;  %v2418_v15 = vpack.i.b16 %v6075_v3, %v6075_v3  ;;  %v4820_v11 = vld [vmem:[%s6854_s1 + $0x240] sm:$0xff] }
  0xeb   : > { %v2350_v36 = vmul.bf16 %v4819_v20, %v4815_v59  ;;  %v2360_v41 = vadd.f32 %v2352_v27, %v2255_v49  ;;  %v2402_v35 = vrot.slane %v2397_v22, %v5322_v51  ;;  %v2409_v31 = vrot.slane %v2404_v48, %v5322_v51 }
  0xec   : > { %v2355_v17 = vunpack.c.l.bf16 %v2349_v28  ;;  %v2356_v62 = vunpack.c.h.bf16 %v2349_v28  ;;  %v2416_v0 = vrot.slane %v2411_v23, %v5322_v51  ;;  %v2423_v30 = vrot.slane %v2418_v15, %v5322_v51 }
  0xed   : > { %v2425_v49 = vpack.i.b16 %v6080_v40, %v6080_v40  ;;  %v2432_v37 = vpack.i.b16 %v6082_v25, %v6082_v25  ;;  %v2439_v47 = vpack.i.b16 %v6084_v33, %v6084_v33  ;;  %v2446_v4 = vpack.i.b16 %v6086_v6, %v6086_v6 }
  0xee   : > { %v4832_v14 = vcombine.low %v2402_v35, %v2409_v31  ;;  %v4833_v12 = vcombine.low %v2416_v0, %v2423_v30  ;;  %v2501_v45 = vshrl.u32 %v4824_v9, 16  ;;  %v2508_v13 = vshrl.u32 %v4825_v55, 16  ;;  %v4823_v9 = vld [vmem:[%s6854_s1 + $0x258] sm:$0xff] }
  0xef   : > { %v2430_v34 = vrot.slane %v2425_v49, %v5322_v51  ;;  %v2437_v24 = vrot.slane %v2432_v37, %v5322_v51  ;;  %v2444_v50 = vrot.slane %v2439_v47, %v5322_v51  ;;  %v2451_v1 = vrot.slane %v2446_v4, %v5322_v51  ;;  %v2606_v37 = vld [vmem:[%s5276_s19 + $0x40] sm:$0x44]  ;;  %v4837_v4 = vld [vmem:[%s6854_s1 + $0x268] sm:$0xff] }
  0xf0   : > { %v2357_v8 = vunpack.c.l.bf16 %v2350_v36  ;;  %v2358_v60 = vunpack.c.h.bf16 %v2350_v36  ;;  %v2476_v61 = vmul.bf16 %v4832_v14, %v4820_v11  ;;  %v2477_v54 = vmul.bf16 %v4833_v12, %v4821_v32 }
  0xf1   : > { %v4834_v57 = vcombine.low %v2430_v34, %v2437_v24  ;;  %v4835_v56 = vcombine.low %v2444_v50, %v2451_v1  ;;  %v2502_v5 = vpack.i.b16 %v2501_v45, %v2501_v45  ;;  %v2509_v18 = vpack.i.b16 %v2508_v13, %v2508_v13  ;;  %v2607_v45 = vld [vmem:[%s5276_s19 + $0x48] sm:$0x44]  ;;  %v4838_v24 = vld [vmem:[%s6854_s1 + $0x270] sm:$0xff] }
  0xf2   : > { %v2361_v19 = vadd.f32 %v2353_v42, %v6057_v46  ;;  %v2362_v58 = vadd.f32 %v2354_v39, %v6062_v44  ;;  %v2515_v55 = vshrl.u32 %v6073_v26, 16  ;;  %v2522_v29 = vshrl.u32 %v6075_v3, 16 }
  0xf3   : > { %v2363_v63 = vadd.f32 %v2355_v17, %v6066_v21  ;;  %v2478_v20 = vmul.bf16 %v4834_v57, %v4822_v38  ;;  %v2480_v27 = vunpack.c.l.bf16 %v2476_v61  ;;  %v2481_v59 = vunpack.c.h.bf16 %v2476_v61  ;;  %v2609_v38 = vld [vmem:[%s5276_s19 + $0x58] sm:$0x44] }
  0xf4   : > { %v2364_v28 = vadd.f32 %v2356_v62, %v2259_v7  ;;  %v2365_v22 = vadd.f32 %v2357_v8, %v2260_v10  ;;  %v2366_v48 = vadd.f32 %v2358_v60, %v2261_v16  ;;  %v2482_v23 = vunpack.c.l.bf16 %v2477_v54  ;;  %v4836_v10 = vld [vmem:[%s6854_s1 + $0x260] sm:$0xff]  ;;  %v2608_v60 = vld [vmem:[%s5276_s19 + $0x50] sm:$0x44] }
  0xf5   : > { %v2479_v46 = vmul.bf16 %v4835_v56, %v4823_v9  ;;  %v2483_v42 = vunpack.c.h.bf16 %v2477_v54  ;;  %v2507_v44 = vrot.slane %v2502_v5, %v5322_v51  ;;  %v2514_v39 = vrot.slane %v2509_v18, %v5322_v51  ;;  %v4839_v56 = vld [vmem:[%s6854_s1 + $0x278] sm:$0xff] }
  0xf6   : > { %v2516_v15 = vpack.i.b16 %v2515_v55, %v2515_v55  ;;  %v2523_v36 = vpack.i.b16 %v2522_v29, %v2522_v29  ;;  %v2529_v26 = vshrl.u32 %v6080_v40, 16  ;;  %v2536_v3 = vshrl.u32 %v6082_v25, 16 }
  0xf7   : > { %v2484_v21 = vunpack.c.l.bf16 %v2478_v20  ;;  %v2485_v35 = vunpack.c.h.bf16 %v2478_v20  ;;  %v2488_v31 = vadd.f32 %v2480_v27, %v2359_v43  ;;  %v6129_v7 = vadd.f32 %v2481_v59, %v2360_v41 }
  0xf8   : > { %v2521_v16 = vrot.slane %v2516_v15, %v5322_v51  ;;  %v2528_v17 = vrot.slane %v2523_v36, %v5322_v51  ;;  %v2530_v62 = vpack.i.b16 %v2529_v26, %v2529_v26  ;;  %v2537_v0 = vpack.i.b16 %v2536_v3, %v2536_v3 }
  0xf9   : > { %v6136_v40 = vadd.f32 %v2482_v23, %v2361_v19  ;;  %v2543_v25 = vshrl.u32 %v6084_v33, 16  ;;  %v2550_v30 = vshrl.u32 %v6086_v6, 16  ;;  %v4840_v43 = vcombine.low %v2507_v44, %v2514_v39 }
  0xfa   : > { %v2486_v41 = vunpack.c.l.bf16 %v2479_v46  ;;  %v2535_v11 = vrot.slane %v2530_v62, %v5322_v51  ;;  %v2542_v32 = vrot.slane %v2537_v0, %v5322_v51  ;;  %v4841_v49 = vcombine.low %v2521_v16, %v2528_v17  ;;  %v4845_v0 = vld [vmem:[%s6854_s1 + $0x288] sm:$0xff] }
  0xfb   : > { %v2487_v47 = vunpack.c.h.bf16 %v2479_v46  ;;  %v2544_v14 = vpack.i.b16 %v2543_v25, %v2543_v25  ;;  %v2551_v12 = vpack.i.b16 %v2550_v30, %v2550_v30  ;;  %v2581_v33 = vmul.bf16 %v4840_v43, %v4836_v10 }
  0xfc   : > { %v6147_v6 = vadd.f32 %v2483_v42, %v2362_v58  ;;  %v6149_v13 = vadd.f32 %v2484_v21, %v2363_v63  ;;  %v6151_v34 = vadd.f32 %v2485_v35, %v2364_v28  ;;  %v4842_v50 = vcombine.low %v2535_v11, %v2542_v32 }
  0xfd   : > { %v2549_v1 = vrot.slane %v2544_v14, %v5322_v51  ;;  %v2556_v8 = vrot.slane %v2551_v12, %v5322_v51  ;;  %v4848_v61 = vcombine.low %v2606_v37, %v2606_v37  ;;  %v4849_v54 = vcombine.high %v2606_v37, %v2606_v37 }
  0xfe   : > { %v2494_v57 = vadd.f32 %v2486_v41, %v2365_v22  ;;  %v2582_v5 = vmul.bf16 %v4841_v49, %v4837_v4  ;;  %v6163_v18 = vcombine.low %v2607_v45, %v2607_v45  ;;  %v6165_v19 = vcombine.high %v2607_v45, %v2607_v45  ;;  %v4846_v49 = vld [vmem:[%s6854_s1 + $0x290] sm:$0xff] }
  0xff   : > { %v2495_v58 = vadd.f32 %v2487_v47, %v2366_v48  ;;  %v4843_v9 = vcombine.low %v2549_v1, %v2556_v8  ;;  %v2583_v55 = vmul.bf16 %v4842_v50, %v4838_v24  ;;  %v2585_v29 = vunpack.c.l.bf16 %v2581_v33 }
 0x100   : > { %v2586_v63 = vunpack.c.h.bf16 %v2581_v33  ;;  %v6167_v20 = vcombine.low %v2608_v60, %v2608_v60  ;;  %v6169_v27 = vcombine.high %v2608_v60, %v2608_v60  ;;  %v6171_v59 = vcombine.low %v2609_v38, %v2609_v38 }
 0x101   : > { %v2584_v28 = vmul.bf16 %v4843_v9, %v4839_v56  ;;  %v6173_v22 = vcombine.high %v2609_v38, %v2609_v38  ;;  %v2631_v23 = vpack.i.b16 %v4848_v61, %v4848_v61  ;;  %v2638_v46 = vpack.i.b16 %v4849_v54, %v4849_v54  ;;  %v4847_v56 = vld [vmem:[%s6854_s1 + $0x298] sm:$0xff] }
 0x102   : > { %v2587_v42 = vunpack.c.l.bf16 %v2582_v5  ;;  %v2588_v44 = vunpack.c.h.bf16 %v2582_v5  ;;  %v2645_v48 = vpack.i.b16 %v6163_v18, %v6163_v18  ;;  %v2652_v39 = vpack.i.b16 %v6165_v19, %v6165_v19 }
 0x103   : > { %v2589_v15 = vunpack.c.l.bf16 %v2583_v55  ;;  %v2593_v36 = vadd.f32 %v2585_v29, %v2488_v31  ;;  %v2636_v26 = vrot.slane %v2631_v23, %v5324_v52  ;;  %v2643_v3 = vrot.slane %v2638_v46, %v5324_v52  ;;  %v4844_v31 = vld [vmem:[%s6854_s1 + $0x280] sm:$0xff] }
 0x104   : > { %v2650_v21 = vrot.slane %v2645_v48, %v5324_v52  ;;  %v2657_v35 = vrot.slane %v2652_v39, %v5324_v52  ;;  %v2659_v10 = vpack.i.b16 %v6167_v20, %v6167_v20  ;;  %v2666_v16 = vpack.i.b16 %v6169_v27, %v6169_v27 }
 0x105   : > { %v2590_v17 = vunpack.c.h.bf16 %v2583_v55  ;;  %v2591_v62 = vunpack.c.l.bf16 %v2584_v28  ;;  %v2673_v25 = vpack.i.b16 %v6171_v59, %v6171_v59  ;;  %v2680_v30 = vpack.i.b16 %v6173_v22, %v6173_v22 }
 0x106   : > { %v2664_v43 = vrot.slane %v2659_v10, %v5324_v52  ;;  %v2671_v41 = vrot.slane %v2666_v16, %v5324_v52  ;;  %v4856_v11 = vcombine.low %v2636_v26, %v2643_v3  ;;  %v4857_v32 = vcombine.low %v2650_v21, %v2657_v35 }
 0x107   : > { %v2678_v37 = vrot.slane %v2673_v25, %v5324_v52  ;;  %v2685_v47 = vrot.slane %v2680_v30, %v5324_v52  ;;  %v2735_v4 = vshrl.u32 %v4848_v61, 16  ;;  %v2742_v14 = vshrl.u32 %v4849_v54, 16  ;;  %v2840_v25 = vld [vmem:[%s5276_s19 + $0x40] sm:$0x88] }
 0x108   : > { %v2592_v12 = vunpack.c.h.bf16 %v2584_v28  ;;  %v4858_v33 = vcombine.low %v2664_v43, %v2671_v41  ;;  %v2710_v45 = vmul.bf16 %v4856_v11, %v4844_v31  ;;  %v2711_v24 = vmul.bf16 %v4857_v32, %v4845_v0  ;;  %v2841_v41 = vld [vmem:[%s5276_s19 + $0x48] sm:$0x88] }
 0x109   : > { %v2594_v50 = vadd.f32 %v2586_v63, %v6129_v7  ;;  %v4859_v1 = vcombine.low %v2678_v37, %v2685_v47  ;;  %v2736_v8 = vpack.i.b16 %v2735_v4, %v2735_v4  ;;  %v2743_v60 = vpack.i.b16 %v2742_v14, %v2742_v14  ;;  %v4862_v4 = vld [vmem:[%s6854_s1 + $0x2b0] sm:$0xff] }
 0x10a   : > { %v2595_v38 = vadd.f32 %v2587_v42, %v6136_v40  ;;  %v2712_v5 = vmul.bf16 %v4858_v33, %v4846_v49  ;;  %v2749_v9 = vshrl.u32 %v6163_v18, 16  ;;  %v2756_v61 = vshrl.u32 %v6165_v19, 16 }
 0x10b   : > { %v2596_v54 = vadd.f32 %v2588_v44, %v6147_v6  ;;  %v2597_v55 = vadd.f32 %v2589_v15, %v6149_v13  ;;  %v2714_v29 = vunpack.c.l.bf16 %v2710_v45  ;;  %v2715_v7 = vunpack.c.h.bf16 %v2710_v45 }
 0x10c   : > { %v2598_v63 = vadd.f32 %v2590_v17, %v6151_v34  ;;  %v2599_v28 = vadd.f32 %v2591_v62, %v2494_v57  ;;  %v2600_v23 = vadd.f32 %v2592_v12, %v2495_v58  ;;  %v2716_v40 = vunpack.c.l.bf16 %v2711_v24  ;;  %v4860_v57 = vld [vmem:[%s6854_s1 + $0x2a0] sm:$0xff]  ;;  %v2842_v12 = vld [vmem:[%s5276_s19 + $0x50] sm:$0x88] }
 0x10d   : > { %v2713_v46 = vmul.bf16 %v4859_v1, %v4847_v56  ;;  %v2717_v42 = vunpack.c.h.bf16 %v2711_v24  ;;  %v2741_v48 = vrot.slane %v2736_v8, %v5324_v52  ;;  %v2748_v39 = vrot.slane %v2743_v60, %v5324_v52  ;;  %v2843_v1 = vld [vmem:[%s5276_s19 + $0x58] sm:$0x88] }
 0x10e   : > { %v2718_v18 = vunpack.c.l.bf16 %v2712_v5  ;;  %v2719_v26 = vunpack.c.h.bf16 %v2712_v5  ;;  %v2750_v19 = vpack.i.b16 %v2749_v9, %v2749_v9  ;;  %v2757_v3 = vpack.i.b16 %v2756_v61, %v2756_v61  ;;  %v4863_v61 = vld [vmem:[%s6854_s1 + $0x2b8] sm:$0xff] }
 0x10f   : > { %v2722_v6 = vadd.f32 %v2714_v29, %v2593_v36  ;;  %v2723_v44 = vadd.f32 %v2715_v7, %v2594_v50  ;;  %v2763_v13 = vshrl.u32 %v6167_v20, 16  ;;  %v2770_v34 = vshrl.u32 %v6169_v27, 16  ;;  %v4861_v20 = vld [vmem:[%s6854_s1 + $0x2a8] sm:$0xff] }
 0x110   : > { %v2755_v58 = vrot.slane %v2750_v19, %v5324_v52  ;;  %v2762_v15 = vrot.slane %v2757_v3, %v5324_v52  ;;  %v2777_v21 = vshrl.u32 %v6171_v59, 16  ;;  %v2784_v35 = vshrl.u32 %v6173_v22, 16 }
 0x111   : > { %v2720_v36 = vunpack.c.l.bf16 %v2713_v46  ;;  %v2764_v10 = vpack.i.b16 %v2763_v13, %v2763_v13  ;;  %v2771_v27 = vpack.i.b16 %v2770_v34, %v2770_v34  ;;  %v4864_v16 = vcombine.low %v2741_v48, %v2748_v39 }
 0x112   : > { %v2721_v17 = vunpack.c.h.bf16 %v2713_v46  ;;  %v2778_v62 = vpack.i.b16 %v2777_v21, %v2777_v21  ;;  %v2785_v31 = vpack.i.b16 %v2784_v35, %v2784_v35  ;;  %v4865_v0 = vcombine.low %v2755_v58, %v2762_v15  ;;  %v4869_v15 = vld [vmem:[%s6854_s1 + $0x2c8] sm:$0xff] }
 0x113   : > { %v6229_v30 = vadd.f32 %v2716_v40, %v2595_v38  ;;  %v2769_v59 = vrot.slane %v2764_v10, %v5324_v52  ;;  %v2776_v22 = vrot.slane %v2771_v27, %v5324_v52  ;;  %v2815_v43 = vmul.bf16 %v4864_v16, %v4860_v57 }
 0x114   : > { %v6234_v11 = vadd.f32 %v2717_v42, %v2596_v54  ;;  %v2783_v32 = vrot.slane %v2778_v62, %v5324_v52  ;;  %v2790_v49 = vrot.slane %v2785_v31, %v5324_v52  ;;  %v2816_v37 = vmul.bf16 %v4865_v0, %v4861_v20 }
 0x115   : > { %v6238_v47 = vadd.f32 %v2718_v18, %v2597_v55  ;;  %v4866_v14 = vcombine.low %v2769_v59, %v2776_v22  ;;  %v4872_v33 = vcombine.low %v2840_v25, %v2840_v25  ;;  %v4873_v45 = vcombine.high %v2840_v25, %v2840_v25  ;;  %v4870_v22 = vld [vmem:[%s6854_s1 + $0x2d0] sm:$0xff] }
 0x116   : > { %v2727_v24 = vadd.f32 %v2719_v26, %v2598_v63  ;;  %v2819_v50 = vunpack.c.l.bf16 %v2815_v43  ;;  %v6245_v8 = vcombine.low %v2841_v41, %v2841_v41  ;;  %v6247_v60 = vcombine.high %v2841_v41, %v2841_v41 }
 0x117   : > { %v2728_v38 = vadd.f32 %v2720_v36, %v2599_v28  ;;  %v2729_v56 = vadd.f32 %v2721_v17, %v2600_v23  ;;  %v4867_v5 = vcombine.low %v2783_v32, %v2790_v49  ;;  %v2820_v9 = vunpack.c.h.bf16 %v2815_v43 }
 0x118   : > { %v2817_v54 = vmul.bf16 %v4866_v14, %v4862_v4  ;;  %v2821_v55 = vunpack.c.l.bf16 %v2816_v37  ;;  %v6252_v29 = vcombine.low %v2842_v12, %v2842_v12  ;;  %v6254_v7 = vcombine.high %v2842_v12, %v2842_v12 }
 0x119   : > { %v6256_v63 = vcombine.low %v2843_v1, %v2843_v1  ;;  %v6258_v40 = vcombine.high %v2843_v1, %v2843_v1  ;;  %v2865_v46 = vpack.i.b16 %v4872_v33, %v4872_v33  ;;  %v2872_v42 = vpack.i.b16 %v4873_v45, %v4873_v45 }
 0x11a   : > { %v2822_v28 = vunpack.c.h.bf16 %v2816_v37  ;;  %v2827_v23 = vadd.f32 %v2819_v50, %v2722_v6  ;;  %v2879_v48 = vpack.i.b16 %v6245_v8, %v6245_v8  ;;  %v2886_v39 = vpack.i.b16 %v6247_v60, %v6247_v60  ;;  %v4868_v6 = vld [vmem:[%s6854_s1 + $0x2c0] sm:$0xff] }
 0x11b   : > { %v2818_v18 = vmul.bf16 %v4867_v5, %v4863_v61  ;;  %v2828_v26 = vadd.f32 %v2820_v9, %v2723_v44  ;;  %v2870_v19 = vrot.slane %v2865_v46, %v5326_v53  ;;  %v2877_v3 = vrot.slane %v2872_v42, %v5326_v53 }
 0x11c   : > { %v2823_v13 = vunpack.c.l.bf16 %v2817_v54  ;;  %v2824_v34 = vunpack.c.h.bf16 %v2817_v54  ;;  %v2884_v57 = vrot.slane %v2879_v48, %v5326_v53  ;;  %v2891_v58 = vrot.slane %v2886_v39, %v5326_v53 }
 0x11d   : > { %v2893_v44 = vpack.i.b16 %v6252_v29, %v6252_v29  ;;  %v2900_v21 = vpack.i.b16 %v6254_v7, %v6254_v7  ;;  %v2907_v35 = vpack.i.b16 %v6256_v63, %v6256_v63  ;;  %v2914_v36 = vpack.i.b16 %v6258_v40, %v6258_v40 }
 0x11e   : > { %v4880_v20 = vcombine.low %v2870_v19, %v2877_v3  ;;  %v4881_v10 = vcombine.low %v2884_v57, %v2891_v58  ;;  %v2969_v27 = vshrl.u32 %v4872_v33, 16  ;;  %v2976_v16 = vshrl.u32 %v4873_v45, 16  ;;  %v4871_v33 = vld [vmem:[%s6854_s1 + $0x2d8] sm:$0xff] }
 0x11f   : > { %v2898_v17 = vrot.slane %v2893_v44, %v5326_v53  ;;  %v2905_v62 = vrot.slane %v2900_v21, %v5326_v53  ;;  %v2912_v31 = vrot.slane %v2907_v35, %v5326_v53  ;;  %v2919_v0 = vrot.slane %v2914_v36, %v5326_v53  ;;  %v3074_v21 = vld [vmem:[%s5276_s19 + $0x60] sm:$0x11]  ;;  %v4885_v36 = vld [vmem:[%s6854_s1 + $0x2e8] sm:$0xff] }
 0x120   : > { %v2825_v25 = vunpack.c.l.bf16 %v2818_v18  ;;  %v2826_v59 = vunpack.c.h.bf16 %v2818_v18  ;;  %v2944_v43 = vmul.bf16 %v4880_v20, %v4868_v6  ;;  %v2945_v41 = vmul.bf16 %v4881_v10, %v4869_v15 }
 0x121   : > { %v4882_v32 = vcombine.low %v2898_v17, %v2905_v62  ;;  %v4883_v49 = vcombine.low %v2912_v31, %v2919_v0  ;;  %v2970_v37 = vpack.i.b16 %v2969_v27, %v2969_v27  ;;  %v2977_v4 = vpack.i.b16 %v2976_v16, %v2976_v16  ;;  %v3075_v27 = vld [vmem:[%s5276_s19 + $0x68] sm:$0x11]  ;;  %v4886_v62 = vld [vmem:[%s6854_s1 + $0x2f0] sm:$0xff] }
 0x122   : > { %v2829_v14 = vadd.f32 %v2821_v55, %v6229_v30  ;;  %v2830_v12 = vadd.f32 %v2822_v28, %v6234_v11  ;;  %v2983_v45 = vshrl.u32 %v6245_v8, 16  ;;  %v2990_v50 = vshrl.u32 %v6247_v60, 16 }
 0x123   : > { %v2831_v1 = vadd.f32 %v2823_v13, %v6238_v47  ;;  %v2946_v5 = vmul.bf16 %v4882_v32, %v4870_v22  ;;  %v2948_v9 = vunpack.c.l.bf16 %v2944_v43  ;;  %v2949_v61 = vunpack.c.h.bf16 %v2944_v43  ;;  %v3077_v22 = vld [vmem:[%s5276_s19 + $0x78] sm:$0x11] }
 0x124   : > { %v2832_v54 = vadd.f32 %v2824_v34, %v2727_v24  ;;  %v2833_v46 = vadd.f32 %v2825_v25, %v2728_v38  ;;  %v2834_v42 = vadd.f32 %v2826_v59, %v2729_v56  ;;  %v2950_v48 = vunpack.c.l.bf16 %v2945_v41  ;;  %v4884_v38 = vld [vmem:[%s6854_s1 + $0x2e0] sm:$0xff]  ;;  %v3076_v59 = vld [vmem:[%s5276_s19 + $0x70] sm:$0x11] }
 0x125   : > { %v2947_v30 = vmul.bf16 %v4883_v49, %v4871_v33  ;;  %v2951_v55 = vunpack.c.h.bf16 %v2945_v41  ;;  %v2975_v11 = vrot.slane %v2970_v37, %v5326_v53  ;;  %v2982_v28 = vrot.slane %v2977_v4, %v5326_v53  ;;  %v4887_v49 = vld [vmem:[%s6854_s1 + $0x2f8] sm:$0xff] }
 0x126   : > { %v2984_v39 = vpack.i.b16 %v2983_v45, %v2983_v45  ;;  %v2991_v18 = vpack.i.b16 %v2990_v50, %v2990_v50  ;;  %v2997_v8 = vshrl.u32 %v6252_v29, 16  ;;  %v3004_v60 = vshrl.u32 %v6254_v7, 16 }
 0x127   : > { %v2952_v47 = vunpack.c.l.bf16 %v2946_v5  ;;  %v2953_v19 = vunpack.c.h.bf16 %v2946_v5  ;;  %v2956_v3 = vadd.f32 %v2948_v9, %v2827_v23  ;;  %v6301_v24 = vadd.f32 %v2949_v61, %v2828_v26 }
 0x128   : > { %v2989_v56 = vrot.slane %v2984_v39, %v5326_v53  ;;  %v2996_v13 = vrot.slane %v2991_v18, %v5326_v53  ;;  %v2998_v34 = vpack.i.b16 %v2997_v8, %v2997_v8  ;;  %v3005_v57 = vpack.i.b16 %v3004_v60, %v3004_v60 }
 0x129   : > { %v6308_v29 = vadd.f32 %v2950_v48, %v2829_v14  ;;  %v3011_v7 = vshrl.u32 %v6256_v63, 16  ;;  %v3018_v58 = vshrl.u32 %v6258_v40, 16  ;;  %v4888_v23 = vcombine.low %v2975_v11, %v2982_v28 }
 0x12a   : > { %v2954_v26 = vunpack.c.l.bf16 %v2947_v30  ;;  %v3003_v6 = vrot.slane %v2998_v34, %v5326_v53  ;;  %v3010_v15 = vrot.slane %v3005_v57, %v5326_v53  ;;  %v4889_v44 = vcombine.low %v2989_v56, %v2996_v13  ;;  %v4893_v57 = vld [vmem:[%s6854_s1 + $0x308] sm:$0xff] }
 0x12b   : > { %v2955_v35 = vunpack.c.h.bf16 %v2947_v30  ;;  %v3012_v20 = vpack.i.b16 %v3011_v7, %v3011_v7  ;;  %v3019_v10 = vpack.i.b16 %v3018_v58, %v3018_v58  ;;  %v3049_v63 = vmul.bf16 %v4888_v23, %v4884_v38 }
 0x12c   : > { %v6319_v40 = vadd.f32 %v2951_v55, %v2830_v12  ;;  %v6321_v16 = vadd.f32 %v2952_v47, %v2831_v1  ;;  %v6323_v17 = vadd.f32 %v2953_v19, %v2832_v54  ;;  %v4890_v31 = vcombine.low %v3003_v6, %v3010_v15 }
 0x12d   : > { %v3017_v0 = vrot.slane %v3012_v20, %v5326_v53  ;;  %v3024_v25 = vrot.slane %v3019_v10, %v5326_v53  ;;  %v4896_v43 = vcombine.low %v3074_v21, %v3074_v21  ;;  %v4897_v41 = vcombine.high %v3074_v21, %v3074_v21 }
 0x12e   : > { %v2962_v32 = vadd.f32 %v2954_v26, %v2833_v46  ;;  %v3050_v37 = vmul.bf16 %v4889_v44, %v4885_v36  ;;  %v6335_v4 = vcombine.low %v3075_v27, %v3075_v27  ;;  %v6337_v14 = vcombine.high %v3075_v27, %v3075_v27  ;;  %v4894_v44 = vld [vmem:[%s6854_s1 + $0x310] sm:$0xff] }
 0x12f   : > { %v2963_v12 = vadd.f32 %v2955_v35, %v2834_v42  ;;  %v4891_v33 = vcombine.low %v3017_v0, %v3024_v25  ;;  %v3051_v45 = vmul.bf16 %v4890_v31, %v4886_v62  ;;  %v3053_v50 = vunpack.c.l.bf16 %v3049_v63 }
 0x130   : > { %v3054_v1 = vunpack.c.h.bf16 %v3049_v63  ;;  %v6339_v5 = vcombine.low %v3076_v59, %v3076_v59  ;;  %v6341_v9 = vcombine.high %v3076_v59, %v3076_v59  ;;  %v6343_v61 = vcombine.low %v3077_v22, %v3077_v22 }
 0x131   : > { %v3052_v54 = vmul.bf16 %v4891_v33, %v4887_v49  ;;  %v6345_v46 = vcombine.high %v3077_v22, %v3077_v22  ;;  %v3099_v48 = vpack.i.b16 %v4896_v43, %v4896_v43  ;;  %v3106_v30 = vpack.i.b16 %v4897_v41, %v4897_v41  ;;  %v4895_v49 = vld [vmem:[%s6854_s1 + $0x318] sm:$0xff] }
 0x132   : > { %v3055_v55 = vunpack.c.l.bf16 %v3050_v37  ;;  %v3056_v11 = vunpack.c.h.bf16 %v3050_v37  ;;  %v3113_v42 = vpack.i.b16 %v6335_v4, %v6335_v4  ;;  %v3120_v28 = vpack.i.b16 %v6337_v14, %v6337_v14 }
 0x133   : > { %v3057_v39 = vunpack.c.l.bf16 %v3051_v45  ;;  %v3061_v18 = vadd.f32 %v3053_v50, %v2956_v3  ;;  %v3104_v8 = vrot.slane %v3099_v48, %v5278_v2  ;;  %v3111_v60 = vrot.slane %v3106_v30, %v5278_v2  ;;  %v4892_v3 = vld [vmem:[%s6854_s1 + $0x300] sm:$0xff] }
 0x134   : > { %v3118_v47 = vrot.slane %v3113_v42, %v5278_v2  ;;  %v3125_v19 = vrot.slane %v3120_v28, %v5278_v2  ;;  %v3127_v38 = vpack.i.b16 %v6339_v5, %v6339_v5  ;;  %v3134_v56 = vpack.i.b16 %v6341_v9, %v6341_v9 }
 0x135   : > { %v3058_v13 = vunpack.c.h.bf16 %v3051_v45  ;;  %v3059_v34 = vunpack.c.l.bf16 %v3052_v54  ;;  %v3141_v7 = vpack.i.b16 %v6343_v61, %v6343_v61  ;;  %v3148_v58 = vpack.i.b16 %v6345_v46, %v6345_v46 }
 0x136   : > { %v3132_v23 = vrot.slane %v3127_v38, %v5278_v2  ;;  %v3139_v26 = vrot.slane %v3134_v56, %v5278_v2  ;;  %v4904_v6 = vcombine.low %v3104_v8, %v3111_v60  ;;  %v4905_v15 = vcombine.low %v3118_v47, %v3125_v19 }
 0x137   : > { %v3146_v21 = vrot.slane %v3141_v7, %v5278_v2  ;;  %v3153_v35 = vrot.slane %v3148_v58, %v5278_v2  ;;  %v3203_v36 = vshrl.u32 %v4896_v43, 16  ;;  %v3210_v20 = vshrl.u32 %v4897_v41, 16  ;;  %v3308_v7 = vld [vmem:[%s5276_s19 + $0x60] sm:$0x22] }
 0x138   : > { %v3060_v10 = vunpack.c.h.bf16 %v3052_v54  ;;  %v4906_v63 = vcombine.low %v3132_v23, %v3139_v26  ;;  %v3178_v27 = vmul.bf16 %v4904_v6, %v4892_v3  ;;  %v3179_v62 = vmul.bf16 %v4905_v15, %v4893_v57  ;;  %v3309_v26 = vld [vmem:[%s5276_s19 + $0x68] sm:$0x22] }
 0x139   : > { %v3062_v31 = vadd.f32 %v3054_v1, %v6301_v24  ;;  %v4907_v0 = vcombine.low %v3146_v21, %v3153_v35  ;;  %v3204_v25 = vpack.i.b16 %v3203_v36, %v3203_v36  ;;  %v3211_v59 = vpack.i.b16 %v3210_v20, %v3210_v20  ;;  %v4910_v36 = vld [vmem:[%s6854_s1 + $0x330] sm:$0xff] }
 0x13a   : > { %v3063_v22 = vadd.f32 %v3055_v55, %v6308_v29  ;;  %v3180_v37 = vmul.bf16 %v4906_v63, %v4894_v44  ;;  %v3217_v33 = vshrl.u32 %v6335_v4, 16  ;;  %v3224_v43 = vshrl.u32 %v6337_v14, 16 }
 0x13b   : > { %v3064_v41 = vadd.f32 %v3056_v11, %v6319_v40  ;;  %v3065_v45 = vadd.f32 %v3057_v39, %v6321_v16  ;;  %v3182_v50 = vunpack.c.l.bf16 %v3178_v27  ;;  %v3183_v24 = vunpack.c.h.bf16 %v3178_v27 }
 0x13c   : > { %v3066_v1 = vadd.f32 %v3058_v13, %v6323_v17  ;;  %v3067_v54 = vadd.f32 %v3059_v34, %v2962_v32  ;;  %v3068_v48 = vadd.f32 %v3060_v10, %v2963_v12  ;;  %v3184_v29 = vunpack.c.l.bf16 %v3179_v62  ;;  %v4908_v32 = vld [vmem:[%s6854_s1 + $0x320] sm:$0xff]  ;;  %v3310_v10 = vld [vmem:[%s5276_s19 + $0x70] sm:$0x22] }
 0x13d   : > { %v3181_v30 = vmul.bf16 %v4907_v0, %v4895_v49  ;;  %v3185_v55 = vunpack.c.h.bf16 %v3179_v62  ;;  %v3209_v42 = vrot.slane %v3204_v25, %v5278_v2  ;;  %v3216_v28 = vrot.slane %v3211_v59, %v5278_v2  ;;  %v3311_v0 = vld [vmem:[%s5276_s19 + $0x78] sm:$0x22] }
 0x13e   : > { %v3186_v4 = vunpack.c.l.bf16 %v3180_v37  ;;  %v3187_v8 = vunpack.c.h.bf16 %v3180_v37  ;;  %v3218_v14 = vpack.i.b16 %v3217_v33, %v3217_v33  ;;  %v3225_v60 = vpack.i.b16 %v3224_v43, %v3224_v43  ;;  %v4911_v43 = vld [vmem:[%s6854_s1 + $0x338] sm:$0xff] }
 0x13f   : > { %v3190_v40 = vadd.f32 %v3182_v50, %v3061_v18  ;;  %v3191_v11 = vadd.f32 %v3183_v24, %v3062_v31  ;;  %v3231_v16 = vshrl.u32 %v6339_v5, 16  ;;  %v3238_v17 = vshrl.u32 %v6341_v9, 16  ;;  %v4909_v5 = vld [vmem:[%s6854_s1 + $0x328] sm:$0xff] }
 0x140   : > { %v3223_v12 = vrot.slane %v3218_v14, %v5278_v2  ;;  %v3230_v39 = vrot.slane %v3225_v60, %v5278_v2  ;;  %v3245_v47 = vshrl.u32 %v6343_v61, 16  ;;  %v3252_v19 = vshrl.u32 %v6345_v46, 16 }
 0x141   : > { %v3188_v18 = vunpack.c.l.bf16 %v3181_v30  ;;  %v3232_v38 = vpack.i.b16 %v3231_v16, %v3231_v16  ;;  %v3239_v9 = vpack.i.b16 %v3238_v17, %v3238_v17  ;;  %v4912_v56 = vcombine.low %v3209_v42, %v3216_v28 }
 0x142   : > { %v3189_v13 = vunpack.c.h.bf16 %v3181_v30  ;;  %v3246_v34 = vpack.i.b16 %v3245_v47, %v3245_v47  ;;  %v3253_v3 = vpack.i.b16 %v3252_v19, %v3252_v19  ;;  %v4913_v57 = vcombine.low %v3223_v12, %v3230_v39  ;;  %v4917_v39 = vld [vmem:[%s6854_s1 + $0x348] sm:$0xff] }
 0x143   : > { %v6401_v58 = vadd.f32 %v3184_v29, %v3063_v22  ;;  %v3237_v61 = vrot.slane %v3232_v38, %v5278_v2  ;;  %v3244_v46 = vrot.slane %v3239_v9, %v5278_v2  ;;  %v3283_v23 = vmul.bf16 %v4912_v56, %v4908_v32 }
 0x144   : > { %v6406_v6 = vadd.f32 %v3185_v55, %v3064_v41  ;;  %v3251_v15 = vrot.slane %v3246_v34, %v5278_v2  ;;  %v3258_v44 = vrot.slane %v3253_v3, %v5278_v2  ;;  %v3284_v21 = vmul.bf16 %v4913_v57, %v4909_v5 }
 0x145   : > { %v6410_v35 = vadd.f32 %v3186_v4, %v3065_v45  ;;  %v4914_v20 = vcombine.low %v3237_v61, %v3244_v46  ;;  %v4920_v63 = vcombine.low %v3308_v7, %v3308_v7  ;;  %v4921_v27 = vcombine.high %v3308_v7, %v3308_v7  ;;  %v4918_v46 = vld [vmem:[%s6854_s1 + $0x350] sm:$0xff] }
 0x146   : > { %v3195_v62 = vadd.f32 %v3187_v8, %v3066_v1  ;;  %v3287_v31 = vunpack.c.l.bf16 %v3283_v23  ;;  %v6417_v25 = vcombine.low %v3309_v26, %v3309_v26  ;;  %v6419_v59 = vcombine.high %v3309_v26, %v3309_v26 }
 0x147   : > { %v3196_v22 = vadd.f32 %v3188_v18, %v3067_v54  ;;  %v3197_v49 = vadd.f32 %v3189_v13, %v3068_v48  ;;  %v4915_v37 = vcombine.low %v3251_v15, %v3258_v44  ;;  %v3288_v33 = vunpack.c.h.bf16 %v3283_v23 }
 0x148   : > { %v3285_v41 = vmul.bf16 %v4914_v20, %v4910_v36  ;;  %v3289_v45 = vunpack.c.l.bf16 %v3284_v21  ;;  %v6424_v50 = vcombine.low %v3310_v10, %v3310_v10  ;;  %v6426_v24 = vcombine.high %v3310_v10, %v3310_v10 }
 0x149   : > { %v6428_v1 = vcombine.low %v3311_v0, %v3311_v0  ;;  %v6430_v29 = vcombine.high %v3311_v0, %v3311_v0  ;;  %v3333_v30 = vpack.i.b16 %v4920_v63, %v4920_v63  ;;  %v3340_v55 = vpack.i.b16 %v4921_v27, %v4921_v27 }
 0x14a   : > { %v3290_v54 = vunpack.c.h.bf16 %v3284_v21  ;;  %v3295_v48 = vadd.f32 %v3287_v31, %v3190_v40  ;;  %v3347_v42 = vpack.i.b16 %v6417_v25, %v6417_v25  ;;  %v3354_v28 = vpack.i.b16 %v6419_v59, %v6419_v59  ;;  %v4916_v40 = vld [vmem:[%s6854_s1 + $0x340] sm:$0xff] }
 0x14b   : > { %v3286_v4 = vmul.bf16 %v4915_v37, %v4911_v43  ;;  %v3296_v8 = vadd.f32 %v3288_v33, %v3191_v11  ;;  %v3338_v14 = vrot.slane %v3333_v30, %v5322_v51  ;;  %v3345_v60 = vrot.slane %v3340_v55, %v5322_v51 }
 0x14c   : > { %v3291_v16 = vunpack.c.l.bf16 %v3285_v41  ;;  %v3292_v17 = vunpack.c.h.bf16 %v3285_v41  ;;  %v3352_v32 = vrot.slane %v3347_v42, %v5322_v51  ;;  %v3359_v12 = vrot.slane %v3354_v28, %v5322_v51 }
 0x14d   : > { %v3361_v11 = vpack.i.b16 %v6424_v50, %v6424_v50  ;;  %v3368_v47 = vpack.i.b16 %v6426_v24, %v6426_v24  ;;  %v3375_v19 = vpack.i.b16 %v6428_v1, %v6428_v1  ;;  %v3382_v18 = vpack.i.b16 %v6430_v29, %v6430_v29 }
 0x14e   : > { %v4928_v5 = vcombine.low %v3338_v14, %v3345_v60  ;;  %v4929_v38 = vcombine.low %v3352_v32, %v3359_v12  ;;  %v3437_v9 = vshrl.u32 %v4920_v63, 16  ;;  %v3444_v56 = vshrl.u32 %v4921_v27, 16  ;;  %v4919_v63 = vld [vmem:[%s6854_s1 + $0x358] sm:$0xff] }
 0x14f   : > { %v3366_v13 = vrot.slane %v3361_v11, %v5322_v51  ;;  %v3373_v34 = vrot.slane %v3368_v47, %v5322_v51  ;;  %v3380_v3 = vrot.slane %v3375_v19, %v5322_v51  ;;  %v3387_v57 = vrot.slane %v3382_v18, %v5322_v51  ;;  %v3542_v47 = vld [vmem:[%s5276_s19 + $0x60] sm:$0x44]  ;;  %v4933_v18 = vld [vmem:[%s6854_s1 + $0x368] sm:$0xff] }
 0x150   : > { %v3293_v7 = vunpack.c.l.bf16 %v3286_v4  ;;  %v3294_v61 = vunpack.c.h.bf16 %v3286_v4  ;;  %v3412_v23 = vmul.bf16 %v4928_v5, %v4916_v40  ;;  %v3413_v26 = vmul.bf16 %v4929_v38, %v4917_v39 }
 0x151   : > { %v4930_v15 = vcombine.low %v3366_v13, %v3373_v34  ;;  %v4931_v44 = vcombine.low %v3380_v3, %v3387_v57  ;;  %v3438_v21 = vpack.i.b16 %v3437_v9, %v3437_v9  ;;  %v3445_v36 = vpack.i.b16 %v3444_v56, %v3444_v56  ;;  %v3543_v9 = vld [vmem:[%s5276_s19 + $0x68] sm:$0x44]  ;;  %v4934_v34 = vld [vmem:[%s6854_s1 + $0x370] sm:$0xff] }
 0x152   : > { %v3297_v20 = vadd.f32 %v3289_v45, %v6401_v58  ;;  %v3298_v10 = vadd.f32 %v3290_v54, %v6406_v6  ;;  %v3451_v27 = vshrl.u32 %v6417_v25, 16  ;;  %v3458_v31 = vshrl.u32 %v6419_v59, 16 }
 0x153   : > { %v3299_v0 = vadd.f32 %v3291_v16, %v6410_v35  ;;  %v3414_v37 = vmul.bf16 %v4930_v15, %v4918_v46  ;;  %v3416_v33 = vunpack.c.l.bf16 %v3412_v23  ;;  %v3417_v43 = vunpack.c.h.bf16 %v3412_v23  ;;  %v3545_v46 = vld [vmem:[%s5276_s19 + $0x78] sm:$0x44] }
 0x154   : > { %v3300_v41 = vadd.f32 %v3292_v17, %v3195_v62  ;;  %v3301_v30 = vadd.f32 %v3293_v7, %v3196_v22  ;;  %v3302_v55 = vadd.f32 %v3294_v61, %v3197_v49  ;;  %v3418_v42 = vunpack.c.l.bf16 %v3413_v26  ;;  %v4932_v22 = vld [vmem:[%s6854_s1 + $0x360] sm:$0xff]  ;;  %v3544_v61 = vld [vmem:[%s5276_s19 + $0x70] sm:$0x44] }
 0x155   : > { %v3415_v58 = vmul.bf16 %v4931_v44, %v4919_v63  ;;  %v3419_v45 = vunpack.c.h.bf16 %v3413_v26  ;;  %v3443_v6 = vrot.slane %v3438_v21, %v5322_v51  ;;  %v3450_v54 = vrot.slane %v3445_v36, %v5322_v51  ;;  %v4935_v44 = vld [vmem:[%s6854_s1 + $0x378] sm:$0xff] }
 0x156   : > { %v3452_v28 = vpack.i.b16 %v3451_v27, %v3451_v27  ;;  %v3459_v4 = vpack.i.b16 %v3458_v31, %v3458_v31  ;;  %v3465_v25 = vshrl.u32 %v6424_v50, 16  ;;  %v3472_v59 = vshrl.u32 %v6426_v24, 16 }
 0x157   : > { %v3420_v35 = vunpack.c.l.bf16 %v3414_v37  ;;  %v3421_v14 = vunpack.c.h.bf16 %v3414_v37  ;;  %v3424_v60 = vadd.f32 %v3416_v33, %v3295_v48  ;;  %v6473_v62 = vadd.f32 %v3417_v43, %v3296_v8 }
 0x158   : > { %v3457_v49 = vrot.slane %v3452_v28, %v5322_v51  ;;  %v3464_v16 = vrot.slane %v3459_v4, %v5322_v51  ;;  %v3466_v17 = vpack.i.b16 %v3465_v25, %v3465_v25  ;;  %v3473_v32 = vpack.i.b16 %v3472_v59, %v3472_v59 }
 0x159   : > { %v6480_v50 = vadd.f32 %v3418_v42, %v3297_v20  ;;  %v3479_v24 = vshrl.u32 %v6428_v1, 16  ;;  %v3486_v12 = vshrl.u32 %v6430_v29, 16  ;;  %v4936_v48 = vcombine.low %v3443_v6, %v3450_v54 }
 0x15a   : > { %v3422_v8 = vunpack.c.l.bf16 %v3415_v58  ;;  %v3471_v40 = vrot.slane %v3466_v17, %v5322_v51  ;;  %v3478_v39 = vrot.slane %v3473_v32, %v5322_v51  ;;  %v4937_v11 = vcombine.low %v3457_v49, %v3464_v16  ;;  %v4941_v32 = vld [vmem:[%s6854_s1 + $0x388] sm:$0xff] }
 0x15b   : > { %v3423_v19 = vunpack.c.h.bf16 %v3415_v58  ;;  %v3480_v5 = vpack.i.b16 %v3479_v24, %v3479_v24  ;;  %v3487_v38 = vpack.i.b16 %v3486_v12, %v3486_v12  ;;  %v3517_v1 = vmul.bf16 %v4936_v48, %v4932_v22 }
 0x15c   : > { %v6491_v29 = vadd.f32 %v3419_v45, %v3298_v10  ;;  %v6493_v56 = vadd.f32 %v3420_v35, %v3299_v0  ;;  %v6495_v13 = vadd.f32 %v3421_v14, %v3300_v41  ;;  %v4938_v3 = vcombine.low %v3471_v40, %v3478_v39 }
 0x15d   : > { %v3485_v57 = vrot.slane %v3480_v5, %v5322_v51  ;;  %v3492_v7 = vrot.slane %v3487_v38, %v5322_v51  ;;  %v4944_v23 = vcombine.low %v3542_v47, %v3542_v47  ;;  %v4945_v26 = vcombine.high %v3542_v47, %v3542_v47 }
 0x15e   : > { %v3430_v15 = vadd.f32 %v3422_v8, %v3301_v30  ;;  %v3518_v21 = vmul.bf16 %v4937_v11, %v4933_v18  ;;  %v6507_v36 = vcombine.low %v3543_v9, %v3543_v9  ;;  %v6509_v20 = vcombine.high %v3543_v9, %v3543_v9  ;;  %v4942_v11 = vld [vmem:[%s6854_s1 + $0x390] sm:$0xff] }
 0x15f   : > { %v3431_v10 = vadd.f32 %v3423_v19, %v3302_v55  ;;  %v4939_v63 = vcombine.low %v3485_v57, %v3492_v7  ;;  %v3519_v27 = vmul.bf16 %v4938_v3, %v4934_v34  ;;  %v3521_v31 = vunpack.c.l.bf16 %v3517_v1 }
 0x160   : > { %v3522_v0 = vunpack.c.h.bf16 %v3517_v1  ;;  %v6511_v37 = vcombine.low %v3544_v61, %v3544_v61  ;;  %v6513_v33 = vcombine.high %v3544_v61, %v3544_v61  ;;  %v6515_v43 = vcombine.low %v3545_v46, %v3545_v46 }
 0x161   : > { %v3520_v41 = vmul.bf16 %v4939_v63, %v4935_v44  ;;  %v6517_v30 = vcombine.high %v3545_v46, %v3545_v46  ;;  %v3567_v42 = vpack.i.b16 %v4944_v23, %v4944_v23  ;;  %v3574_v58 = vpack.i.b16 %v4945_v26, %v4945_v26  ;;  %v4943_v44 = vld [vmem:[%s6854_s1 + $0x398] sm:$0xff] }
 0x162   : > { %v3523_v45 = vunpack.c.l.bf16 %v3518_v21  ;;  %v3524_v6 = vunpack.c.h.bf16 %v3518_v21  ;;  %v3581_v55 = vpack.i.b16 %v6507_v36, %v6507_v36  ;;  %v3588_v54 = vpack.i.b16 %v6509_v20, %v6509_v20 }
 0x163   : > { %v3525_v28 = vunpack.c.l.bf16 %v3519_v27  ;;  %v3529_v4 = vadd.f32 %v3521_v31, %v3424_v60  ;;  %v3572_v25 = vrot.slane %v3567_v42, %v5324_v52  ;;  %v3579_v59 = vrot.slane %v3574_v58, %v5324_v52  ;;  %v4940_v60 = vld [vmem:[%s6854_s1 + $0x380] sm:$0xff] }
 0x164   : > { %v3586_v35 = vrot.slane %v3581_v55, %v5324_v52  ;;  %v3593_v14 = vrot.slane %v3588_v54, %v5324_v52  ;;  %v3595_v22 = vpack.i.b16 %v6511_v37, %v6511_v37  ;;  %v3602_v49 = vpack.i.b16 %v6513_v33, %v6513_v33 }
 0x165   : > { %v3526_v16 = vunpack.c.h.bf16 %v3519_v27  ;;  %v3527_v17 = vunpack.c.l.bf16 %v3520_v41  ;;  %v3609_v24 = vpack.i.b16 %v6515_v43, %v6515_v43  ;;  %v3616_v12 = vpack.i.b16 %v6517_v30, %v6517_v30 }
 0x166   : > { %v3600_v48 = vrot.slane %v3595_v22, %v5324_v52  ;;  %v3607_v8 = vrot.slane %v3602_v49, %v5324_v52  ;;  %v4952_v40 = vcombine.low %v3572_v25, %v3579_v59  ;;  %v4953_v39 = vcombine.low %v3586_v35, %v3593_v14 }
 0x167   : > { %v3614_v47 = vrot.slane %v3609_v24, %v5324_v52  ;;  %v3621_v19 = vrot.slane %v3616_v12, %v5324_v52  ;;  %v3671_v18 = vshrl.u32 %v4944_v23, 16  ;;  %v3678_v5 = vshrl.u32 %v4945_v26, 16  ;;  %v3776_v24 = vld [vmem:[%s5276_s19 + $0x60] sm:$0x88] }
 0x168   : > { %v3528_v38 = vunpack.c.h.bf16 %v3520_v41  ;;  %v4954_v1 = vcombine.low %v3600_v48, %v3607_v8  ;;  %v3646_v9 = vmul.bf16 %v4952_v40, %v4940_v60  ;;  %v3647_v34 = vmul.bf16 %v4953_v39, %v4941_v32  ;;  %v3777_v8 = vld [vmem:[%s5276_s19 + $0x68] sm:$0x88] }
 0x169   : > { %v3530_v3 = vadd.f32 %v3522_v0, %v6473_v62  ;;  %v4955_v57 = vcombine.low %v3614_v47, %v3621_v19  ;;  %v3672_v7 = vpack.i.b16 %v3671_v18, %v3671_v18  ;;  %v3679_v61 = vpack.i.b16 %v3678_v5, %v3678_v5  ;;  %v4958_v18 = vld [vmem:[%s6854_s1 + $0x3b0] sm:$0xff] }
 0x16a   : > { %v3531_v46 = vadd.f32 %v3523_v45, %v6480_v50  ;;  %v3648_v21 = vmul.bf16 %v4954_v1, %v4942_v11  ;;  %v3685_v63 = vshrl.u32 %v6507_v36, 16  ;;  %v3692_v23 = vshrl.u32 %v6509_v20, 16 }
 0x16b   : > { %v3532_v26 = vadd.f32 %v3524_v6, %v6491_v29  ;;  %v3533_v27 = vadd.f32 %v3525_v28, %v6493_v56  ;;  %v3650_v31 = vunpack.c.l.bf16 %v3646_v9  ;;  %v3651_v62 = vunpack.c.h.bf16 %v3646_v9 }
 0x16c   : > { %v3534_v0 = vadd.f32 %v3526_v16, %v6495_v13  ;;  %v3535_v41 = vadd.f32 %v3527_v17, %v3430_v15  ;;  %v3536_v42 = vadd.f32 %v3528_v38, %v3431_v10  ;;  %v3652_v50 = vunpack.c.l.bf16 %v3647_v34  ;;  %v4956_v15 = vld [vmem:[%s6854_s1 + $0x3a0] sm:$0xff]  ;;  %v3778_v38 = vld [vmem:[%s5276_s19 + $0x70] sm:$0x88] }
 0x16d   : > { %v3649_v58 = vmul.bf16 %v4955_v57, %v4943_v44  ;;  %v3653_v45 = vunpack.c.h.bf16 %v3647_v34  ;;  %v3677_v55 = vrot.slane %v3672_v7, %v5324_v52  ;;  %v3684_v54 = vrot.slane %v3679_v61, %v5324_v52  ;;  %v3779_v57 = vld [vmem:[%s5276_s19 + $0x78] sm:$0x88] }
 0x16e   : > { %v3654_v36 = vunpack.c.l.bf16 %v3648_v21  ;;  %v3655_v25 = vunpack.c.h.bf16 %v3648_v21  ;;  %v3686_v20 = vpack.i.b16 %v3685_v63, %v3685_v63  ;;  %v3693_v59 = vpack.i.b16 %v3692_v23, %v3692_v23  ;;  %v4959_v63 = vld [vmem:[%s6854_s1 + $0x3b8] sm:$0xff] }
 0x16f   : > { %v3658_v29 = vadd.f32 %v3650_v31, %v3529_v4  ;;  %v3659_v6 = vadd.f32 %v3651_v62, %v3530_v3  ;;  %v3699_v56 = vshrl.u32 %v6511_v37, 16  ;;  %v3706_v13 = vshrl.u32 %v6513_v33, 16  ;;  %v4957_v37 = vld [vmem:[%s6854_s1 + $0x3a8] sm:$0xff] }
 0x170   : > { %v3691_v10 = vrot.slane %v3686_v20, %v5324_v52  ;;  %v3698_v28 = vrot.slane %v3693_v59, %v5324_v52  ;;  %v3713_v35 = vshrl.u32 %v6515_v43, 16  ;;  %v3720_v14 = vshrl.u32 %v6517_v30, 16 }
 0x171   : > { %v3656_v4 = vunpack.c.l.bf16 %v3649_v58  ;;  %v3700_v22 = vpack.i.b16 %v3699_v56, %v3699_v56  ;;  %v3707_v33 = vpack.i.b16 %v3706_v13, %v3706_v13  ;;  %v4960_v49 = vcombine.low %v3677_v55, %v3684_v54 }
 0x172   : > { %v3657_v16 = vunpack.c.h.bf16 %v3649_v58  ;;  %v3714_v17 = vpack.i.b16 %v3713_v35, %v3713_v35  ;;  %v3721_v60 = vpack.i.b16 %v3720_v14, %v3720_v14  ;;  %v4961_v32 = vcombine.low %v3691_v10, %v3698_v28  ;;  %v4965_v10 = vld [vmem:[%s6854_s1 + $0x3c8] sm:$0xff] }
 0x173   : > { %v6573_v12 = vadd.f32 %v3652_v50, %v3531_v46  ;;  %v3705_v43 = vrot.slane %v3700_v22, %v5324_v52  ;;  %v3712_v30 = vrot.slane %v3707_v33, %v5324_v52  ;;  %v3751_v48 = vmul.bf16 %v4960_v49, %v4956_v15 }
 0x174   : > { %v6578_v40 = vadd.f32 %v3653_v45, %v3532_v26  ;;  %v3719_v39 = vrot.slane %v3714_v17, %v5324_v52  ;;  %v3726_v11 = vrot.slane %v3721_v60, %v5324_v52  ;;  %v3752_v47 = vmul.bf16 %v4961_v32, %v4957_v37 }
 0x175   : > { %v6582_v19 = vadd.f32 %v3654_v36, %v3533_v27  ;;  %v4962_v5 = vcombine.low %v3705_v43, %v3712_v30  ;;  %v4968_v1 = vcombine.low %v3776_v24, %v3776_v24  ;;  %v4969_v9 = vcombine.high %v3776_v24, %v3776_v24  ;;  %v4966_v43 = vld [vmem:[%s6854_s1 + $0x3d0] sm:$0xff] }
 0x176   : > { %v3663_v34 = vadd.f32 %v3655_v25, %v3534_v0  ;;  %v3755_v3 = vunpack.c.l.bf16 %v3751_v48  ;;  %v6589_v7 = vcombine.low %v3777_v8, %v3777_v8  ;;  %v6591_v61 = vcombine.high %v3777_v8, %v3777_v8 }
 0x177   : > { %v3664_v46 = vadd.f32 %v3656_v4, %v3535_v41  ;;  %v3665_v52 = vadd.f32 %v3657_v16, %v3536_v42  ;;  %v4963_v44 = vcombine.low %v3719_v39, %v3726_v11  ;;  %v3756_v21 = vunpack.c.h.bf16 %v3751_v48 }
 0x178   : > { %v3753_v23 = vmul.bf16 %v4962_v5, %v4958_v18  ;;  %v3757_v26 = vunpack.c.l.bf16 %v3752_v47  ;;  %v6596_v27 = vcombine.low %v3778_v38, %v3778_v38  ;;  %v6598_v31 = vcombine.high %v3778_v38, %v3778_v38  ;;  %v4967_v38 = vld [vmem:[%s6854_s1 + $0x3d8] sm:$0xff] }
 0x179   : > { %v6600_v62 = vcombine.low %v3779_v57, %v3779_v57  ;;  %v6602_v0 = vcombine.high %v3779_v57, %v3779_v57  ;;  %v3801_v50 = vpack.i.b16 %v4968_v1, %v4968_v1  ;;  %v3808_v58 = vpack.i.b16 %v4969_v9, %v4969_v9 }
 0x17a   : > { %v3758_v41 = vunpack.c.h.bf16 %v3752_v47  ;;  %v3763_v42 = vadd.f32 %v3755_v3, %v3658_v29  ;;  %v3815_v45 = vpack.i.b16 %v6589_v7, %v6589_v7  ;;  %v3822_v55 = vpack.i.b16 %v6591_v61, %v6591_v61  ;;  %v4964_v29 = vld [vmem:[%s6854_s1 + $0x3c0] sm:$0xff] }
 0x17b   : > { %v3754_v54 = vmul.bf16 %v4963_v44, %v4959_v63  ;;  %v3764_v36 = vadd.f32 %v3756_v21, %v3659_v6  ;;  %v3806_v25 = vrot.slane %v3801_v50, %v5326_v53  ;;  %v3813_v20 = vrot.slane %v3808_v58, %v5326_v53 }
 0x17c   : > { %v3759_v59 = vunpack.c.l.bf16 %v3753_v23  ;;  %v3760_v56 = vunpack.c.h.bf16 %v3753_v23  ;;  %v3820_v13 = vrot.slane %v3815_v45, %v5326_v53  ;;  %v3827_v15 = vrot.slane %v3822_v55, %v5326_v53 }
 0x17d   : > { %v3829_v6 = vpack.i.b16 %v6596_v27, %v6596_v27  ;;  %v3836_v28 = vpack.i.b16 %v6598_v31, %v6598_v31  ;;  %v3843_v35 = vpack.i.b16 %v6600_v62, %v6600_v62  ;;  %v3850_v14 = vpack.i.b16 %v6602_v0, %v6602_v0 }
 0x17e   : > { %v4976_v4 = vcombine.low %v3806_v25, %v3813_v20  ;;  %v4977_v37 = vcombine.low %v3820_v13, %v3827_v15  ;;  %v3905_v22 = vshrl.u32 %v4968_v1, 16  ;;  %v3912_v33 = vshrl.u32 %v4969_v9, 16 }
 0x17f   : > { %v3834_v49 = vrot.slane %v3829_v6, %v5326_v53  ;;  %v3841_v16 = vrot.slane %v3836_v28, %v5326_v53  ;;  %v3848_v17 = vrot.slane %v3843_v35, %v5326_v53  ;;  %v3855_v60 = vrot.slane %v3850_v14, %v5326_v53  ;;  %v4010_v6 = vld [vmem:[%s5276_s19 + $0x80] sm:$0x11]  ;;  %v4981_v35 = vld [vmem:[%s6854_s1 + $0x3e8] sm:$0xff] }
 0x180   : > { %v3761_v32 = vunpack.c.l.bf16 %v3754_v54  ;;  %v3762_v24 = vunpack.c.h.bf16 %v3754_v54  ;;  %v3880_v30 = vmul.bf16 %v4976_v4, %v4964_v29  ;;  %v3881_v48 = vmul.bf16 %v4977_v37, %v4965_v10  ;;  %v4011_v37 = vld [vmem:[%s5276_s19 + $0x88] sm:$0x11] }
 0x181   : > { %v4978_v8 = vcombine.low %v3834_v49, %v3841_v16  ;;  %v4979_v39 = vcombine.low %v3848_v17, %v3855_v60  ;;  %v3906_v11 = vpack.i.b16 %v3905_v22, %v3905_v22  ;;  %v3913_v47 = vpack.i.b16 %v3912_v33, %v3912_v33  ;;  %v4982_v49 = vld [vmem:[%s6854_s1 + $0x3f0] sm:$0xff] }
 0x182   : > { %v3765_v18 = vadd.f32 %v3757_v26, %v6573_v12  ;;  %v3766_v5 = vadd.f32 %v3758_v41, %v6578_v40  ;;  %v3919_v1 = vshrl.u32 %v6589_v7, 16  ;;  %v3926_v9 = vshrl.u32 %v6591_v61, 16 }
 0x183   : > { %v3767_v3 = vadd.f32 %v3759_v59, %v6582_v19  ;;  %v3882_v57 = vmul.bf16 %v4978_v8, %v4966_v43  ;;  %v3884_v44 = vunpack.c.l.bf16 %v3880_v30  ;;  %v3885_v21 = vunpack.c.h.bf16 %v3880_v30  ;;  %v4983_v8 = vld [vmem:[%s6854_s1 + $0x3f8] sm:$0xff] }
 0x184   : > { %v3768_v63 = vadd.f32 %v3760_v56, %v3663_v34  ;;  %v3769_v23 = vadd.f32 %v3761_v32, %v3664_v46  ;;  %v3770_v50 = vadd.f32 %v3762_v24, %v3665_v52  ;;  %v3886_v58 = vunpack.c.l.bf16 %v3881_v48  ;;  %v4980_v46 = vld [vmem:[%s6854_s1 + $0x3e0] sm:$0xff]  ;;  %v4012_v32 = vld [vmem:[%s5276_s19 + $0x90] sm:$0x11]  ;;  %v4013_v24 = vld [vmem:[%s5276_s19 + $0x98] sm:$0x11] }
 0x185   : > { %v3883_v12 = vmul.bf16 %v4979_v39, %v4967_v38  ;;  %v3887_v26 = vunpack.c.h.bf16 %v3881_v48  ;;  %v3911_v40 = vrot.slane %v3906_v11, %v5326_v53  ;;  %v3918_v41 = vrot.slane %v3913_v47, %v5326_v53 }
 0x186   : > { %v3920_v45 = vpack.i.b16 %v3919_v1, %v3919_v1  ;;  %v3927_v55 = vpack.i.b16 %v3926_v9, %v3926_v9  ;;  %v3933_v7 = vshrl.u32 %v6596_v27, 16  ;;  %v3940_v61 = vshrl.u32 %v6598_v31, 16 }
 0x187   : > { %v3888_v19 = vunpack.c.l.bf16 %v3882_v57  ;;  %v3889_v54 = vunpack.c.h.bf16 %v3882_v57  ;;  %v3892_v25 = vadd.f32 %v3884_v44, %v3763_v42  ;;  %v6645_v34 = vadd.f32 %v3885_v21, %v3764_v36 }
 0x188   : > { %v3925_v52 = vrot.slane %v3920_v45, %v5326_v53  ;;  %v3932_v20 = vrot.slane %v3927_v55, %v5326_v53  ;;  %v3934_v59 = vpack.i.b16 %v3933_v7, %v3933_v7  ;;  %v3941_v56 = vpack.i.b16 %v3940_v61, %v3940_v61 }
 0x189   : > { %v6652_v27 = vadd.f32 %v3886_v58, %v3765_v18  ;;  %v3947_v31 = vshrl.u32 %v6600_v62, 16  ;;  %v3954_v13 = vshrl.u32 %v6602_v0, 16  ;;  %v4984_v42 = vcombine.low %v3911_v40, %v3918_v41 }
 0x18a   : > { %v3890_v36 = vunpack.c.l.bf16 %v3883_v12  ;;  %v3939_v15 = vrot.slane %v3934_v59, %v5326_v53  ;;  %v3946_v29 = vrot.slane %v3941_v56, %v5326_v53  ;;  %v4985_v10 = vcombine.low %v3925_v52, %v3932_v20  ;;  %v4989_v20 = vld [vmem:[%s6854_s1 + $0x408] sm:$0xff] }
 0x18b   : > { %v3891_v28 = vunpack.c.h.bf16 %v3883_v12  ;;  %v3948_v14 = vpack.i.b16 %v3947_v31, %v3947_v31  ;;  %v3955_v4 = vpack.i.b16 %v3954_v13, %v3954_v13  ;;  %v3985_v62 = vmul.bf16 %v4984_v42, %v4980_v46 }
 0x18c   : > { %v6663_v0 = vadd.f32 %v3887_v26, %v3766_v5  ;;  %v6665_v22 = vadd.f32 %v3888_v19, %v3767_v3  ;;  %v6667_v33 = vadd.f32 %v3889_v54, %v3768_v63  ;;  %v4986_v16 = vcombine.low %v3939_v15, %v3946_v29  ;;  %v4990_v15 = vld [vmem:[%s6854_s1 + $0x410] sm:$0xff] }
 0x18d   : > { %v3953_v17 = vrot.slane %v3948_v14, %v5326_v53  ;;  %v3960_v60 = vrot.slane %v3955_v4, %v5326_v53  ;;  %v4992_v43 = vcombine.low %v4010_v6, %v4010_v6  ;;  %v4993_v30 = vcombine.high %v4010_v6, %v4010_v6 }
 0x18e   : > { %v3898_v48 = vadd.f32 %v3890_v36, %v3769_v23  ;;  %v3986_v39 = vmul.bf16 %v4985_v10, %v4981_v35  ;;  %v6679_v11 = vcombine.low %v4011_v37, %v4011_v37  ;;  %v6681_v47 = vcombine.high %v4011_v37, %v4011_v37 }
 0x18f   : > { %v3899_v18 = vadd.f32 %v3891_v28, %v3770_v50  ;;  %v4987_v5 = vcombine.low %v3953_v17, %v3960_v60  ;;  %v3987_v38 = vmul.bf16 %v4986_v16, %v4982_v49  ;;  %v3989_v1 = vunpack.c.l.bf16 %v3985_v62 }
 0x190   : > { %v3990_v9 = vunpack.c.h.bf16 %v3985_v62  ;;  %v6683_v53 = vcombine.low %v4012_v32, %v4012_v32  ;;  %v6685_v3 = vcombine.high %v4012_v32, %v4012_v32  ;;  %v6687_v57 = vcombine.low %v4013_v24, %v4013_v24  ;;  %v4991_v32 = vld [vmem:[%s6854_s1 + $0x418] sm:$0xff] }
 0x191   : > { %v3988_v44 = vmul.bf16 %v4987_v5, %v4983_v8  ;;  %v6689_v21 = vcombine.high %v4013_v24, %v4013_v24  ;;  %v4035_v63 = vpack.i.b16 %v4992_v43, %v4992_v43  ;;  %v4042_v23 = vpack.i.b16 %v4993_v30, %v4993_v30 }
 0x192   : > { %v3991_v58 = vunpack.c.l.bf16 %v3986_v39  ;;  %v3992_v12 = vunpack.c.h.bf16 %v3986_v39  ;;  %v4049_v50 = vpack.i.b16 %v6679_v11, %v6679_v11  ;;  %v4056_v26 = vpack.i.b16 %v6681_v47, %v6681_v47 }
 0x193   : > { %v3993_v40 = vunpack.c.l.bf16 %v3987_v38  ;;  %v3997_v41 = vadd.f32 %v3989_v1, %v3892_v25  ;;  %v4040_v45 = vrot.slane %v4035_v63, %v5278_v2  ;;  %v4047_v55 = vrot.slane %v4042_v23, %v5278_v2  ;;  %v4988_v25 = vld [vmem:[%s6854_s1 + $0x400] sm:$0xff] }
 0x194   : > { %v4054_v7 = vrot.slane %v4049_v50, %v5278_v2  ;;  %v4061_v61 = vrot.slane %v4056_v26, %v5278_v2  ;;  %v4063_v19 = vpack.i.b16 %v6683_v53, %v6683_v53  ;;  %v4070_v54 = vpack.i.b16 %v6685_v3, %v6685_v3 }
 0x195   : > { %v3994_v46 = vunpack.c.h.bf16 %v3987_v38  ;;  %v3995_v52 = vunpack.c.l.bf16 %v3988_v44  ;;  %v4077_v59 = vpack.i.b16 %v6687_v57, %v6687_v57  ;;  %v4084_v56 = vpack.i.b16 %v6689_v21, %v6689_v21 }
 0x196   : > { %v4068_v31 = vrot.slane %v4063_v19, %v5278_v2  ;;  %v4075_v13 = vrot.slane %v4070_v54, %v5278_v2  ;;  %v5000_v42 = vcombine.low %v4040_v45, %v4047_v55  ;;  %v5001_v36 = vcombine.low %v4054_v7, %v4061_v61 }
 0x197   : > { %v4082_v29 = vrot.slane %v4077_v59, %v5278_v2  ;;  %v4089_v10 = vrot.slane %v4084_v56, %v5278_v2  ;;  %v4139_v6 = vshrl.u32 %v4992_v43, 16  ;;  %v4146_v28 = vshrl.u32 %v4993_v30, 16  ;;  %v4245_v56 = vld [vmem:[%s5276_s19 + $0x88] sm:$0x22] }
 0x198   : > { %v3996_v35 = vunpack.c.h.bf16 %v3988_v44  ;;  %v5002_v14 = vcombine.low %v4068_v31, %v4075_v13  ;;  %v4114_v4 = vmul.bf16 %v5000_v42, %v4988_v25  ;;  %v4115_v62 = vmul.bf16 %v5001_v36, %v4989_v20  ;;  %v4244_v25 = vld [vmem:[%s5276_s19 + $0x80] sm:$0x22] }
 0x199   : > { %v3998_v37 = vadd.f32 %v3990_v9, %v6645_v34  ;;  %v5003_v49 = vcombine.low %v4082_v29, %v4089_v10  ;;  %v4140_v16 = vpack.i.b16 %v4139_v6, %v4139_v6  ;;  %v4147_v17 = vpack.i.b16 %v4146_v28, %v4146_v28  ;;  %v5006_v29 = vld [vmem:[%s6854_s1 + $0x430] sm:$0xff] }
 0x19a   : > { %v3999_v60 = vadd.f32 %v3991_v58, %v6652_v27  ;;  %v4116_v24 = vmul.bf16 %v5002_v14, %v4990_v15  ;;  %v4153_v8 = vshrl.u32 %v6679_v11, 16  ;;  %v4160_v43 = vshrl.u32 %v6681_v47, 16  ;;  %v4246_v6 = vld [vmem:[%s5276_s19 + $0x90] sm:$0x22] }
 0x19b   : > { %v4000_v30 = vadd.f32 %v3992_v12, %v6663_v0  ;;  %v4001_v39 = vadd.f32 %v3993_v40, %v6665_v22  ;;  %v4118_v5 = vunpack.c.l.bf16 %v4114_v4  ;;  %v4119_v34 = vunpack.c.h.bf16 %v4114_v4 }
 0x19c   : > { %v4002_v38 = vadd.f32 %v3994_v46, %v6667_v33  ;;  %v4003_v1 = vadd.f32 %v3995_v52, %v3898_v48  ;;  %v4004_v9 = vadd.f32 %v3996_v35, %v3899_v18  ;;  %v4120_v27 = vunpack.c.l.bf16 %v4115_v62  ;;  %v5004_v48 = vld [vmem:[%s6854_s1 + $0x420] sm:$0xff] }
 0x19d   : > { %v4117_v44 = vmul.bf16 %v5003_v49, %v4991_v32  ;;  %v4121_v63 = vunpack.c.h.bf16 %v4115_v62  ;;  %v4145_v23 = vrot.slane %v4140_v16, %v5278_v2  ;;  %v4152_v58 = vrot.slane %v4147_v17, %v5278_v2  ;;  %v4247_v62 = vld [vmem:[%s5276_s19 + $0x98] sm:$0x22] }
 0x19e   : > { %v4122_v11 = vunpack.c.l.bf16 %v4116_v24  ;;  %v4123_v50 = vunpack.c.h.bf16 %v4116_v24  ;;  %v4154_v47 = vpack.i.b16 %v4153_v8, %v4153_v8  ;;  %v4161_v26 = vpack.i.b16 %v4160_v43, %v4160_v43  ;;  %v5007_v32 = vld [vmem:[%s6854_s1 + $0x438] sm:$0xff] }
 0x19f   : > { %v4126_v0 = vadd.f32 %v4118_v5, %v3997_v41  ;;  %v4127_v12 = vadd.f32 %v4119_v34, %v3998_v37  ;;  %v4167_v22 = vshrl.u32 %v6683_v53, 16  ;;  %v4174_v33 = vshrl.u32 %v6685_v3, 16  ;;  %v5005_v53 = vld [vmem:[%s6854_s1 + $0x428] sm:$0xff] }
 0x1a0   : > { %v4159_v18 = vrot.slane %v4154_v47, %v5278_v2  ;;  %v4166_v40 = vrot.slane %v4161_v26, %v5278_v2  ;;  %v4181_v45 = vshrl.u32 %v6687_v57, 16  ;;  %v4188_v55 = vshrl.u32 %v6689_v21, 16 }
 0x1a1   : > { %v4124_v41 = vunpack.c.l.bf16 %v4117_v44  ;;  %v4168_v7 = vpack.i.b16 %v4167_v22, %v4167_v22  ;;  %v4175_v3 = vpack.i.b16 %v4174_v33, %v4174_v33  ;;  %v5008_v61 = vcombine.low %v4145_v23, %v4152_v58  ;;  %v5013_v33 = vld [vmem:[%s6854_s1 + $0x448] sm:$0xff] }
 0x1a2   : > { %v4125_v19 = vunpack.c.h.bf16 %v4117_v44  ;;  %v4182_v54 = vpack.i.b16 %v4181_v45, %v4181_v45  ;;  %v4189_v46 = vpack.i.b16 %v4188_v55, %v4188_v55  ;;  %v5009_v52 = vcombine.low %v4159_v18, %v4166_v40 }
 0x1a3   : > { %v6745_v20 = vadd.f32 %v4120_v27, %v3999_v60  ;;  %v4173_v57 = vrot.slane %v4168_v7, %v5278_v2  ;;  %v4180_v21 = vrot.slane %v4175_v3, %v5278_v2  ;;  %v4219_v59 = vmul.bf16 %v5008_v61, %v5004_v48 }
 0x1a4   : > { %v6750_v31 = vadd.f32 %v4121_v63, %v4000_v30  ;;  %v4187_v13 = vrot.slane %v4182_v54, %v5278_v2  ;;  %v4194_v42 = vrot.slane %v4189_v46, %v5278_v2  ;;  %v4220_v36 = vmul.bf16 %v5009_v52, %v5005_v53  ;;  %v5014_v52 = vld [vmem:[%s6854_s1 + $0x450] sm:$0xff] }
 0x1a5   : > { %v6754_v15 = vadd.f32 %v4122_v11, %v4001_v39  ;;  %v5010_v10 = vcombine.low %v4173_v57, %v4180_v21  ;;  %v5016_v28 = vcombine.low %v4244_v25, %v4244_v25  ;;  %v5017_v35 = vcombine.high %v4244_v25, %v4244_v25 }
 0x1a6   : > { %v6760_v14 = vadd.f32 %v4123_v50, %v4002_v38  ;;  %v4223_v4 = vunpack.c.l.bf16 %v4219_v59  ;;  %v6763_v37 = vcombine.low %v4245_v56, %v4245_v56  ;;  %v6765_v49 = vcombine.high %v4245_v56, %v4245_v56 }
 0x1a7   : > { %v4132_v2 = vadd.f32 %v4124_v41, %v4003_v1  ;;  %v4133_v16 = vadd.f32 %v4125_v19, %v4004_v9  ;;  %v5011_v17 = vcombine.low %v4187_v13, %v4194_v42  ;;  %v4224_v60 = vunpack.c.h.bf16 %v4219_v59 }
 0x1a8   : > { %v4221_v24 = vmul.bf16 %v5010_v10, %v5006_v29  ;;  %v4225_v8 = vunpack.c.l.bf16 %v4220_v36  ;;  %v6770_v43 = vcombine.low %v4246_v6, %v4246_v6  ;;  %v6772_v30 = vcombine.high %v4246_v6, %v4246_v6  ;;  %v5015_v29 = vld [vmem:[%s6854_s1 + $0x458] sm:$0xff] }
 0x1a9   : > { %v6774_v39 = vcombine.low %v4247_v62, %v4247_v62  ;;  %v6776_v5 = vcombine.high %v4247_v62, %v4247_v62  ;;  %v4269_v34 = vpack.i.b16 %v5016_v28, %v5016_v28  ;;  %v4276_v38 = vpack.i.b16 %v5017_v35, %v5017_v35 }
 0x1aa   : > { %v4226_v1 = vunpack.c.h.bf16 %v4220_v36  ;;  %v4231_v9 = vadd.f32 %v4223_v4, %v4126_v0  ;;  %v4283_v27 = vpack.i.b16 %v6763_v37, %v6763_v37  ;;  %v4290_v44 = vpack.i.b16 %v6765_v49, %v6765_v49  ;;  %v5012_v0 = vld [vmem:[%s6854_s1 + $0x440] sm:$0xff] }
 0x1ab   : > { %v4222_v63 = vmul.bf16 %v5011_v17, %v5007_v32  ;;  %v4232_v23 = vadd.f32 %v4224_v60, %v4127_v12  ;;  %v4274_v58 = vrot.slane %v4269_v34, %v5322_v51  ;;  %v4281_v11 = vrot.slane %v4276_v38, %v5322_v51 }
 0x1ac   : > { %v4227_v50 = vunpack.c.l.bf16 %v4221_v24  ;;  %v4228_v47 = vunpack.c.h.bf16 %v4221_v24  ;;  %v4288_v26 = vrot.slane %v4283_v27, %v5322_v51  ;;  %v4295_v22 = vrot.slane %v4290_v44, %v5322_v51 }
 0x1ad   : > { %v4297_v12 = vpack.i.b16 %v6770_v43, %v6770_v43  ;;  %v4304_v48 = vpack.i.b16 %v6772_v30, %v6772_v30  ;;  %v4311_v18 = vpack.i.b16 %v6774_v39, %v6774_v39  ;;  %v4318_v40 = vpack.i.b16 %v6776_v5, %v6776_v5 }
 0x1ae   : > { %v5024_v45 = vcombine.low %v4274_v58, %v4281_v11  ;;  %v5025_v55 = vcombine.low %v4288_v26, %v4295_v22  ;;  %v4373_v41 = vshrl.u32 %v5016_v28, 16  ;;  %v4380_v53 = vshrl.u32 %v5017_v35, 16 }
 0x1af   : > { %v4302_v7 = vrot.slane %v4297_v12, %v5322_v51  ;;  %v4309_v3 = vrot.slane %v4304_v48, %v5322_v51  ;;  %v4316_v61 = vrot.slane %v4311_v18, %v5322_v51  ;;  %v4323_v19 = vrot.slane %v4318_v40, %v5322_v51  ;;  %v5030_v12 = vld [vmem:[%s6854_s1 + $0x470] sm:$0xff] }
 0x1b0   : > { %v4229_v54 = vunpack.c.l.bf16 %v4222_v63  ;;  %v4230_v46 = vunpack.c.h.bf16 %v4222_v63  ;;  %v4348_v25 = vmul.bf16 %v5024_v45, %v5012_v0  ;;  %v4349_v57 = vmul.bf16 %v5025_v55, %v5013_v33 }
 0x1b1   : > { %v5026_v21 = vcombine.low %v4302_v7, %v4309_v3  ;;  %v5027_v59 = vcombine.low %v4316_v61, %v4323_v19  ;;  %v4374_v56 = vpack.i.b16 %v4373_v41, %v4373_v41  ;;  %v4381_v13 = vpack.i.b16 %v4380_v53, %v4380_v53  ;;  %v5031_v19 = vld [vmem:[%s6854_s1 + $0x478] sm:$0xff] }
 0x1b2   : > { %v4233_v42 = vadd.f32 %v4225_v8, %v6745_v20  ;;  %v4234_v36 = vadd.f32 %v4226_v1, %v6750_v31  ;;  %v4387_v10 = vshrl.u32 %v6763_v37, 16  ;;  %v4394_v6 = vshrl.u32 %v6765_v49, 16 }
 0x1b3   : > { %v4350_v28 = vmul.bf16 %v5026_v21, %v5014_v52  ;;  %v4352_v35 = vunpack.c.l.bf16 %v4348_v25  ;;  %v4353_v4 = vunpack.c.h.bf16 %v4348_v25  ;;  %v4354_v62 = vunpack.c.l.bf16 %v4349_v57 }
 0x1b4   : > { %v4235_v17 = vadd.f32 %v4227_v50, %v6754_v15  ;;  %v4236_v60 = vadd.f32 %v4228_v47, %v6760_v14  ;;  %v4237_v32 = vadd.f32 %v4229_v54, %v4132_v2  ;;  %v4238_v20 = vadd.f32 %v4230_v46, %v4133_v16  ;;  %v5028_v14 = vld [vmem:[%s6854_s1 + $0x460] sm:$0xff] }
 0x1b5   : > { %v4351_v24 = vmul.bf16 %v5027_v59, %v5015_v29  ;;  %v4355_v31 = vunpack.c.h.bf16 %v4349_v57  ;;  %v4379_v8 = vrot.slane %v4374_v56, %v5322_v51  ;;  %v4386_v34 = vrot.slane %v4381_v13, %v5322_v51 }
 0x1b6   : > { %v4388_v38 = vpack.i.b16 %v4387_v10, %v4387_v10  ;;  %v4395_v37 = vpack.i.b16 %v4394_v6, %v4394_v6  ;;  %v4401_v49 = vshrl.u32 %v6770_v43, 16  ;;  %v4408_v1 = vshrl.u32 %v6772_v30, 16  ;;  %v5029_v43 = vld [vmem:[%s6854_s1 + $0x468] sm:$0xff] }
 0x1b7   : > { %v4356_v27 = vunpack.c.l.bf16 %v4350_v28  ;;  %v4360_v44 = vadd.f32 %v4352_v35, %v4231_v9  ;;  %v4361_v63 = vadd.f32 %v4353_v4, %v4232_v23  ;;  %v4362_v15 = vadd.f32 %v4354_v62, %v4233_v42 }
 0x1b8   : > { %v4393_v2 = vrot.slane %v4388_v38, %v5322_v51  ;;  %v4400_v16 = vrot.slane %v4395_v37, %v5322_v51  ;;  %v4402_v58 = vpack.i.b16 %v4401_v49, %v4401_v49  ;;  %v4409_v11 = vpack.i.b16 %v4408_v1, %v4408_v1 }
 0x1b9   : > { %v4363_v50 = vadd.f32 %v4355_v31, %v4234_v36  ;;  %v4415_v30 = vshrl.u32 %v6774_v39, 16  ;;  %v4422_v9 = vshrl.u32 %v6776_v5, 16  ;;  %v5032_v23 = vcombine.low %v4379_v8, %v4386_v34 }
 0x1ba   : > { %v4357_v47 = vunpack.c.h.bf16 %v4350_v28  ;;  %v4407_v26 = vrot.slane %v4402_v58, %v5322_v51  ;;  %v4414_v22 = vrot.slane %v4409_v11, %v5322_v51  ;;  %v5033_v0 = vcombine.low %v4393_v2, %v4400_v16 }
 0x1bb   : > { %v4358_v33 = vunpack.c.l.bf16 %v4351_v24  ;;  %v4416_v48 = vpack.i.b16 %v4415_v30, %v4415_v30  ;;  %v4423_v18 = vpack.i.b16 %v4422_v9, %v4422_v9  ;;  %v4453_v40 = vmul.bf16 %v5032_v23, %v5028_v14 }
 0x1bc   : > { %v4359_v45 = vunpack.c.h.bf16 %v4351_v24  ;;  %v4364_v39 = vadd.f32 %v4356_v27, %v4235_v17  ;;  %v5034_v55 = vcombine.low %v4407_v26, %v4414_v22  ;;  %v4454_v5 = vmul.bf16 %v5033_v0, %v5029_v43 }
 0x1bd   : > { %v4421_v41 = vrot.slane %v4416_v48, %v5322_v51  ;;  %v4428_v53 = vrot.slane %v4423_v18, %v5322_v51  ;;  %v4457_v7 = vunpack.c.l.bf16 %v4453_v40  ;;  %v4458_v3 = vunpack.c.h.bf16 %v4453_v40 }
 0x1be   : > { %v4365_v61 = vadd.f32 %v4357_v47, %v4236_v60  ;;  %v4455_v54 = vmul.bf16 %v5034_v55, %v5030_v12  ;;  %v4459_v46 = vunpack.c.l.bf16 %v4454_v5  ;;  %v4460_v52 = vunpack.c.h.bf16 %v4454_v5 }
 0x1bf   : > { %v5035_v25 = vcombine.low %v4421_v41, %v4428_v53  ;;  %v4465_v57 = vadd.f32 %v4457_v7, %v4360_v44  ;;  %v4466_v21 = vadd.f32 %v4458_v3, %v4361_v63  ;;  %v4366_v42 = vadd.f32 %v4358_v33, %v4237_v32 }
 0x1c0   : > { %v4461_v59 = vunpack.c.l.bf16 %v4455_v54  ;;  %v4462_v56 = vunpack.c.h.bf16 %v4455_v54  ;;  %v4467_v51 = vadd.f32 %v4459_v46, %v4362_v15  ;;  %v4468_v13 = vadd.f32 %v4460_v52, %v4363_v50 }
 0x1c1   : > { %v4367_v36 = vadd.f32 %v4359_v45, %v4238_v20  ;;  %v4456_v29 = vmul.bf16 %v5035_v25, %v5031_v19  ;;  %4473 = vst [vmem:[%s252_s10] sm:$0xff] %v4465_v57  ;;  %4474 = vst [vmem:[%s252_s10 + $0x8] sm:$0xff] %v4466_v21 }
 0x1c2   : > { %v4469_v10 = vadd.f32 %v4461_v59, %v4364_v39  ;;  %v4470_v6 = vadd.f32 %v4462_v56, %v4365_v61  ;;  %4475 = vst [vmem:[%s252_s10 + $0x10] sm:$0xff] %v4467_v51  ;;  %4476 = vst [vmem:[%s252_s10 + $0x18] sm:$0xff] %v4468_v13 }
 0x1c3   : > { %v4463_v28 = vunpack.c.l.bf16 %v4456_v29  ;;  %v4464_v35 = vunpack.c.h.bf16 %v4456_v29 }
 0x1c4   : > { %4477 = vst [vmem:[%s252_s10 + $0x20] sm:$0xff] %v4469_v10  ;;  %4478 = vst [vmem:[%s252_s10 + $0x28] sm:$0xff] %v4470_v6 }
 0x1c5   : > { %v4471_v4 = vadd.f32 %v4463_v28, %v4366_v42  ;;  %v4472_v62 = vadd.f32 %v4464_v35, %v4367_v36 }
 0x1c7   : > { %4479 = vst [vmem:[%s252_s10 + $0x30] sm:$0xff] %v4471_v4  ;;  %4480 = vst [vmem:[%s252_s10 + $0x38] sm:$0xff] %v4472_v62 }
 0x1c8 PF: > { %s13_s14 = sadd.s32 1, %s5230_s14   ;;  %s6857_s12 = smov %s5226_s13 }
 0x1c9   : > { %p10_p5 = scmp.ge.s32.totalorder %s13_s14, 4   ;;  %s6858_s13 = smov %s6860_s15 }
 0x1cb   :  { %12 = sbr.rel (!%p10_p5) target bundleno = 2 (0x2), region = 103 }

</bundles_post_ra>
